<compile_context>
chip_gen: v7x
topology: tpu7x:2x2x1
jax: 0.10.0
libtpu: 0.0.40
codegen_flags: <defaults>
</compile_context>

<pallas_src>
import jax
import jax.numpy as jnp
import numpy as np
from jax import lax
from jax.experimental import pallas as pl
from jax.experimental.pallas import tpu as pltpu

EPS = 1e-5      # nn.BatchNorm2d default eps
LANE = 128      # TPU lane width


def _round_up(x, m):
    return (x + m - 1) // m * m


# ------------------------------ Pallas kernels ------------------------------ #
def _conv_stats_kernel(xhalo_ref, w_ref, conv_ref, sum_ref, ssq_ref):
    """3x3 conv as 9 shifted MXU dots + per-channel (sum, sumsq) partial stats.

    xhalo_ref: (1, H+2, W+2, Cp)  spatially zero-padded NHWC tile
    w_ref    : (9, Cp, Co)        weights, index = kh*3 + kw
    conv_ref : (1, H, W, Co)      raw conv output (f32)
    sum_ref  : (1, 1, Co)         per-channel sum over this tile's H*W
    ssq_ref  : (1, 1, Co)         per-channel sum of squares
    """
    _, hp, wp, cp = xhalo_ref.shape
    h, w = hp - 2, wp - 2
    co = w_ref.shape[2]

    acc = jnp.zeros((h * w, co), jnp.float32)
    for di in range(3):
        for dj in range(3):
            patch = xhalo_ref[0, di:di + h, dj:dj + w, :].reshape(h * w, cp)
            acc = acc + jnp.dot(patch, w_ref[di * 3 + dj],
                                preferred_element_type=jnp.float32)

    conv_ref[0] = acc.reshape(h, w, co).astype(conv_ref.dtype)
    sum_ref[0] = jnp.sum(acc, axis=0, keepdims=True)
    ssq_ref[0] = jnp.sum(acc * acc, axis=0, keepdims=True)


def _bn_relu_conv_stats_kernel(conv1_ref, scale_ref, shift_ref, w_ref,
                               conv2_ref, sum_ref, ssq_ref, halo_ref):
    """BN1 (folded scale/shift) + ReLU, then 3x3 conv2 + partial stats.

    The BN1+ReLU activation lives only in the VMEM halo scratch (never hits HBM).
    """
    _, h, w, cp = conv1_ref.shape
    co = w_ref.shape[2]

    c1 = conv1_ref[0].reshape(h * w, cp)
    a = jnp.maximum(c1 * scale_ref[...] + shift_ref[...], 0.0)   # (H*W, Cp)

    halo_ref[...] = jnp.zeros_like(halo_ref)                     # zero the 1-px border
    halo_ref[1:h + 1, 1:w + 1, :] = a.reshape(h, w, cp)

    acc = jnp.zeros((h * w, co), jnp.float32)
    for di in range(3):
        for dj in range(3):
            patch = halo_ref[di:di + h, dj:dj + w, :].reshape(h * w, cp)
            acc = acc + jnp.dot(patch, w_ref[di * 3 + dj],
                                preferred_element_type=jnp.float32)

    conv2_ref[0] = acc.reshape(h, w, co).astype(conv2_ref.dtype)
    sum_ref[0] = jnp.sum(acc, axis=0, keepdims=True)
    ssq_ref[0] = jnp.sum(acc * acc, axis=0, keepdims=True)


def _bn_relu_residual_kernel(conv2_ref, scale_ref, shift_ref, res_ref, out_ref):
    """BN2 (folded scale/shift) + ReLU + residual add."""
    _, h, w, cp = conv2_ref.shape
    c2 = conv2_ref[0].reshape(h * w, cp)
    y = jnp.maximum(c2 * scale_ref[...] + shift_ref[...], 0.0)
    y = y + res_ref[0].reshape(h * w, cp).astype(jnp.float32)
    out_ref[0] = y.reshape(h, w, cp).astype(out_ref.dtype)


# -------------------------------- JAX glue ---------------------------------- #
def _prep_weights(w_oihw, cp_in, cp_out):
    """torch (Cout, Cin, KH, KW) -> (KH*KW, Cp_in, Cp_out) zero-padded, f32."""
    cout, cin, kh, kw = w_oihw.shape
    wt = jnp.transpose(w_oihw, (2, 3, 1, 0)).reshape(kh * kw, cin, cout)
    return (jnp.zeros((kh * kw, cp_in, cp_out), jnp.float32)
            .at[:, :cin, :cout].set(wt.astype(jnp.float32)))


def _fold_bn(sums, sqs, m, gamma_p, beta_p):
    """Reduce per-tile partial stats and fold BN into per-channel scale/shift."""
    total = jnp.sum(sums, axis=0).reshape(1, -1)     # (1, Cp)
    totsq = jnp.sum(sqs, axis=0).reshape(1, -1)      # (1, Cp)
    mean = total / m
    var = jnp.maximum(totsq / m - mean * mean, 0.0)  # biased (train-mode) variance
    scale = gamma_p.reshape(1, -1) * lax.rsqrt(var + EPS)
    shift = beta_p.reshape(1, -1) - mean * scale
    return scale.astype(jnp.float32), shift.astype(jnp.float32)


def residual_block(x_nchw, params):
    """ResidualBlock.forward. Input/output in NCHW to match the PyTorch module."""
    (w1, _b1, g1, be1), (w2, _b2, g2, be2) = params   # conv bias cancelled by BN
    n, c, h, w = x_nchw.shape
    cp = _round_up(c, LANE)
    m = n * h * w

    x = jnp.transpose(x_nchw, (0, 2, 3, 1)).astype(jnp.float32)       # NCHW -> NHWC
    x_p = jnp.pad(x, ((0, 0), (0, 0), (0, 0), (0, cp - c)))           # lane-dense channels
    x_halo = jnp.pad(x_p, ((0, 0), (1, 1), (1, 1), (0, 0)))           # spatial halo

    w1p = _prep_weights(w1, cp, cp)
    w2p = _prep_weights(w2, cp, cp)
    g1p = jnp.pad(g1.astype(jnp.float32), (0, cp - c))
    be1p = jnp.pad(be1.astype(jnp.float32), (0, cp - c))
    g2p = jnp.pad(g2.astype(jnp.float32), (0, cp - c))
    be2p = jnp.pad(be2.astype(jnp.float32), (0, cp - c))

    par = pltpu.CompilerParams(dimension_semantics=("parallel",))
    conv_flops = 2 * m * 9 * cp * cp

    img_spec = pl.BlockSpec((1, h, w, cp), lambda i: (i, 0, 0, 0))
    halo_spec = pl.BlockSpec((1, h + 2, w + 2, cp), lambda i: (i, 0, 0, 0))
    w_spec = pl.BlockSpec((9, cp, cp), lambda i: (0, 0, 0))
    vec_spec = pl.BlockSpec((1, cp), lambda i: (0, 0))
    stat_spec = pl.BlockSpec((1, 1, cp), lambda i: (i, 0, 0))

    img_shape = jax.ShapeDtypeStruct((n, h, w, cp), jnp.float32)
    stat_shape = jax.ShapeDtypeStruct((n, 1, cp), jnp.float32)

    # ---- pass 1: conv1 + partial batch stats ----
    conv1, sum1, ssq1 = pl.pallas_call(
        _conv_stats_kernel,
        grid=(n,),
        in_specs=[halo_spec, w_spec],
        out_specs=(img_spec, stat_spec, stat_spec),
        out_shape=(img_shape, stat_shape, stat_shape),
        compiler_params=par,
        cost_estimate=pl.CostEstimate(
            flops=conv_flops, transcendentals=0,
            bytes_accessed=4 * (x_halo.size + w1p.size + (n * h * w + 2 * n) * cp)),
    )(x_halo, w1p)
    scale1, shift1 = _fold_bn(sum1, ssq1, m, g1p, be1p)

    # ---- pass 2: BN1 + ReLU (VMEM only) -> conv2 + partial batch stats ----
    conv2, sum2, ssq2 = pl.pallas_call(
        _bn_relu_conv_stats_kernel,
        grid=(n,),
        in_specs=[img_spec, vec_spec, vec_spec, w_spec],
        out_specs=(img_spec, stat_spec, stat_spec),
        out_shape=(img_shape, stat_shape, stat_shape),
        scratch_shapes=[pltpu.VMEM((h + 2, w + 2, cp), jnp.float32)],
        compiler_params=par,
        cost_estimate=pl.CostEstimate(
            flops=conv_flops, transcendentals=0,
            bytes_accessed=4 * (2 * n * h * w * cp + w2p.size + 2 * n * cp)),
    )(conv1, scale1, shift1, w2p)
    scale2, shift2 = _fold_bn(sum2, ssq2, m, g2p, be2p)

    # ---- pass 3: BN2 + ReLU + residual add ----
    out = pl.pallas_call(
        _bn_relu_residual_kernel,
        grid=(n,),
        in_specs=[img_spec, vec_spec, vec_spec, img_spec],
        out_specs=img_spec,
        out_shape=img_shape,
        compiler_params=par,
    )(conv2, scale2, shift2, x_p)

    out = out[:, :, :, :c]                                        # drop channel padding
    return jnp.transpose(out, (0, 3, 1, 2)).astype(x_nchw.dtype)  # NHWC -> NCHW


# ---------------------------- pure-JAX reference ----------------------------- #
def _ref_conv_block(x_nhwc, w_oihw, b, gamma, beta):
    w_hwio = jnp.transpose(w_oihw, (2, 3, 1, 0))
    conv = lax.conv_general_dilated(
        x_nhwc, w_hwio, window_strides=(1, 1), padding=((1, 1), (1, 1)),
        dimension_numbers=("NHWC", "HWIO", "NHWC")) + b
    mean = jnp.mean(conv, axis=(0, 1, 2), keepdims=True)
    var = jnp.mean((conv - mean) ** 2, axis=(0, 1, 2), keepdims=True)
    y = (conv - mean) / jnp.sqrt(var + EPS) * gamma + beta
    return jnp.maximum(y, 0.0)


def _ref_residual_block(x_nchw, params):
    x = jnp.transpose(x_nchw, (0, 2, 3, 1))
    (w1, b1, g1, be1), (w2, b2, g2, be2) = params
    out = _ref_conv_block(x, w1, b1, g1, be1)
    out = _ref_conv_block(out, w2, b2, g2, be2) + x
    return jnp.transpose(out, (0, 3, 1, 2))


# ----------------------------------- main ------------------------------------ #
if __name__ == "__main__":
    N, C, H, W = 2, 4, 16, 16          # in_channels == out_channels (needed for residual)
    KH = KW = 3

    key = jax.random.PRNGKey(0)
    kx, kw1, kb1, kw2, kb2 = jax.random.split(key, 5)

    x = jax.random.normal(kx, (N, C, H, W), dtype=jnp.float32)

    def conv_params(kw_key, kb_key):
        fan_in = C * KH * KW
        bound = 1.0 / np.sqrt(fan_in)
        w = jax.random.uniform(kw_key, (C, C, KH, KW), jnp.float32, -bound, bound)
        b = jax.random.uniform(kb_key, (C,), jnp.float32, -bound, bound)
        gamma = jnp.ones((C,), jnp.float32)   # nn.BatchNorm2d default affine init
        beta = jnp.zeros((C,), jnp.float32)
        return (w, b, gamma, beta)

    params = (conv_params(kw1, kb1), conv_params(kw2, kb2))

    out = jax.block_until_ready(jax.jit(residual_block)(x, params))
    ref = jax.block_until_ready(_ref_residual_block(x, params))

    assert out.shape == (N, C, H, W), out.shape
    np.testing.assert_allclose(np.asarray(out), np.asarray(ref), rtol=1e-4, atol=1e-4)
    print("KERNEL_OK")
</pallas_src>

<mosaic_0001>
module attributes {stable_mosaic.version = 11 : i64} {
  func.func @_conv_stats_kernel(%arg0: i32, %arg1: memref<1x18x18x128xf32, #tpu.memory_space<vmem>>, %arg2: memref<9x128x128xf32, #tpu.memory_space<vmem>>, %arg3: memref<1x16x16x128xf32, #tpu.memory_space<vmem>>, %arg4: memref<1x1x128xf32, #tpu.memory_space<vmem>>, %arg5: memref<1x1x128xf32, #tpu.memory_space<vmem>>) attributes {dimension_semantics = [#tpu.dimension_semantics<parallel>], iteration_bounds = array<i64: 2>, scalar_prefetch = 0 : i64, scratch_operands = 0 : i64, tpu.core_type = #tpu.core_type<tc>, window_params = [{transform_indices = @transform_0, window_bounds = array<i64: 1, 18, 18, 128>}, {pipeline_mode = #tpu.pipeline_mode<synchronous>, transform_indices = @transform_1, window_bounds = array<i64: 9, 128, 128>}, {transform_indices = @transform_2, window_bounds = array<i64: 1, 16, 16, 128>}, {transform_indices = @transform_3, window_bounds = array<i64: 1, 1, 128>}, {transform_indices = @transform_4, window_bounds = array<i64: 1, 1, 128>}]} {
    %cst = arith.constant 0.000000e+00 : f32
    %0 = vector.broadcast %cst : f32 to vector<256x128xf32>
    %c0 = arith.constant 0 : index
    %c0_0 = arith.constant 0 : index
    %c0_1 = arith.constant 0 : index
    %c0_2 = arith.constant 0 : index
    %1 = vector.load %arg1[%c0, %c0_0, %c0_1, %c0_2] : memref<1x18x18x128xf32, #tpu.memory_space<vmem>>, vector<1x16x16x128xf32>
    %2 = vector.shape_cast %1 : vector<1x16x16x128xf32> to vector<16x16x128xf32>
    %3 = vector.shape_cast %2 : vector<16x16x128xf32> to vector<256x128xf32>
    %c0_3 = arith.constant 0 : index
    %c0_4 = arith.constant 0 : index
    %c0_5 = arith.constant 0 : index
    %4 = vector.load %arg2[%c0_3, %c0_4, %c0_5] : memref<9x128x128xf32, #tpu.memory_space<vmem>>, vector<1x128x128xf32>
    %5 = vector.shape_cast %4 : vector<1x128x128xf32> to vector<128x128xf32>
    %cst_6 = arith.constant dense<0.000000e+00> : vector<256x128xf32>
    %6 = tpu.matmul %3, %5, %cst_6 {dimension_numbers = #tpu.dot_dimension_numbers<[1], [0], [0], [1], [0, 0, 1, 1], [], []>} : vector<256x128xf32>, vector<128x128xf32>, vector<256x128xf32> -> vector<256x128xf32>
    %7 = arith.addf %0, %6 : vector<256x128xf32>
    %c0_7 = arith.constant 0 : index
    %c0_8 = arith.constant 0 : index
    %c1 = arith.constant 1 : index
    %c0_9 = arith.constant 0 : index
    %8 = vector.load %arg1[%c0_7, %c0_8, %c1, %c0_9] : memref<1x18x18x128xf32, #tpu.memory_space<vmem>>, vector<1x16x16x128xf32>
    %9 = vector.shape_cast %8 : vector<1x16x16x128xf32> to vector<16x16x128xf32>
    %10 = vector.shape_cast %9 : vector<16x16x128xf32> to vector<256x128xf32>
    %c1_10 = arith.constant 1 : index
    %c0_11 = arith.constant 0 : index
    %c0_12 = arith.constant 0 : index
    %11 = vector.load %arg2[%c1_10, %c0_11, %c0_12] : memref<9x128x128xf32, #tpu.memory_space<vmem>>, vector<1x128x128xf32>
    %12 = vector.shape_cast %11 : vector<1x128x128xf32> to vector<128x128xf32>
    %cst_13 = arith.constant dense<0.000000e+00> : vector<256x128xf32>
    %13 = tpu.matmul %10, %12, %cst_13 {dimension_numbers = #tpu.dot_dimension_numbers<[1], [0], [0], [1], [0, 0, 1, 1], [], []>} : vector<256x128xf32>, vector<128x128xf32>, vector<256x128xf32> -> vector<256x128xf32>
    %14 = arith.addf %7, %13 : vector<256x128xf32>
    %c0_14 = arith.constant 0 : index
    %c0_15 = arith.constant 0 : index
    %c2 = arith.constant 2 : index
    %c0_16 = arith.constant 0 : index
    %15 = vector.load %arg1[%c0_14, %c0_15, %c2, %c0_16] : memref<1x18x18x128xf32, #tpu.memory_space<vmem>>, vector<1x16x16x128xf32>
    %16 = vector.shape_cast %15 : vector<1x16x16x128xf32> to vector<16x16x128xf32>
    %17 = vector.shape_cast %16 : vector<16x16x128xf32> to vector<256x128xf32>
    %c2_17 = arith.constant 2 : index
    %c0_18 = arith.constant 0 : index
    %c0_19 = arith.constant 0 : index
    %18 = vector.load %arg2[%c2_17, %c0_18, %c0_19] : memref<9x128x128xf32, #tpu.memory_space<vmem>>, vector<1x128x128xf32>
    %19 = vector.shape_cast %18 : vector<1x128x128xf32> to vector<128x128xf32>
    %cst_20 = arith.constant dense<0.000000e+00> : vector<256x128xf32>
    %20 = tpu.matmul %17, %19, %cst_20 {dimension_numbers = #tpu.dot_dimension_numbers<[1], [0], [0], [1], [0, 0, 1, 1], [], []>} : vector<256x128xf32>, vector<128x128xf32>, vector<256x128xf32> -> vector<256x128xf32>
    %21 = arith.addf %14, %20 : vector<256x128xf32>
    %c0_21 = arith.constant 0 : index
    %c1_22 = arith.constant 1 : index
    %c0_23 = arith.constant 0 : index
    %c0_24 = arith.constant 0 : index
    %22 = vector.load %arg1[%c0_21, %c1_22, %c0_23, %c0_24] : memref<1x18x18x128xf32, #tpu.memory_space<vmem>>, vector<1x16x16x128xf32>
    %23 = vector.shape_cast %22 : vector<1x16x16x128xf32> to vector<16x16x128xf32>
    %24 = vector.shape_cast %23 : vector<16x16x128xf32> to vector<256x128xf32>
    %c3 = arith.constant 3 : index
    %c0_25 = arith.constant 0 : index
    %c0_26 = arith.constant 0 : index
    %25 = vector.load %arg2[%c3, %c0_25, %c0_26] : memref<9x128x128xf32, #tpu.memory_space<vmem>>, vector<1x128x128xf32>
    %26 = vector.shape_cast %25 : vector<1x128x128xf32> to vector<128x128xf32>
    %cst_27 = arith.constant dense<0.000000e+00> : vector<256x128xf32>
    %27 = tpu.matmul %24, %26, %cst_27 {dimension_numbers = #tpu.dot_dimension_numbers<[1], [0], [0], [1], [0, 0, 1, 1], [], []>} : vector<256x128xf32>, vector<128x128xf32>, vector<256x128xf32> -> vector<256x128xf32>
    %28 = arith.addf %21, %27 : vector<256x128xf32>
    %c0_28 = arith.constant 0 : index
    %c1_29 = arith.constant 1 : index
    %c1_30 = arith.constant 1 : index
    %c0_31 = arith.constant 0 : index
    %29 = vector.load %arg1[%c0_28, %c1_29, %c1_30, %c0_31] : memref<1x18x18x128xf32, #tpu.memory_space<vmem>>, vector<1x16x16x128xf32>
    %30 = vector.shape_cast %29 : vector<1x16x16x128xf32> to vector<16x16x128xf32>
    %31 = vector.shape_cast %30 : vector<16x16x128xf32> to vector<256x128xf32>
    %c4 = arith.constant 4 : index
    %c0_32 = arith.constant 0 : index
    %c0_33 = arith.constant 0 : index
    %32 = vector.load %arg2[%c4, %c0_32, %c0_33] : memref<9x128x128xf32, #tpu.memory_space<vmem>>, vector<1x128x128xf32>
    %33 = vector.shape_cast %32 : vector<1x128x128xf32> to vector<128x128xf32>
    %cst_34 = arith.constant dense<0.000000e+00> : vector<256x128xf32>
    %34 = tpu.matmul %31, %33, %cst_34 {dimension_numbers = #tpu.dot_dimension_numbers<[1], [0], [0], [1], [0, 0, 1, 1], [], []>} : vector<256x128xf32>, vector<128x128xf32>, vector<256x128xf32> -> vector<256x128xf32>
    %35 = arith.addf %28, %34 : vector<256x128xf32>
    %c0_35 = arith.constant 0 : index
    %c1_36 = arith.constant 1 : index
    %c2_37 = arith.constant 2 : index
    %c0_38 = arith.constant 0 : index
    %36 = vector.load %arg1[%c0_35, %c1_36, %c2_37, %c0_38] : memref<1x18x18x128xf32, #tpu.memory_space<vmem>>, vector<1x16x16x128xf32>
    %37 = vector.shape_cast %36 : vector<1x16x16x128xf32> to vector<16x16x128xf32>
    %38 = vector.shape_cast %37 : vector<16x16x128xf32> to vector<256x128xf32>
    %c5 = arith.constant 5 : index
    %c0_39 = arith.constant 0 : index
    %c0_40 = arith.constant 0 : index
    %39 = vector.load %arg2[%c5, %c0_39, %c0_40] : memref<9x128x128xf32, #tpu.memory_space<vmem>>, vector<1x128x128xf32>
    %40 = vector.shape_cast %39 : vector<1x128x128xf32> to vector<128x128xf32>
    %cst_41 = arith.constant dense<0.000000e+00> : vector<256x128xf32>
    %41 = tpu.matmul %38, %40, %cst_41 {dimension_numbers = #tpu.dot_dimension_numbers<[1], [0], [0], [1], [0, 0, 1, 1], [], []>} : vector<256x128xf32>, vector<128x128xf32>, vector<256x128xf32> -> vector<256x128xf32>
    %42 = arith.addf %35, %41 : vector<256x128xf32>
    %c0_42 = arith.constant 0 : index
    %c2_43 = arith.constant 2 : index
    %c0_44 = arith.constant 0 : index
    %c0_45 = arith.constant 0 : index
    %43 = vector.load %arg1[%c0_42, %c2_43, %c0_44, %c0_45] : memref<1x18x18x128xf32, #tpu.memory_space<vmem>>, vector<1x16x16x128xf32>
    %44 = vector.shape_cast %43 : vector<1x16x16x128xf32> to vector<16x16x128xf32>
    %45 = vector.shape_cast %44 : vector<16x16x128xf32> to vector<256x128xf32>
    %c6 = arith.constant 6 : index
    %c0_46 = arith.constant 0 : index
    %c0_47 = arith.constant 0 : index
    %46 = vector.load %arg2[%c6, %c0_46, %c0_47] : memref<9x128x128xf32, #tpu.memory_space<vmem>>, vector<1x128x128xf32>
    %47 = vector.shape_cast %46 : vector<1x128x128xf32> to vector<128x128xf32>
    %cst_48 = arith.constant dense<0.000000e+00> : vector<256x128xf32>
    %48 = tpu.matmul %45, %47, %cst_48 {dimension_numbers = #tpu.dot_dimension_numbers<[1], [0], [0], [1], [0, 0, 1, 1], [], []>} : vector<256x128xf32>, vector<128x128xf32>, vector<256x128xf32> -> vector<256x128xf32>
    %49 = arith.addf %42, %48 : vector<256x128xf32>
    %c0_49 = arith.constant 0 : index
    %c2_50 = arith.constant 2 : index
    %c1_51 = arith.constant 1 : index
    %c0_52 = arith.constant 0 : index
    %50 = vector.load %arg1[%c0_49, %c2_50, %c1_51, %c0_52] : memref<1x18x18x128xf32, #tpu.memory_space<vmem>>, vector<1x16x16x128xf32>
    %51 = vector.shape_cast %50 : vector<1x16x16x128xf32> to vector<16x16x128xf32>
    %52 = vector.shape_cast %51 : vector<16x16x128xf32> to vector<256x128xf32>
    %c7 = arith.constant 7 : index
    %c0_53 = arith.constant 0 : index
    %c0_54 = arith.constant 0 : index
    %53 = vector.load %arg2[%c7, %c0_53, %c0_54] : memref<9x128x128xf32, #tpu.memory_space<vmem>>, vector<1x128x128xf32>
    %54 = vector.shape_cast %53 : vector<1x128x128xf32> to vector<128x128xf32>
    %cst_55 = arith.constant dense<0.000000e+00> : vector<256x128xf32>
    %55 = tpu.matmul %52, %54, %cst_55 {dimension_numbers = #tpu.dot_dimension_numbers<[1], [0], [0], [1], [0, 0, 1, 1], [], []>} : vector<256x128xf32>, vector<128x128xf32>, vector<256x128xf32> -> vector<256x128xf32>
    %56 = arith.addf %49, %55 : vector<256x128xf32>
    %c0_56 = arith.constant 0 : index
    %c2_57 = arith.constant 2 : index
    %c2_58 = arith.constant 2 : index
    %c0_59 = arith.constant 0 : index
    %57 = vector.load %arg1[%c0_56, %c2_57, %c2_58, %c0_59] : memref<1x18x18x128xf32, #tpu.memory_space<vmem>>, vector<1x16x16x128xf32>
    %58 = vector.shape_cast %57 : vector<1x16x16x128xf32> to vector<16x16x128xf32>
    %59 = vector.shape_cast %58 : vector<16x16x128xf32> to vector<256x128xf32>
    %c8 = arith.constant 8 : index
    %c0_60 = arith.constant 0 : index
    %c0_61 = arith.constant 0 : index
    %60 = vector.load %arg2[%c8, %c0_60, %c0_61] : memref<9x128x128xf32, #tpu.memory_space<vmem>>, vector<1x128x128xf32>
    %61 = vector.shape_cast %60 : vector<1x128x128xf32> to vector<128x128xf32>
    %cst_62 = arith.constant dense<0.000000e+00> : vector<256x128xf32>
    %62 = tpu.matmul %59, %61, %cst_62 {dimension_numbers = #tpu.dot_dimension_numbers<[1], [0], [0], [1], [0, 0, 1, 1], [], []>} : vector<256x128xf32>, vector<128x128xf32>, vector<256x128xf32> -> vector<256x128xf32>
    %63 = arith.addf %56, %62 : vector<256x128xf32>
    %64 = vector.shape_cast %63 : vector<256x128xf32> to vector<16x16x128xf32>
    %c0_63 = arith.constant 0 : index
    %c0_64 = arith.constant 0 : index
    %c0_65 = arith.constant 0 : index
    %c0_66 = arith.constant 0 : index
    %65 = vector.load %arg3[%c0_63, %c0_64, %c0_65, %c0_66] : memref<1x16x16x128xf32, #tpu.memory_space<vmem>>, vector<1x16x16x128xf32>
    %66 = vector.shape_cast %65 : vector<1x16x16x128xf32> to vector<16x16x128xf32>
    %67 = vector.shape_cast %64 : vector<16x16x128xf32> to vector<1x16x16x128xf32>
    tpu.vector_store %arg3[%c0_63, %c0_64, %c0_65, %c0_66], %67 {strides = array<i32>} : memref<1x16x16x128xf32, #tpu.memory_space<vmem>>, vector<1x16x16x128xf32>,
    %cst_67 = arith.constant dense<0.000000e+00> : vector<128xf32>
    %68 = vector.multi_reduction <add>, %63, %cst_67 [0] : vector<256x128xf32> to vector<128xf32>
    %69 = vector.shape_cast %68 : vector<128xf32> to vector<1x128xf32>
    %c0_68 = arith.constant 0 : index
    %c0_69 = arith.constant 0 : index
    %c0_70 = arith.constant 0 : index
    %70 = vector.load %arg4[%c0_68, %c0_69, %c0_70] : memref<1x1x128xf32, #tpu.memory_space<vmem>>, vector<1x1x128xf32>
    %71 = vector.shape_cast %70 : vector<1x1x128xf32> to vector<1x128xf32>
    %72 = vector.shape_cast %69 : vector<1x128xf32> to vector<1x1x128xf32>
    tpu.vector_store %arg4[%c0_68, %c0_69, %c0_70], %72 {strides = array<i32>} : memref<1x1x128xf32, #tpu.memory_space<vmem>>, vector<1x1x128xf32>,
    %73 = arith.mulf %63, %63 : vector<256x128xf32>
    %cst_71 = arith.constant dense<0.000000e+00> : vector<128xf32>
    %74 = vector.multi_reduction <add>, %73, %cst_71 [0] : vector<256x128xf32> to vector<128xf32>
    %75 = vector.shape_cast %74 : vector<128xf32> to vector<1x128xf32>
    %c0_72 = arith.constant 0 : index
    %c0_73 = arith.constant 0 : index
    %c0_74 = arith.constant 0 : index
    %76 = vector.load %arg5[%c0_72, %c0_73, %c0_74] : memref<1x1x128xf32, #tpu.memory_space<vmem>>, vector<1x1x128xf32>
    %77 = vector.shape_cast %76 : vector<1x1x128xf32> to vector<1x128xf32>
    %78 = vector.shape_cast %75 : vector<1x128xf32> to vector<1x1x128xf32>
    tpu.vector_store %arg5[%c0_72, %c0_73, %c0_74], %78 {strides = array<i32>} : memref<1x1x128xf32, #tpu.memory_space<vmem>>, vector<1x1x128xf32>,
    return
  }
  func.func @transform_0(%arg0: i32) -> (i32, i32, i32, i32) {
    %c0_i32 = arith.constant 0 : i32
    %c0_i32_0 = arith.constant 0 : i32
    %c0_i32_1 = arith.constant 0 : i32
    %c0_i32_2 = arith.constant 0 : i32
    return %arg0, %c0_i32, %c0_i32_0, %c0_i32_1 : i32, i32, i32, i32
  }
  func.func @transform_1(%arg0: i32) -> (i32, i32, i32) {
    %c0_i32 = arith.constant 0 : i32
    %c0_i32_0 = arith.constant 0 : i32
    %c0_i32_1 = arith.constant 0 : i32
    %c0_i32_2 = arith.constant 0 : i32
    return %c0_i32, %c0_i32_0, %c0_i32_1 : i32, i32, i32
  }
  func.func @transform_2(%arg0: i32) -> (i32, i32, i32, i32) {
    %c0_i32 = arith.constant 0 : i32
    %c0_i32_0 = arith.constant 0 : i32
    %c0_i32_1 = arith.constant 0 : i32
    %c0_i32_2 = arith.constant 0 : i32
    return %arg0, %c0_i32, %c0_i32_0, %c0_i32_1 : i32, i32, i32, i32
  }
  func.func @transform_3(%arg0: i32) -> (i32, i32, i32) {
    %c0_i32 = arith.constant 0 : i32
    %c0_i32_0 = arith.constant 0 : i32
    %c0_i32_1 = arith.constant 0 : i32
    return %arg0, %c0_i32, %c0_i32_0 : i32, i32, i32
  }
  func.func @transform_4(%arg0: i32) -> (i32, i32, i32) {
    %c0_i32 = arith.constant 0 : i32
    %c0_i32_0 = arith.constant 0 : i32
    %c0_i32_1 = arith.constant 0 : i32
    return %arg0, %c0_i32, %c0_i32_0 : i32, i32, i32
  }
}

module attributes {stable_mosaic.version = 11 : i64} {
  func.func @_bn_relu_residual_kernel(%arg0: i32, %arg1: memref<1x16x16x128xf32, #tpu.memory_space<vmem>>, %arg2: memref<1x128xf32, #tpu.memory_space<vmem>>, %arg3: memref<1x128xf32, #tpu.memory_space<vmem>>, %arg4: memref<1x16x16x128xf32, #tpu.memory_space<vmem>>, %arg5: memref<1x16x16x128xf32, #tpu.memory_space<vmem>>) attributes {dimension_semantics = [#tpu.dimension_semantics<parallel>], iteration_bounds = array<i64: 2>, scalar_prefetch = 0 : i64, scratch_operands = 0 : i64, tpu.core_type = #tpu.core_type<tc>, window_params = [{transform_indices = @transform_0, window_bounds = array<i64: 1, 16, 16, 128>}, {pipeline_mode = #tpu.pipeline_mode<synchronous>, transform_indices = @transform_1, window_bounds = array<i64: 1, 128>}, {pipeline_mode = #tpu.pipeline_mode<synchronous>, transform_indices = @transform_2, window_bounds = array<i64: 1, 128>}, {transform_indices = @transform_3, window_bounds = array<i64: 1, 16, 16, 128>}, {transform_indices = @transform_4, window_bounds = array<i64: 1, 16, 16, 128>}]} {
    %c0 = arith.constant 0 : index
    %c0_0 = arith.constant 0 : index
    %c0_1 = arith.constant 0 : index
    %c0_2 = arith.constant 0 : index
    %0 = vector.load %arg1[%c0, %c0_0, %c0_1, %c0_2] : memref<1x16x16x128xf32, #tpu.memory_space<vmem>>, vector<1x16x16x128xf32>
    %1 = vector.shape_cast %0 : vector<1x16x16x128xf32> to vector<16x16x128xf32>
    %2 = vector.shape_cast %1 : vector<16x16x128xf32> to vector<256x128xf32>
    %c0_3 = arith.constant 0 : index
    %c0_4 = arith.constant 0 : index
    %3 = vector.load %arg2[%c0_3, %c0_4] : memref<1x128xf32, #tpu.memory_space<vmem>>, vector<1x128xf32>
    %4 = vector.broadcast %3 : vector<1x128xf32> to vector<256x128xf32>
    %5 = arith.mulf %2, %4 : vector<256x128xf32>
    %c0_5 = arith.constant 0 : index
    %c0_6 = arith.constant 0 : index
    %6 = vector.load %arg3[%c0_5, %c0_6] : memref<1x128xf32, #tpu.memory_space<vmem>>, vector<1x128xf32>
    %7 = vector.broadcast %6 : vector<1x128xf32> to vector<256x128xf32>
    %8 = arith.addf %5, %7 : vector<256x128xf32>
    %cst = arith.constant 0.000000e+00 : f32
    %9 = vector.broadcast %cst : f32 to vector<256x128xf32>
    %10 = arith.maximumf %8, %9 : vector<256x128xf32>
    %c0_7 = arith.constant 0 : index
    %c0_8 = arith.constant 0 : index
    %c0_9 = arith.constant 0 : index
    %c0_10 = arith.constant 0 : index
    %11 = vector.load %arg4[%c0_7, %c0_8, %c0_9, %c0_10] : memref<1x16x16x128xf32, #tpu.memory_space<vmem>>, vector<1x16x16x128xf32>
    %12 = vector.shape_cast %11 : vector<1x16x16x128xf32> to vector<16x16x128xf32>
    %13 = vector.shape_cast %12 : vector<16x16x128xf32> to vector<256x128xf32>
    %14 = arith.addf %10, %13 : vector<256x128xf32>
    %15 = vector.shape_cast %14 : vector<256x128xf32> to vector<16x16x128xf32>
    %c0_11 = arith.constant 0 : index
    %c0_12 = arith.constant 0 : index
    %c0_13 = arith.constant 0 : index
    %c0_14 = arith.constant 0 : index
    %16 = vector.load %arg5[%c0_11, %c0_12, %c0_13, %c0_14] : memref<1x16x16x128xf32, #tpu.memory_space<vmem>>, vector<1x16x16x128xf32>
    %17 = vector.shape_cast %16 : vector<1x16x16x128xf32> to vector<16x16x128xf32>
    %18 = vector.shape_cast %15 : vector<16x16x128xf32> to vector<1x16x16x128xf32>
    tpu.vector_store %arg5[%c0_11, %c0_12, %c0_13, %c0_14], %18 {strides = array<i32>} : memref<1x16x16x128xf32, #tpu.memory_space<vmem>>, vector<1x16x16x128xf32>,
    return
  }
  func.func @transform_0(%arg0: i32) -> (i32, i32, i32, i32) {
    %c0_i32 = arith.constant 0 : i32
    %c0_i32_0 = arith.constant 0 : i32
    %c0_i32_1 = arith.constant 0 : i32
    %c0_i32_2 = arith.constant 0 : i32
    return %arg0, %c0_i32, %c0_i32_0, %c0_i32_1 : i32, i32, i32, i32
  }
  func.func @transform_1(%arg0: i32) -> (i32, i32) {
    %c0_i32 = arith.constant 0 : i32
    %c0_i32_0 = arith.constant 0 : i32
    %c0_i32_1 = arith.constant 0 : i32
    return %c0_i32, %c0_i32_0 : i32, i32
  }
  func.func @transform_2(%arg0: i32) -> (i32, i32) {
    %c0_i32 = arith.constant 0 : i32
    %c0_i32_0 = arith.constant 0 : i32
    %c0_i32_1 = arith.constant 0 : i32
    return %c0_i32, %c0_i32_0 : i32, i32
  }
  func.func @transform_3(%arg0: i32) -> (i32, i32, i32, i32) {
    %c0_i32 = arith.constant 0 : i32
    %c0_i32_0 = arith.constant 0 : i32
    %c0_i32_1 = arith.constant 0 : i32
    %c0_i32_2 = arith.constant 0 : i32
    return %arg0, %c0_i32, %c0_i32_0, %c0_i32_1 : i32, i32, i32, i32
  }
  func.func @transform_4(%arg0: i32) -> (i32, i32, i32, i32) {
    %c0_i32 = arith.constant 0 : i32
    %c0_i32_0 = arith.constant 0 : i32
    %c0_i32_1 = arith.constant 0 : i32
    %c0_i32_2 = arith.constant 0 : i32
    return %arg0, %c0_i32, %c0_i32_0, %c0_i32_1 : i32, i32, i32, i32
  }
}

module attributes {stable_mosaic.version = 11 : i64} {
  func.func @_bn_relu_conv_stats_kernel(%arg0: i32, %arg1: memref<1x16x16x128xf32, #tpu.memory_space<vmem>>, %arg2: memref<1x128xf32, #tpu.memory_space<vmem>>, %arg3: memref<1x128xf32, #tpu.memory_space<vmem>>, %arg4: memref<9x128x128xf32, #tpu.memory_space<vmem>>, %arg5: memref<1x16x16x128xf32, #tpu.memory_space<vmem>>, %arg6: memref<1x1x128xf32, #tpu.memory_space<vmem>>, %arg7: memref<1x1x128xf32, #tpu.memory_space<vmem>>, %arg8: memref<18x18x128xf32, #tpu.memory_space<vmem>>) attributes {dimension_semantics = [#tpu.dimension_semantics<parallel>], iteration_bounds = array<i64: 2>, scalar_prefetch = 0 : i64, scratch_operands = 1 : i64, tpu.core_type = #tpu.core_type<tc>, window_params = [{transform_indices = @transform_0, window_bounds = array<i64: 1, 16, 16, 128>}, {pipeline_mode = #tpu.pipeline_mode<synchronous>, transform_indices = @transform_1, window_bounds = array<i64: 1, 128>}, {pipeline_mode = #tpu.pipeline_mode<synchronous>, transform_indices = @transform_2, window_bounds = array<i64: 1, 128>}, {pipeline_mode = #tpu.pipeline_mode<synchronous>, transform_indices = @transform_3, window_bounds = array<i64: 9, 128, 128>}, {transform_indices = @transform_4, window_bounds = array<i64: 1, 16, 16, 128>}, {transform_indices = @transform_5, window_bounds = array<i64: 1, 1, 128>}, {transform_indices = @transform_6, window_bounds = array<i64: 1, 1, 128>}]} {
    %c0 = arith.constant 0 : index
    %c0_0 = arith.constant 0 : index
    %c0_1 = arith.constant 0 : index
    %c0_2 = arith.constant 0 : index
    %0 = vector.load %arg1[%c0, %c0_0, %c0_1, %c0_2] : memref<1x16x16x128xf32, #tpu.memory_space<vmem>>, vector<1x16x16x128xf32>
    %1 = vector.shape_cast %0 : vector<1x16x16x128xf32> to vector<16x16x128xf32>
    %2 = vector.shape_cast %1 : vector<16x16x128xf32> to vector<256x128xf32>
    %c0_3 = arith.constant 0 : index
    %c0_4 = arith.constant 0 : index
    %3 = vector.load %arg2[%c0_3, %c0_4] : memref<1x128xf32, #tpu.memory_space<vmem>>, vector<1x128xf32>
    %4 = vector.broadcast %3 : vector<1x128xf32> to vector<256x128xf32>
    %5 = arith.mulf %2, %4 : vector<256x128xf32>
    %c0_5 = arith.constant 0 : index
    %c0_6 = arith.constant 0 : index
    %6 = vector.load %arg3[%c0_5, %c0_6] : memref<1x128xf32, #tpu.memory_space<vmem>>, vector<1x128xf32>
    %7 = vector.broadcast %6 : vector<1x128xf32> to vector<256x128xf32>
    %8 = arith.addf %5, %7 : vector<256x128xf32>
    %cst = arith.constant 0.000000e+00 : f32
    %9 = vector.broadcast %cst : f32 to vector<256x128xf32>
    %10 = arith.maximumf %8, %9 : vector<256x128xf32>
    %cst_7 = arith.constant 0.000000e+00 : f32
    %11 = vector.broadcast %cst_7 : f32 to vector<18x18x128xf32>
    %c0_8 = arith.constant 0 : index
    %c0_9 = arith.constant 0 : index
    %c0_10 = arith.constant 0 : index
    %12 = vector.load %arg8[%c0_8, %c0_9, %c0_10] : memref<18x18x128xf32, #tpu.memory_space<vmem>>, vector<18x18x128xf32>
    tpu.vector_store %arg8[%c0_8, %c0_9, %c0_10], %11 {strides = array<i32>} : memref<18x18x128xf32, #tpu.memory_space<vmem>>, vector<18x18x128xf32>,
    %13 = vector.shape_cast %10 : vector<256x128xf32> to vector<16x16x128xf32>
    %c1 = arith.constant 1 : index
    %c1_11 = arith.constant 1 : index
    %c0_12 = arith.constant 0 : index
    %14 = vector.load %arg8[%c1, %c1_11, %c0_12] : memref<18x18x128xf32, #tpu.memory_space<vmem>>, vector<16x16x128xf32>
    tpu.vector_store %arg8[%c1, %c1_11, %c0_12], %13 {strides = array<i32>} : memref<18x18x128xf32, #tpu.memory_space<vmem>>, vector<16x16x128xf32>,
    %cst_13 = arith.constant 0.000000e+00 : f32
    %15 = vector.broadcast %cst_13 : f32 to vector<256x128xf32>
    %c0_14 = arith.constant 0 : index
    %c0_15 = arith.constant 0 : index
    %c0_16 = arith.constant 0 : index
    %16 = vector.load %arg8[%c0_14, %c0_15, %c0_16] : memref<18x18x128xf32, #tpu.memory_space<vmem>>, vector<16x16x128xf32>
    %17 = vector.shape_cast %16 : vector<16x16x128xf32> to vector<256x128xf32>
    %c0_17 = arith.constant 0 : index
    %c0_18 = arith.constant 0 : index
    %c0_19 = arith.constant 0 : index
    %18 = vector.load %arg4[%c0_17, %c0_18, %c0_19] : memref<9x128x128xf32, #tpu.memory_space<vmem>>, vector<1x128x128xf32>
    %19 = vector.shape_cast %18 : vector<1x128x128xf32> to vector<128x128xf32>
    %cst_20 = arith.constant dense<0.000000e+00> : vector<256x128xf32>
    %20 = tpu.matmul %17, %19, %cst_20 {dimension_numbers = #tpu.dot_dimension_numbers<[1], [0], [0], [1], [0, 0, 1, 1], [], []>} : vector<256x128xf32>, vector<128x128xf32>, vector<256x128xf32> -> vector<256x128xf32>
    %21 = arith.addf %15, %20 : vector<256x128xf32>
    %c0_21 = arith.constant 0 : index
    %c1_22 = arith.constant 1 : index
    %c0_23 = arith.constant 0 : index
    %22 = vector.load %arg8[%c0_21, %c1_22, %c0_23] : memref<18x18x128xf32, #tpu.memory_space<vmem>>, vector<16x16x128xf32>
    %23 = vector.shape_cast %22 : vector<16x16x128xf32> to vector<256x128xf32>
    %c1_24 = arith.constant 1 : index
    %c0_25 = arith.constant 0 : index
    %c0_26 = arith.constant 0 : index
    %24 = vector.load %arg4[%c1_24, %c0_25, %c0_26] : memref<9x128x128xf32, #tpu.memory_space<vmem>>, vector<1x128x128xf32>
    %25 = vector.shape_cast %24 : vector<1x128x128xf32> to vector<128x128xf32>
    %cst_27 = arith.constant dense<0.000000e+00> : vector<256x128xf32>
    %26 = tpu.matmul %23, %25, %cst_27 {dimension_numbers = #tpu.dot_dimension_numbers<[1], [0], [0], [1], [0, 0, 1, 1], [], []>} : vector<256x128xf32>, vector<128x128xf32>, vector<256x128xf32> -> vector<256x128xf32>
    %27 = arith.addf %21, %26 : vector<256x128xf32>
    %c0_28 = arith.constant 0 : index
    %c2 = arith.constant 2 : index
    %c0_29 = arith.constant 0 : index
    %28 = vector.load %arg8[%c0_28, %c2, %c0_29] : memref<18x18x128xf32, #tpu.memory_space<vmem>>, vector<16x16x128xf32>
    %29 = vector.shape_cast %28 : vector<16x16x128xf32> to vector<256x128xf32>
    %c2_30 = arith.constant 2 : index
    %c0_31 = arith.constant 0 : index
    %c0_32 = arith.constant 0 : index
    %30 = vector.load %arg4[%c2_30, %c0_31, %c0_32] : memref<9x128x128xf32, #tpu.memory_space<vmem>>, vector<1x128x128xf32>
    %31 = vector.shape_cast %30 : vector<1x128x128xf32> to vector<128x128xf32>
    %cst_33 = arith.constant dense<0.000000e+00> : vector<256x128xf32>
    %32 = tpu.matmul %29, %31, %cst_33 {dimension_numbers = #tpu.dot_dimension_numbers<[1], [0], [0], [1], [0, 0, 1, 1], [], []>} : vector<256x128xf32>, vector<128x128xf32>, vector<256x128xf32> -> vector<256x128xf32>
    %33 = arith.addf %27, %32 : vector<256x128xf32>
    %c1_34 = arith.constant 1 : index
    %c0_35 = arith.constant 0 : index
    %c0_36 = arith.constant 0 : index
    %34 = vector.load %arg8[%c1_34, %c0_35, %c0_36] : memref<18x18x128xf32, #tpu.memory_space<vmem>>, vector<16x16x128xf32>
    %35 = vector.shape_cast %34 : vector<16x16x128xf32> to vector<256x128xf32>
    %c3 = arith.constant 3 : index
    %c0_37 = arith.constant 0 : index
    %c0_38 = arith.constant 0 : index
    %36 = vector.load %arg4[%c3, %c0_37, %c0_38] : memref<9x128x128xf32, #tpu.memory_space<vmem>>, vector<1x128x128xf32>
    %37 = vector.shape_cast %36 : vector<1x128x128xf32> to vector<128x128xf32>
    %cst_39 = arith.constant dense<0.000000e+00> : vector<256x128xf32>
    %38 = tpu.matmul %35, %37, %cst_39 {dimension_numbers = #tpu.dot_dimension_numbers<[1], [0], [0], [1], [0, 0, 1, 1], [], []>} : vector<256x128xf32>, vector<128x128xf32>, vector<256x128xf32> -> vector<256x128xf32>
    %39 = arith.addf %33, %38 : vector<256x128xf32>
    %c1_40 = arith.constant 1 : index
    %c1_41 = arith.constant 1 : index
    %c0_42 = arith.constant 0 : index
    %40 = vector.load %arg8[%c1_40, %c1_41, %c0_42] : memref<18x18x128xf32, #tpu.memory_space<vmem>>, vector<16x16x128xf32>
    %41 = vector.shape_cast %40 : vector<16x16x128xf32> to vector<256x128xf32>
    %c4 = arith.constant 4 : index
    %c0_43 = arith.constant 0 : index
    %c0_44 = arith.constant 0 : index
    %42 = vector.load %arg4[%c4, %c0_43, %c0_44] : memref<9x128x128xf32, #tpu.memory_space<vmem>>, vector<1x128x128xf32>
    %43 = vector.shape_cast %42 : vector<1x128x128xf32> to vector<128x128xf32>
    %cst_45 = arith.constant dense<0.000000e+00> : vector<256x128xf32>
    %44 = tpu.matmul %41, %43, %cst_45 {dimension_numbers = #tpu.dot_dimension_numbers<[1], [0], [0], [1], [0, 0, 1, 1], [], []>} : vector<256x128xf32>, vector<128x128xf32>, vector<256x128xf32> -> vector<256x128xf32>
    %45 = arith.addf %39, %44 : vector<256x128xf32>
    %c1_46 = arith.constant 1 : index
    %c2_47 = arith.constant 2 : index
    %c0_48 = arith.constant 0 : index
    %46 = vector.load %arg8[%c1_46, %c2_47, %c0_48] : memref<18x18x128xf32, #tpu.memory_space<vmem>>, vector<16x16x128xf32>
    %47 = vector.shape_cast %46 : vector<16x16x128xf32> to vector<256x128xf32>
    %c5 = arith.constant 5 : index
    %c0_49 = arith.constant 0 : index
    %c0_50 = arith.constant 0 : index
    %48 = vector.load %arg4[%c5, %c0_49, %c0_50] : memref<9x128x128xf32, #tpu.memory_space<vmem>>, vector<1x128x128xf32>
    %49 = vector.shape_cast %48 : vector<1x128x128xf32> to vector<128x128xf32>
    %cst_51 = arith.constant dense<0.000000e+00> : vector<256x128xf32>
    %50 = tpu.matmul %47, %49, %cst_51 {dimension_numbers = #tpu.dot_dimension_numbers<[1], [0], [0], [1], [0, 0, 1, 1], [], []>} : vector<256x128xf32>, vector<128x128xf32>, vector<256x128xf32> -> vector<256x128xf32>
    %51 = arith.addf %45, %50 : vector<256x128xf32>
    %c2_52 = arith.constant 2 : index
    %c0_53 = arith.constant 0 : index
    %c0_54 = arith.constant 0 : index
    %52 = vector.load %arg8[%c2_52, %c0_53, %c0_54] : memref<18x18x128xf32, #tpu.memory_space<vmem>>, vector<16x16x128xf32>
    %53 = vector.shape_cast %52 : vector<16x16x128xf32> to vector<256x128xf32>
    %c6 = arith.constant 6 : index
    %c0_55 = arith.constant 0 : index
    %c0_56 = arith.constant 0 : index
    %54 = vector.load %arg4[%c6, %c0_55, %c0_56] : memref<9x128x128xf32, #tpu.memory_space<vmem>>, vector<1x128x128xf32>
    %55 = vector.shape_cast %54 : vector<1x128x128xf32> to vector<128x128xf32>
    %cst_57 = arith.constant dense<0.000000e+00> : vector<256x128xf32>
    %56 = tpu.matmul %53, %55, %cst_57 {dimension_numbers = #tpu.dot_dimension_numbers<[1], [0], [0], [1], [0, 0, 1, 1], [], []>} : vector<256x128xf32>, vector<128x128xf32>, vector<256x128xf32> -> vector<256x128xf32>
    %57 = arith.addf %51, %56 : vector<256x128xf32>
    %c2_58 = arith.constant 2 : index
    %c1_59 = arith.constant 1 : index
    %c0_60 = arith.constant 0 : index
    %58 = vector.load %arg8[%c2_58, %c1_59, %c0_60] : memref<18x18x128xf32, #tpu.memory_space<vmem>>, vector<16x16x128xf32>
    %59 = vector.shape_cast %58 : vector<16x16x128xf32> to vector<256x128xf32>
    %c7 = arith.constant 7 : index
    %c0_61 = arith.constant 0 : index
    %c0_62 = arith.constant 0 : index
    %60 = vector.load %arg4[%c7, %c0_61, %c0_62] : memref<9x128x128xf32, #tpu.memory_space<vmem>>, vector<1x128x128xf32>
    %61 = vector.shape_cast %60 : vector<1x128x128xf32> to vector<128x128xf32>
    %cst_63 = arith.constant dense<0.000000e+00> : vector<256x128xf32>
    %62 = tpu.matmul %59, %61, %cst_63 {dimension_numbers = #tpu.dot_dimension_numbers<[1], [0], [0], [1], [0, 0, 1, 1], [], []>} : vector<256x128xf32>, vector<128x128xf32>, vector<256x128xf32> -> vector<256x128xf32>
    %63 = arith.addf %57, %62 : vector<256x128xf32>
    %c2_64 = arith.constant 2 : index
    %c2_65 = arith.constant 2 : index
    %c0_66 = arith.constant 0 : index
    %64 = vector.load %arg8[%c2_64, %c2_65, %c0_66] : memref<18x18x128xf32, #tpu.memory_space<vmem>>, vector<16x16x128xf32>
    %65 = vector.shape_cast %64 : vector<16x16x128xf32> to vector<256x128xf32>
    %c8 = arith.constant 8 : index
    %c0_67 = arith.constant 0 : index
    %c0_68 = arith.constant 0 : index
    %66 = vector.load %arg4[%c8, %c0_67, %c0_68] : memref<9x128x128xf32, #tpu.memory_space<vmem>>, vector<1x128x128xf32>
    %67 = vector.shape_cast %66 : vector<1x128x128xf32> to vector<128x128xf32>
    %cst_69 = arith.constant dense<0.000000e+00> : vector<256x128xf32>
    %68 = tpu.matmul %65, %67, %cst_69 {dimension_numbers = #tpu.dot_dimension_numbers<[1], [0], [0], [1], [0, 0, 1, 1], [], []>} : vector<256x128xf32>, vector<128x128xf32>, vector<256x128xf32> -> vector<256x128xf32>
    %69 = arith.addf %63, %68 : vector<256x128xf32>
    %70 = vector.shape_cast %69 : vector<256x128xf32> to vector<16x16x128xf32>
    %c0_70 = arith.constant 0 : index
    %c0_71 = arith.constant 0 : index
    %c0_72 = arith.constant 0 : index
    %c0_73 = arith.constant 0 : index
    %71 = vector.load %arg5[%c0_70, %c0_71, %c0_72, %c0_73] : memref<1x16x16x128xf32, #tpu.memory_space<vmem>>, vector<1x16x16x128xf32>
    %72 = vector.shape_cast %71 : vector<1x16x16x128xf32> to vector<16x16x128xf32>
    %73 = vector.shape_cast %70 : vector<16x16x128xf32> to vector<1x16x16x128xf32>
    tpu.vector_store %arg5[%c0_70, %c0_71, %c0_72, %c0_73], %73 {strides = array<i32>} : memref<1x16x16x128xf32, #tpu.memory_space<vmem>>, vector<1x16x16x128xf32>,
    %cst_74 = arith.constant dense<0.000000e+00> : vector<128xf32>
    %74 = vector.multi_reduction <add>, %69, %cst_74 [0] : vector<256x128xf32> to vector<128xf32>
    %75 = vector.shape_cast %74 : vector<128xf32> to vector<1x128xf32>
    %c0_75 = arith.constant 0 : index
    %c0_76 = arith.constant 0 : index
    %c0_77 = arith.constant 0 : index
    %76 = vector.load %arg6[%c0_75, %c0_76, %c0_77] : memref<1x1x128xf32, #tpu.memory_space<vmem>>, vector<1x1x128xf32>
    %77 = vector.shape_cast %76 : vector<1x1x128xf32> to vector<1x128xf32>
    %78 = vector.shape_cast %75 : vector<1x128xf32> to vector<1x1x128xf32>
    tpu.vector_store %arg6[%c0_75, %c0_76, %c0_77], %78 {strides = array<i32>} : memref<1x1x128xf32, #tpu.memory_space<vmem>>, vector<1x1x128xf32>,
    %79 = arith.mulf %69, %69 : vector<256x128xf32>
    %cst_78 = arith.constant dense<0.000000e+00> : vector<128xf32>
    %80 = vector.multi_reduction <add>, %79, %cst_78 [0] : vector<256x128xf32> to vector<128xf32>
    %81 = vector.shape_cast %80 : vector<128xf32> to vector<1x128xf32>
    %c0_79 = arith.constant 0 : index
    %c0_80 = arith.constant 0 : index
    %c0_81 = arith.constant 0 : index
    %82 = vector.load %arg7[%c0_79, %c0_80, %c0_81] : memref<1x1x128xf32, #tpu.memory_space<vmem>>, vector<1x1x128xf32>
    %83 = vector.shape_cast %82 : vector<1x1x128xf32> to vector<1x128xf32>
    %84 = vector.shape_cast %81 : vector<1x128xf32> to vector<1x1x128xf32>
    tpu.vector_store %arg7[%c0_79, %c0_80, %c0_81], %84 {strides = array<i32>} : memref<1x1x128xf32, #tpu.memory_space<vmem>>, vector<1x1x128xf32>,
    return
  }
  func.func @transform_0(%arg0: i32) -> (i32, i32, i32, i32) {
    %c0_i32 = arith.constant 0 : i32
    %c0_i32_0 = arith.constant 0 : i32
    %c0_i32_1 = arith.constant 0 : i32
    %c0_i32_2 = arith.constant 0 : i32
    return %arg0, %c0_i32, %c0_i32_0, %c0_i32_1 : i32, i32, i32, i32
  }
  func.func @transform_1(%arg0: i32) -> (i32, i32) {
    %c0_i32 = arith.constant 0 : i32
    %c0_i32_0 = arith.constant 0 : i32
    %c0_i32_1 = arith.constant 0 : i32
    return %c0_i32, %c0_i32_0 : i32, i32
  }
  func.func @transform_2(%arg0: i32) -> (i32, i32) {
    %c0_i32 = arith.constant 0 : i32
    %c0_i32_0 = arith.constant 0 : i32
    %c0_i32_1 = arith.constant 0 : i32
    return %c0_i32, %c0_i32_0 : i32, i32
  }
  func.func @transform_3(%arg0: i32) -> (i32, i32, i32) {
    %c0_i32 = arith.constant 0 : i32
    %c0_i32_0 = arith.constant 0 : i32
    %c0_i32_1 = arith.constant 0 : i32
    %c0_i32_2 = arith.constant 0 : i32
    return %c0_i32, %c0_i32_0, %c0_i32_1 : i32, i32, i32
  }
  func.func @transform_4(%arg0: i32) -> (i32, i32, i32, i32) {
    %c0_i32 = arith.constant 0 : i32
    %c0_i32_0 = arith.constant 0 : i32
    %c0_i32_1 = arith.constant 0 : i32
    %c0_i32_2 = arith.constant 0 : i32
    return %arg0, %c0_i32, %c0_i32_0, %c0_i32_1 : i32, i32, i32, i32
  }
  func.func @transform_5(%arg0: i32) -> (i32, i32, i32) {
    %c0_i32 = arith.constant 0 : i32
    %c0_i32_0 = arith.constant 0 : i32
    %c0_i32_1 = arith.constant 0 : i32
    return %arg0, %c0_i32, %c0_i32_0 : i32, i32, i32
  }
  func.func @transform_6(%arg0: i32) -> (i32, i32, i32) {
    %c0_i32 = arith.constant 0 : i32
    %c0_i32_0 = arith.constant 0 : i32
    %c0_i32_1 = arith.constant 0 : i32
    return %arg0, %c0_i32, %c0_i32_0 : i32, i32, i32
  }
}

</mosaic_0001>

<bundles_post_ra>
// kernel: residual_block.5
= control target key start
LH: loop header
LB: loop body
LE: loop exit
PB: predicated region body
PF: predicated region fallthrough
CT: control target
= control target key end

     0   :  { %s582_s15 = smov 0   ;;  %s783_s0 = inlined_call_operand.vmem [shape: f32[2,16,16,128], index: 0, kind: input, shape index: {}]   ;;  %s784_s1 = inlined_call_operand.vmem [shape: f32[1,128], index: 1, kind: input, shape index: {}]   ;;  %s785_s2 = inlined_call_operand.vmem [shape: f32[1,128], index: 2, kind: input, shape index: {}]   ;;  %s786_s3 = inlined_call_operand.vmem [shape: f32[2,16,16,128], index: 3, kind: input, shape index: {}]   ;;  %s787_s4 = inlined_call_operand.vmem [shape: f32[2,16,16,128], index: 4, kind: output, shape index: {}]  }
   0x1 LB: > { %s523_s16 = sadd.s32 4294967295, %s555_s15   ;;  %p527_p0 = scmp.ge.s32.totalorder %s555_s15, 1  ;;  %s555_s15 = sphi %s582_s15, %s14_s15  }
   0x2   : > { %p172_p1 = scmp.lt.s32.totalorder %s555_s15, 3 }
   0x4   : > { %p173_p2 = pnand %p527_p0, %p172_p1 }
   0x5   : > { %p203_p3 = scmp.lt.s32.totalorder (!%p173_p2), %s523_s16, 1  ;;  %v595_v0 = vld [vmem:[%s784_s1] ss:$0 sm:$0xff] (!%p173_p2) }
   0x6   : > { %176 = sbr.rel (%p173_p2) target bundleno = 54 (0x36), region = 36  ;;  %v613_v2 = vld [vmem:[%s785_s2] ss:$0 sm:$0xff] (!%p173_p2) }
   0xd   : > { %s789_s16 = smov (!%p203_p3, %s523_s16), 1 }
   0xe   : > { %s590_s17 = sshll.u32 %s789_s16, 8 }
   0xf   : > { %s601_s22 = scalar_lea.vmem %s783_s0, %s590_s17  ;;  %s607_s25 = scalar_lea.vmem %s786_s3, %s590_s17 }
  0x10   : > { %v218_v1 = vld [vmem:[%s601_s22] sm:$0xff]  ;;  %v219_v3 = vld [vmem:[%s601_s22 + $0x8] sm:$0xff]  ;;  %v220_v6 = vld [vmem:[%s601_s22 + $0x10] sm:$0xff]  ;;  %s641_s30 = scalar_lea.vmem %s787_s4, %s590_s17 }
  0x11   : > { %v257_v4 = vmul.f32 %v595_v0, %v218_v1  ;;  %v258_v5 = vmul.f32 %v595_v0, %v219_v3  ;;  %v259_v7 = vmul.f32 %v595_v0, %v220_v6  ;;  %v221_v8 = vld [vmem:[%s601_s22 + $0x18] sm:$0xff]  ;;  %v222_v9 = vld [vmem:[%s601_s22 + $0x20] sm:$0xff]  ;;  %v223_v15 = vld [vmem:[%s601_s22 + $0x28] sm:$0xff] }
  0x12   : > { %v360_v11 = vld [vmem:[%s607_s25] sm:$0xff]  ;;  %v260_v13 = vmul.f32 %v595_v0, %v221_v8  ;;  %v261_v14 = vmul.f32 %v595_v0, %v222_v9  ;;  %v361_v16 = vld [vmem:[%s607_s25 + $0x8] sm:$0xff]  ;;  %v262_v18 = vmul.f32 %v595_v0, %v223_v15  ;;  %v224_v19 = vld [vmem:[%s601_s22 + $0x30] sm:$0xff] }
  0x13   : > { %v296_v10 = vadd.f32 %v613_v2, %v257_v4  ;;  %v297_v12 = vadd.f32 %v613_v2, %v258_v5  ;;  %v298_v17 = vadd.f32 %v613_v2, %v259_v7  ;;  %v225_v20 = vld [vmem:[%s601_s22 + $0x38] sm:$0xff]  ;;  %v362_v23 = vld [vmem:[%s607_s25 + $0x10] sm:$0xff]  ;;  %v364_v28 = vld [vmem:[%s607_s25 + $0x20] sm:$0xff]  ;;  %v263_v30 = vmul.f32 %v595_v0, %v224_v19 }
  0x14   : > { %v299_v24 = vadd.f32 %v613_v2, %v260_v13  ;;  %v363_v25 = vld [vmem:[%s607_s25 + $0x18] sm:$0xff]  ;;  %v300_v26 = vadd.f32 %v613_v2, %v261_v14  ;;  %v301_v29 = vadd.f32 %v613_v2, %v262_v18  ;;  %v264_v31 = vmul.f32 %v595_v0, %v225_v20  ;;  %v226_v32 = vld [vmem:[%s601_s22 + $0x40] sm:$0xff]  ;;  %v227_v33 = vld [vmem:[%s601_s22 + $0x48] sm:$0xff] }
  0x15   : > { %v328_v21 = vmax.f32 %v296_v10, 0.0  ;;  %v329_v22 = vmax.f32 %v297_v12, 0.0  ;;  %v330_v27 = vmax.f32 %v298_v17, 0.0  ;;  %v365_v38 = vld [vmem:[%s607_s25 + $0x28] sm:$0xff]  ;;  %v228_v39 = vld [vmem:[%s601_s22 + $0x50] sm:$0xff]  ;;  %v302_v42 = vadd.f32 %v613_v2, %v263_v30  ;;  %v229_v44 = vld [vmem:[%s601_s22 + $0x58] sm:$0xff] }
  0x16   : > { %v331_v36 = vmax.f32 %v299_v24, 0.0  ;;  %v332_v37 = vmax.f32 %v300_v26, 0.0  ;;  %v333_v41 = vmax.f32 %v301_v29, 0.0  ;;  %v303_v43 = vadd.f32 %v613_v2, %v264_v31  ;;  %v230_v45 = vld [vmem:[%s601_s22 + $0x60] sm:$0xff]  ;;  %v366_v48 = vld [vmem:[%s607_s25 + $0x30] sm:$0xff]  ;;  %v367_v49 = vld [vmem:[%s607_s25 + $0x38] sm:$0xff] }
  0x17   : > { %v392_v34 = vadd.f32 %v360_v11, %v328_v21  ;;  %v393_v35 = vadd.f32 %v361_v16, %v329_v22  ;;  %v394_v40 = vadd.f32 %v362_v23, %v330_v27  ;;  %v265_v50 = vmul.f32 %v595_v0, %v226_v32  ;;  %v231_v52 = vld [vmem:[%s601_s22 + $0x68] sm:$0xff]  ;;  %v232_v61 = vld [vmem:[%s601_s22 + $0x70] sm:$0xff]  ;;  %v233_v62 = vld [vmem:[%s601_s22 + $0x78] sm:$0xff] }
  0x18   : > { %v395_v46 = vadd.f32 %v363_v25, %v331_v36  ;;  %v396_v47 = vadd.f32 %v364_v28, %v332_v37  ;;  %v266_v51 = vmul.f32 %v595_v0, %v227_v33  ;;  %v397_v53 = vadd.f32 %v365_v38, %v333_v41  ;;  %v368_v3 = vld [vmem:[%s607_s25 + $0x40] sm:$0xff]  ;;  %v369_v4 = vld [vmem:[%s607_s25 + $0x48] sm:$0xff]  ;;  %v370_v9 = vld [vmem:[%s607_s25 + $0x50] sm:$0xff] }
  0x19   : > { %424 = vst [vmem:[%s641_s30] sm:$0xff] %v392_v34  ;;  %425 = vst [vmem:[%s641_s30 + $0x8] sm:$0xff] %v393_v35  ;;  %v334_v54 = vmax.f32 %v302_v42, 0.0  ;;  %v335_v55 = vmax.f32 %v303_v43, 0.0  ;;  %v267_v56 = vmul.f32 %v595_v0, %v228_v39  ;;  %v304_v57 = vadd.f32 %v613_v2, %v265_v50  ;;  %v371_v11 = vld [vmem:[%s607_s25 + $0x58] sm:$0xff]  ;;  %v372_v14 = vld [vmem:[%s607_s25 + $0x60] sm:$0xff] }
  0x1a   : > { %426 = vst [vmem:[%s641_s30 + $0x10] sm:$0xff] %v394_v40  ;;  %427 = vst [vmem:[%s641_s30 + $0x18] sm:$0xff] %v395_v46  ;;  %v305_v58 = vadd.f32 %v613_v2, %v266_v51  ;;  %v268_v59 = vmul.f32 %v595_v0, %v229_v44  ;;  %v269_v60 = vmul.f32 %v595_v0, %v230_v45  ;;  %v234_v18 = vld [vmem:[%s601_s22 + $0x80] sm:$0xff]  ;;  %v235_v19 = vld [vmem:[%s601_s22 + $0x88] sm:$0xff] }
  0x1b   : > { %428 = vst [vmem:[%s641_s30 + $0x20] sm:$0xff] %v396_v47  ;;  %429 = vst [vmem:[%s641_s30 + $0x28] sm:$0xff] %v397_v53  ;;  %v398_v63 = vadd.f32 %v366_v48, %v334_v54  ;;  %v399_v1 = vadd.f32 %v367_v49, %v335_v55  ;;  %v306_v5 = vadd.f32 %v613_v2, %v267_v56  ;;  %v336_v7 = vmax.f32 %v304_v57, 0.0  ;;  %v373_v24 = vld [vmem:[%s607_s25 + $0x68] sm:$0xff]  ;;  %v236_v25 = vld [vmem:[%s601_s22 + $0x90] sm:$0xff] }
  0x1c   : > { %v270_v6 = vmul.f32 %v595_v0, %v231_v52  ;;  %v337_v8 = vmax.f32 %v305_v58, 0.0  ;;  %v307_v10 = vadd.f32 %v613_v2, %v268_v59  ;;  %v308_v12 = vadd.f32 %v613_v2, %v269_v60  ;;  %v237_v30 = vld [vmem:[%s601_s22 + $0x98] sm:$0xff]  ;;  %v238_v31 = vld [vmem:[%s601_s22 + $0xa0] sm:$0xff]  ;;  %v374_v34 = vld [vmem:[%s607_s25 + $0x70] sm:$0xff] }
  0x1d   : > { %430 = vst [vmem:[%s641_s30 + $0x30] sm:$0xff] %v398_v63  ;;  %431 = vst [vmem:[%s641_s30 + $0x38] sm:$0xff] %v399_v1  ;;  %v338_v13 = vmax.f32 %v306_v5, 0.0  ;;  %v271_v16 = vmul.f32 %v595_v0, %v232_v61  ;;  %v272_v17 = vmul.f32 %v595_v0, %v233_v62  ;;  %v400_v20 = vadd.f32 %v368_v3, %v336_v7  ;;  %v375_v35 = vld [vmem:[%s607_s25 + $0x78] sm:$0xff]  ;;  %v239_v38 = vld [vmem:[%s601_s22 + $0xa8] sm:$0xff] }
  0x1e   : > { %v309_v15 = vadd.f32 %v613_v2, %v270_v6  ;;  %v401_v21 = vadd.f32 %v369_v4, %v337_v8  ;;  %v339_v22 = vmax.f32 %v307_v10, 0.0  ;;  %v340_v23 = vmax.f32 %v308_v12, 0.0  ;;  %v240_v47 = vld [vmem:[%s601_s22 + $0xb0] sm:$0xff]  ;;  %v241_v48 = vld [vmem:[%s601_s22 + $0xb8] sm:$0xff]  ;;  %v376_v51 = vld [vmem:[%s607_s25 + $0x80] sm:$0xff] }
  0x1f   : > { %v402_v26 = vadd.f32 %v370_v9, %v338_v13  ;;  %v310_v28 = vadd.f32 %v613_v2, %v271_v16  ;;  %v311_v29 = vadd.f32 %v613_v2, %v272_v17  ;;  %432 = vst [vmem:[%s641_s30 + $0x40] sm:$0xff] %v400_v20  ;;  %v273_v36 = vmul.f32 %v595_v0, %v234_v18  ;;  %v377_v52 = vld [vmem:[%s607_s25 + $0x88] sm:$0xff]  ;;  %v378_v57 = vld [vmem:[%s607_s25 + $0x90] sm:$0xff]  ;;  %v379_v59 = vld [vmem:[%s607_s25 + $0x98] sm:$0xff] }
  0x20   : > { %v341_v27 = vmax.f32 %v309_v15, 0.0  ;;  %433 = vst [vmem:[%s641_s30 + $0x48] sm:$0xff] %v401_v21  ;;  %v403_v32 = vadd.f32 %v371_v11, %v339_v22  ;;  %v404_v33 = vadd.f32 %v372_v14, %v340_v23  ;;  %v274_v37 = vmul.f32 %v595_v0, %v235_v19  ;;  %v380_v62 = vld [vmem:[%s607_s25 + $0xa0] sm:$0xff]  ;;  %v243_v5 = vld [vmem:[%s601_s22 + $0xc8] sm:$0xff]  ;;  %v244_v11 = vld [vmem:[%s601_s22 + $0xd0] sm:$0xff] }
  0x21   : > { %434 = vst [vmem:[%s641_s30 + $0x50] sm:$0xff] %v402_v26  ;;  %v342_v40 = vmax.f32 %v310_v28, 0.0  ;;  %v343_v41 = vmax.f32 %v311_v29, 0.0  ;;  %v275_v42 = vmul.f32 %v595_v0, %v236_v25  ;;  %v312_v43 = vadd.f32 %v613_v2, %v273_v36  ;;  %v242_v4 = vld [vmem:[%s601_s22 + $0xc0] sm:$0xff]  ;;  %v381_v10 = vld [vmem:[%s607_s25 + $0xa8] sm:$0xff]  ;;  %v245_v16 = vld [vmem:[%s601_s22 + $0xd8] sm:$0xff] }
  0x22   : > { %v405_v39 = vadd.f32 %v373_v24, %v341_v27  ;;  %435 = vst [vmem:[%s641_s30 + $0x58] sm:$0xff] %v403_v32  ;;  %436 = vst [vmem:[%s641_s30 + $0x60] sm:$0xff] %v404_v33  ;;  %v313_v44 = vadd.f32 %v613_v2, %v274_v37  ;;  %v276_v45 = vmul.f32 %v595_v0, %v237_v30  ;;  %v246_v17 = vld [vmem:[%s601_s22 + $0xe0] sm:$0xff]  ;;  %v382_v20 = vld [vmem:[%s607_s25 + $0xb0] sm:$0xff] }
  0x23   : > { %v277_v46 = vmul.f32 %v595_v0, %v238_v31  ;;  %v406_v49 = vadd.f32 %v374_v34, %v342_v40  ;;  %v407_v50 = vadd.f32 %v375_v35, %v343_v41  ;;  %v314_v53 = vadd.f32 %v613_v2, %v275_v42  ;;  %v383_v21 = vld [vmem:[%s607_s25 + $0xb8] sm:$0xff]  ;;  %v247_v24 = vld [vmem:[%s601_s22 + $0xe8] sm:$0xff]  ;;  %v248_v33 = vld [vmem:[%s601_s22 + $0xf0] sm:$0xff] }
  0x24   : > { %437 = vst [vmem:[%s641_s30 + $0x68] sm:$0xff] %v405_v39  ;;  %v278_v54 = vmul.f32 %v595_v0, %v239_v38  ;;  %v344_v55 = vmax.f32 %v312_v43, 0.0  ;;  %v345_v56 = vmax.f32 %v313_v44, 0.0  ;;  %v315_v58 = vadd.f32 %v613_v2, %v276_v45  ;;  %v249_v34 = vld [vmem:[%s601_s22 + $0xf8] sm:$0xff]  ;;  %v384_v37 = vld [vmem:[%s607_s25 + $0xc0] sm:$0xff]  ;;  %v385_v38 = vld [vmem:[%s607_s25 + $0xc8] sm:$0xff] }
  0x25   : > { %v316_v60 = vadd.f32 %v613_v2, %v277_v46  ;;  %438 = vst [vmem:[%s641_s30 + $0x70] sm:$0xff] %v406_v49  ;;  %439 = vst [vmem:[%s641_s30 + $0x78] sm:$0xff] %v407_v50  ;;  %v346_v61 = vmax.f32 %v314_v53, 0.0  ;;  %v279_v1 = vmul.f32 %v595_v0, %v240_v47  ;;  %v280_v3 = vmul.f32 %v595_v0, %v241_v48  ;;  %v386_v43 = vld [vmem:[%s607_s25 + $0xd0] sm:$0xff]  ;;  %v387_v47 = vld [vmem:[%s607_s25 + $0xd8] sm:$0xff] }
  0x26   : > { %v317_v63 = vadd.f32 %v613_v2, %v278_v54  ;;  %v408_v6 = vadd.f32 %v376_v51, %v344_v55  ;;  %v409_v7 = vadd.f32 %v377_v52, %v345_v56  ;;  %v347_v8 = vmax.f32 %v315_v58, 0.0  ;;  %v388_v48 = vld [vmem:[%s607_s25 + $0xe0] sm:$0xff]  ;;  %v389_v56 = vld [vmem:[%s607_s25 + $0xe8] sm:$0xff] }
  0x27   : > { %v348_v9 = vmax.f32 %v316_v60, 0.0  ;;  %v410_v12 = vadd.f32 %v378_v57, %v346_v61  ;;  %v318_v14 = vadd.f32 %v613_v2, %v279_v1  ;;  %v319_v15 = vadd.f32 %v613_v2, %v280_v3 }
  0x28   : > { %v349_v13 = vmax.f32 %v317_v63, 0.0  ;;  %440 = vst [vmem:[%s641_s30 + $0x80] sm:$0xff] %v408_v6  ;;  %441 = vst [vmem:[%s641_s30 + $0x88] sm:$0xff] %v409_v7  ;;  %v411_v18 = vadd.f32 %v379_v59, %v347_v8  ;;  %v281_v22 = vmul.f32 %v595_v0, %v242_v4  ;;  %v282_v23 = vmul.f32 %v595_v0, %v243_v5  ;;  %v391_v63 = vld [vmem:[%s607_s25 + $0xf8] sm:$0xff] }
  0x29   : > { %v412_v19 = vadd.f32 %v380_v62, %v348_v9  ;;  %442 = vst [vmem:[%s641_s30 + $0x90] sm:$0xff] %v410_v12  ;;  %v350_v26 = vmax.f32 %v318_v14, 0.0  ;;  %v351_v27 = vmax.f32 %v319_v15, 0.0  ;;  %v283_v28 = vmul.f32 %v595_v0, %v244_v11  ;;  %v390_v62 = vld [vmem:[%s607_s25 + $0xf0] sm:$0xff] }
  0x2a   : > { %v413_v25 = vadd.f32 %v381_v10, %v349_v13  ;;  %443 = vst [vmem:[%s641_s30 + $0x98] sm:$0xff] %v411_v18  ;;  %v320_v29 = vadd.f32 %v613_v2, %v281_v22  ;;  %v321_v30 = vadd.f32 %v613_v2, %v282_v23  ;;  %v284_v31 = vmul.f32 %v595_v0, %v245_v16 }
  0x2b   : > { %444 = vst [vmem:[%s641_s30 + $0xa0] sm:$0xff] %v412_v19  ;;  %v285_v32 = vmul.f32 %v595_v0, %v246_v17  ;;  %v414_v35 = vadd.f32 %v382_v20, %v350_v26  ;;  %v415_v36 = vadd.f32 %v383_v21, %v351_v27  ;;  %v322_v39 = vadd.f32 %v613_v2, %v283_v28 }
  0x2c   : > { %445 = vst [vmem:[%s641_s30 + $0xa8] sm:$0xff] %v413_v25  ;;  %v286_v40 = vmul.f32 %v595_v0, %v247_v24  ;;  %v352_v41 = vmax.f32 %v320_v29, 0.0  ;;  %v353_v42 = vmax.f32 %v321_v30, 0.0  ;;  %v323_v44 = vadd.f32 %v613_v2, %v284_v31 }
  0x2d   : > { %v324_v45 = vadd.f32 %v613_v2, %v285_v32  ;;  %446 = vst [vmem:[%s641_s30 + $0xb0] sm:$0xff] %v414_v35  ;;  %447 = vst [vmem:[%s641_s30 + $0xb8] sm:$0xff] %v415_v36  ;;  %v354_v46 = vmax.f32 %v322_v39, 0.0  ;;  %v287_v50 = vmul.f32 %v595_v0, %v248_v33  ;;  %v288_v51 = vmul.f32 %v595_v0, %v249_v34 }
  0x2e   : > { %v325_v49 = vadd.f32 %v613_v2, %v286_v40  ;;  %v416_v52 = vadd.f32 %v384_v37, %v352_v41  ;;  %v417_v53 = vadd.f32 %v385_v38, %v353_v42  ;;  %v355_v54 = vmax.f32 %v323_v44, 0.0 }
  0x2f   : > { %v356_v55 = vmax.f32 %v324_v45, 0.0  ;;  %v418_v57 = vadd.f32 %v386_v43, %v354_v46  ;;  %v326_v59 = vadd.f32 %v613_v2, %v287_v50  ;;  %v327_v60 = vadd.f32 %v613_v2, %v288_v51 }
  0x30   : > { %v357_v58 = vmax.f32 %v325_v49, 0.0  ;;  %448 = vst [vmem:[%s641_s30 + $0xc0] sm:$0xff] %v416_v52  ;;  %449 = vst [vmem:[%s641_s30 + $0xc8] sm:$0xff] %v417_v53  ;;  %v419_v0 = vadd.f32 %v387_v47, %v355_v54 }
  0x31   : > { %v420_v61 = vadd.f32 %v388_v48, %v356_v55  ;;  %450 = vst [vmem:[%s641_s30 + $0xd0] sm:$0xff] %v418_v57  ;;  %v358_v3 = vmax.f32 %v326_v59, 0.0  ;;  %v359_v4 = vmax.f32 %v327_v60, 0.0 }
  0x32   : > { %v421_v1 = vadd.f32 %v389_v56, %v357_v58  ;;  %451 = vst [vmem:[%s641_s30 + $0xd8] sm:$0xff] %v419_v0 }
  0x33   : > { %452 = vst [vmem:[%s641_s30 + $0xe0] sm:$0xff] %v420_v61  ;;  %v422_v5 = vadd.f32 %v390_v62, %v358_v3  ;;  %v423_v6 = vadd.f32 %v391_v63, %v359_v4 }
  0x34   : > { %453 = vst [vmem:[%s641_s30 + $0xe8] sm:$0xff] %v421_v1 }
  0x35   : > { %454 = vst [vmem:[%s641_s30 + $0xf0] sm:$0xff] %v422_v5  ;;  %455 = vst [vmem:[%s641_s30 + $0xf8] sm:$0xff] %v423_v6 }
  0x36 PF: > { %s14_s15 = sadd.s32 1, %s555_s15  }
  0x37   : > { %p11_p4 = scmp.ge.s32.totalorder %s14_s15, 4  }
  0x39   :  { %13 = sbr.rel (!%p11_p4) target bundleno = 1 (0x1), region = 69 }

// kernel: residual_block.3
= control target key start
LH: loop header
LB: loop body
LE: loop exit
PB: predicated region body
PF: predicated region fallthrough
CT: control target
= control target key end

     0   :  { %s5236_s15 = smov 0   ;;  %s6337_s0 = inlined_call_operand.vmem [shape: f32[2,18,18,128], index: 0, kind: input, shape index: {}]   ;;  %s6338_s1 = inlined_call_operand.vmem [shape: f32[9,128,128], index: 1, kind: input, shape index: {}]   ;;  %s6339_s2 = inlined_call_operand.vmem [shape: f32[2,16,16,128], index: 2, kind: output, shape index: {0}]   ;;  %s6340_s3 = inlined_call_operand.vmem [shape: f32[2,1,128], index: 3, kind: output, shape index: {1}]   ;;  %s6341_s4 = inlined_call_operand.vmem [shape: f32[2,1,128], index: 4, kind: output, shape index: {2}]  }
   0x1 LB: > { %s3151_s16 = sadd.s32 4294967295, %s5209_s15   ;;  %p3155_p0 = scmp.ge.s32.totalorder %s5209_s15, 1  ;;  %s5209_s15 = sphi %s5236_s15, %s15_s15  }
   0x2   : > { %p167_p1 = scmp.lt.s32.totalorder %s5209_s15, 3 }
   0x4   : > { %p168_p2 = pnand %p3155_p0, %p167_p1 }
   0x6   : > { %171 = sbr.rel (%p168_p2) target bundleno = 567 (0x237), region = 28 }
   0xd   : > { %v3159_v0 = vld [vmem:[%s6338_s1 + $0x80] sm:$0xff]  ;;  %v3160_v1 = vld [vmem:[%s6338_s1 + $0x88] sm:$0xff]  ;;  %p199_p3 = scmp.lt.s32.totalorder %s3151_s16, 1  ;;  %v3161_v5 = vld [vmem:[%s6338_s1 + $0x90] sm:$0xff] }
   0xe   : > { %v3271_v2 = vld [vmem:[%s6338_s1 + $0x200] sm:$0xff]  ;;  %v4634_v3 = vpack.c.bf16 %v3160_v1, %v3159_v0  ;;  %v3272_v4 = vld [vmem:[%s6338_s1 + $0x208] sm:$0xff]  ;;  %v3162_v6 = vld [vmem:[%s6338_s1 + $0x98] sm:$0xff] }
   0xf   : > { %v5262_v7 = vpack.c.bf16 %v3272_v4, %v3271_v2  ;;  %v4638_v8 = vpack.c.bf16 %v3162_v6, %v3161_v5  ;;  %v3273_v9 = vld [vmem:[%s6338_s1 + $0x210] sm:$0xff]  ;;  %v3274_v10 = vld [vmem:[%s6338_s1 + $0x218] sm:$0xff]  ;;  %v3163_v11 = vld [vmem:[%s6338_s1 + $0xa0] sm:$0xff]  ;;  %s6443_s16 = smov (!%p199_p3, %s3151_s16), 1 }
  0x10   : > { %4635 = vmatprep.subr.bf16.mxu1 %v4634_v3  ;;  %v5275_v12 = vpack.c.bf16 %v3274_v10, %v3273_v9  ;;  %v3164_v13 = vld [vmem:[%s6338_s1 + $0xa8] sm:$0xff]  ;;  %v3275_v14 = vld [vmem:[%s6338_s1 + $0x220] sm:$0xff]  ;;  %s5194_s17 = smul.u32 432, %s6443_s16  ;;  %v3165_v18 = vld [vmem:[%s6338_s1 + $0xb0] sm:$0xff]  ;;  %s211_s11 = scalar_lea.vmem %s6340_s3, %s6443_s16 }
  0x11   : > { %v3276_v15 = vld [vmem:[%s6338_s1 + $0x228] sm:$0xff]  ;;  %4763 = vmatprep.subr.bf16.mxu0 %v5262_v7  ;;  %4637 = vmatpush3.bf16.msra.mxu1 %v4634_v3  ;;  %v4642_v16 = vpack.c.bf16 %v3164_v13, %v3163_v11  ;;  %v3166_v19 = vld [vmem:[%s6338_s1 + $0xb8] sm:$0xff]  ;;  %v3277_v20 = vld [vmem:[%s6338_s1 + $0x230] sm:$0xff]  ;;  %s214_s14 = scalar_lea.vmem %s6341_s4, %s6443_s16 }
  0x12   : > { %6380 = vst [vmem:[#allocation2_spill] sm:$0xff] %v5275_v12  ;;  %4765 = vmatpush3.bf16.msra.mxu0 %v5262_v7  ;;  %4639 = vmatprep.subr.bf16.mxu1 %v4638_v8  ;;  %v5290_v17 = vpack.c.bf16 %v3276_v15, %v3275_v14  ;;  %v3278_v21 = vld [vmem:[%s6338_s1 + $0x238] sm:$0xff]  ;;  %s5307_s28 = scalar_lea.vmem %s6337_s0, %s5194_s17  ;;  %v4646_v22 = vpack.c.bf16 %v3166_v19, %v3165_v18  ;;  %v3167_v24 = vld [vmem:[%s6338_s1 + $0xc0] sm:$0xff]  ;;  %v3168_v25 = vld [vmem:[%s6338_s1 + $0xc8] sm:$0xff] }
  0x13   : > { %4767 = vmatprep.subr.bf16.mxu0 %v5275_v12  ;;  %v5311_v23 = vpack.c.bf16 %v3278_v21, %v3277_v20  ;;  %v263_v26 = vld [vmem:[%s5307_s28 + $0x1] sm:$0xff]  ;;  %v5327_v29 = vld [vmem:[%s5307_s28 + $0x19] sm:$0xff]  ;;  %v4650_v30 = vpack.c.bf16 %v3168_v25, %v3167_v24  ;;  %v3169_v32 = vld [vmem:[%s6338_s1 + $0xd0] sm:$0xff] }
  0x14   : > { %6381 = vst [vmem:[#allocation3_spill] sm:$0xff] %v5290_v17  ;;  %v3279_v27 = vld [vmem:[%s6338_s1 + $0x240] sm:$0xff]  ;;  %v3280_v28 = vld [vmem:[%s6338_s1 + $0x248] sm:$0xff]  ;;  %3946 = vmatprep.mubr.f32.mxu1 %v263_v26  ;;  %4266 = vmatprep.mubr.f32.mxu0 %v5327_v29  ;;  %v3170_v33 = vld [vmem:[%s6338_s1 + $0xd8] sm:$0xff] }
  0x15   : > { %4641 = vmatpush3.bf16.msra.mxu1 %v4638_v8  ;;  %6382 = vst [vmem:[#allocation4_spill] sm:$0xff] %v5311_v23  ;;  %v5332_v31 = vpack.c.bf16 %v3280_v28, %v3279_v27  ;;  %v3281_v34 = vld [vmem:[%s6338_s1 + $0x250] sm:$0xff]  ;;  %v3282_v35 = vld [vmem:[%s6338_s1 + $0x258] sm:$0xff]  ;;  %v4654_v36 = vpack.c.bf16 %v3170_v33, %v3169_v32  ;;  %v3171_v38 = vld [vmem:[%s6338_s1 + $0xe0] sm:$0xff] }
  0x16   : > { %4769 = vmatpush3.bf16.msra.mxu0 %v5275_v12  ;;  %4643 = vmatprep.subr.bf16.mxu1 %v4642_v16  ;;  %v5348_v37 = vpack.c.bf16 %v3282_v35, %v3281_v34  ;;  %v3172_v39 = vld [vmem:[%s6338_s1 + $0xe8] sm:$0xff]  ;;  %v3283_v40 = vld [vmem:[%s6338_s1 + $0x260] sm:$0xff]  ;;  %v3173_v44 = vld [vmem:[%s6338_s1 + $0xf0] sm:$0xff] }
  0x17   : > { %4771 = vmatprep.subr.bf16.mxu0 %v5290_v17  ;;  %6383 = vst [vmem:[#allocation5_spill] sm:$0xff] %v5332_v31  ;;  %v3284_v41 = vld [vmem:[%s6338_s1 + $0x268] sm:$0xff]  ;;  %v4658_v42 = vpack.c.bf16 %v3172_v39, %v3171_v38  ;;  %v3174_v45 = vld [vmem:[%s6338_s1 + $0xf8] sm:$0xff]  ;;  %v3285_v46 = vld [vmem:[%s6338_s1 + $0x270] sm:$0xff] }
  0x18   : > { %6384 = vst [vmem:[#allocation6_spill] sm:$0xff] %v5348_v37  ;;  %v5364_v43 = vpack.c.bf16 %v3284_v41, %v3283_v40  ;;  %v3286_v47 = vld [vmem:[%s6338_s1 + $0x278] sm:$0xff]  ;;  %v4662_v48 = vpack.c.bf16 %v3174_v45, %v3173_v44  ;;  %v247_v50 = vld [vmem:[%s6338_s1] sm:$0xff]  ;;  %v248_v51 = vld [vmem:[%s6338_s1 + $0x8] sm:$0xff] }
  0x19   : > { %4645 = vmatpush3.bf16.msra.mxu1 %v4642_v16  ;;  %v5380_v49 = vpack.c.bf16 %v3286_v47, %v3285_v46  ;;  %v3319_v52 = vld [vmem:[%s6338_s1 + $0x280] sm:$0xff]  ;;  %v3320_v53 = vld [vmem:[%s6338_s1 + $0x288] sm:$0xff]  ;;  %v4666_v54 = vpack.c.bf16 %v248_v51, %v247_v50  ;;  %v3321_v56 = vld [vmem:[%s6338_s1 + $0x290] sm:$0xff] }
  0x1a   : > { %4773 = vmatpush3.bf16.msra.mxu0 %v5290_v17  ;;  %4647 = vmatprep.subr.bf16.mxu1 %v4646_v22  ;;  %6385 = vst [vmem:[#allocation7_spill] sm:$0xff] %v5364_v43  ;;  %v4794_v55 = vpack.c.bf16 %v3320_v53, %v3319_v52  ;;  %v3322_v57 = vld [vmem:[%s6338_s1 + $0x298] sm:$0xff]  ;;  %v264_v58 = vld [vmem:[%s5307_s28 + $0x9] sm:$0xff]  ;;  %v3240_v61 = vld [vmem:[%s5307_s28 + $0x21] sm:$0xff] }
  0x1b   : > { %4775 = vmatprep.subr.bf16.mxu0 %v5311_v23  ;;  %6386 = vst [vmem:[#allocation8_spill] sm:$0xff] %v5380_v49  ;;  %v249_v59 = vld [vmem:[%s6338_s1 + $0x10] sm:$0xff]  ;;  %v250_v60 = vld [vmem:[%s6338_s1 + $0x18] sm:$0xff]  ;;  %v4798_v62 = vpack.c.bf16 %v3322_v57, %v3321_v56  ;;  %v3323_v1 = vld [vmem:[%s6338_s1 + $0x2a0] sm:$0xff] }
  0x1c   : > { %v3241_v63 = vld [vmem:[%s5307_s28 + $0x31] sm:$0xff]  ;;  %v4670_v0 = vpack.c.bf16 %v250_v60, %v249_v59  ;;  %v3324_v2 = vld [vmem:[%s6338_s1 + $0x2a8] sm:$0xff]  ;;  %v251_v3 = vld [vmem:[%s6338_s1 + $0x20] sm:$0xff] }
  0x1d   : > { %4649 = vmatpush3.bf16.msra.mxu1 %v4646_v22  ;;  %v252_v4 = vld [vmem:[%s6338_s1 + $0x28] sm:$0xff]  ;;  %v3242_v5 = vld [vmem:[%s5307_s28 + $0x39] sm:$0xff]  ;;  %v4802_v8 = vpack.c.bf16 %v3324_v2, %v3323_v1  ;;  %v3325_v9 = vld [vmem:[%s6338_s1 + $0x2b0] sm:$0xff] }
  0x1e   : > { %4777 = vmatpush3.bf16.msra.mxu0 %v5311_v23  ;;  %4651 = vmatprep.subr.bf16.mxu1 %v4650_v30  ;;  %v3243_v6 = vld [vmem:[%s5307_s28 + $0x49] sm:$0xff]  ;;  %v3326_v10 = vld [vmem:[%s6338_s1 + $0x2b8] sm:$0xff]  ;;  %v4674_v11 = vpack.c.bf16 %v252_v4, %v251_v3  ;;  %v3245_v16 = vld [vmem:[%s5307_s28 + $0x61] sm:$0xff] }
  0x1f   : > { %4779 = vmatprep.subr.bf16.mxu0 %v5332_v31  ;;  %v253_v13 = vld [vmem:[%s6338_s1 + $0x30] sm:$0xff]  ;;  %v254_v14 = vld [vmem:[%s6338_s1 + $0x38] sm:$0xff]  ;;  %v4806_v18 = vpack.c.bf16 %v3326_v10, %v3325_v9  ;;  %v3327_v19 = vld [vmem:[%s6338_s1 + $0x2c0] sm:$0xff] }
  0x20   : > { %v3244_v15 = vld [vmem:[%s5307_s28 + $0x51] sm:$0xff]  ;;  %v3328_v20 = vld [vmem:[%s6338_s1 + $0x2c8] sm:$0xff]  ;;  %v4678_v21 = vpack.c.bf16 %v254_v14, %v253_v13  ;;  %v255_v22 = vld [vmem:[%s6338_s1 + $0x40] sm:$0xff] }
  0x21   : > { %4653 = vmatpush3.bf16.msra.mxu1 %v4650_v30  ;;  %v256_v24 = vld [vmem:[%s6338_s1 + $0x48] sm:$0xff]  ;;  %v3247_v26 = vld [vmem:[%s5307_s28 + $0x79] sm:$0xff]  ;;  %v4810_v27 = vpack.c.bf16 %v3328_v20, %v3327_v19  ;;  %v3329_v28 = vld [vmem:[%s6338_s1 + $0x2d0] sm:$0xff] }
  0x22   : > { %4781 = vmatpush3.bf16.msra.mxu0 %v5332_v31  ;;  %4655 = vmatprep.subr.bf16.mxu1 %v4654_v36  ;;  %v3246_v25 = vld [vmem:[%s5307_s28 + $0x69] sm:$0xff]  ;;  %v4682_v30 = vpack.c.bf16 %v256_v24, %v255_v22  ;;  %v258_v33 = vld [vmem:[%s6338_s1 + $0x58] sm:$0xff]  ;;  %v3248_v34 = vld [vmem:[%s5307_s28 + $0x81] sm:$0xff] }
  0x23   : > { %4783 = vmatprep.subr.bf16.mxu0 %v5348_v37  ;;  %v257_v32 = vld [vmem:[%s6338_s1 + $0x50] sm:$0xff]  ;;  %v3331_v38 = vld [vmem:[%s6338_s1 + $0x2e0] sm:$0xff]  ;;  %v3332_v39 = vld [vmem:[%s6338_s1 + $0x2e8] sm:$0xff] }
  0x24   : > { %v5469_v35 = vld [vmem:[%s5307_s28 + $0x91] sm:$0xff]  ;;  %v4686_v40 = vpack.c.bf16 %v258_v33, %v257_v32  ;;  %v259_v41 = vld [vmem:[%s6338_s1 + $0x60] sm:$0xff]  ;;  %v3251_v45 = vld [vmem:[%s5307_s28 + $0xa9] sm:$0xff]  ;;  %v4818_v46 = vpack.c.bf16 %v3332_v39, %v3331_v38 }
  0x25   : > { %4657 = vmatpush3.bf16.msra.mxu1 %v4654_v36  ;;  %v3250_v44 = vld [vmem:[%s5307_s28 + $0x99] sm:$0xff]  ;;  %v3333_v47 = vld [vmem:[%s6338_s1 + $0x2f0] sm:$0xff]  ;;  %v3368_v57 = vld [vmem:[%s6338_s1 + $0x308] sm:$0xff] }
  0x26   : > { %4785 = vmatpush3.bf16.msra.mxu0 %v5348_v37  ;;  %4659 = vmatprep.subr.bf16.mxu1 %v4658_v42  ;;  %v261_v51 = vld [vmem:[%s6338_s1 + $0x70] sm:$0xff]  ;;  %v262_v52 = vld [vmem:[%s6338_s1 + $0x78] sm:$0xff]  ;;  %v3367_v56 = vld [vmem:[%s6338_s1 + $0x300] sm:$0xff] }
  0x27   : > { %4787 = vmatprep.subr.bf16.mxu0 %v5364_v43  ;;  %v3252_v53 = vld [vmem:[%s5307_s28 + $0xb1] sm:$0xff]  ;;  %v3175_v59 = vld [vmem:[%s6338_s1 + $0x100] sm:$0xff]  ;;  %v3176_v60 = vld [vmem:[%s6338_s1 + $0x108] sm:$0xff] }
  0x28   : > { %v3370_v1 = vld [vmem:[%s6338_s1 + $0x318] sm:$0xff]  ;;  %v5528_v2 = vpack.c.bf16 %v3176_v60, %v3175_v59  ;;  %v5534_v3 = vld [vmem:[%s5307_s28 + $0x22] sm:$0xff]  ;;  %v5563_v14 = vld [vmem:[%s5307_s28 + $0x4a] sm:$0xff] }
  0x29   : > { %4661 = vmatpush3.bf16.msra.mxu1 %v4658_v42  ;;  %v260_v42 = vld [vmem:[%s6338_s1 + $0x68] sm:$0xff]  ;;  %v5537_v4 = vld [vmem:[%s5307_s28 + $0xd9] sm:$0xff]  ;;  %v5560_v13 = vld [vmem:[%s5307_s28 + $0xf1] sm:$0xff] }
  0x2a   : > { %4789 = vmatpush3.bf16.msra.mxu0 %v5364_v43  ;;  %4663 = vmatprep.subr.bf16.mxu1 %v4662_v48  ;;  %v4690_v50 = vpack.c.bf16 %v260_v42, %v259_v41  ;;  %v3372_v9 = vld [vmem:[%s6338_s1 + $0x328] sm:$0xff]  ;;  %v5575_v19 = vld [vmem:[%s5307_s28 + $0xf9] sm:$0xff]  ;;  %v3377_v33 = vld [vmem:[%s6338_s1 + $0x350] sm:$0xff] }
  0x2b   : > { %4791 = vmatprep.subr.bf16.mxu0 %v5380_v49  ;;  %v5553_v10 = vld [vmem:[%s5307_s28 + $0xe1] sm:$0xff]  ;;  %v5579_v20 = vld [vmem:[%s5307_s28 + $0x52] sm:$0xff] }
  0x2c   : > { %v5585_v22 = vld [vmem:[%s5307_s28 + $0x62] sm:$0xff]  ;;  %v5626_v39 = vld [vmem:[%s5307_s28 + $0x139] sm:$0xff] }
  0x2d   : > { %4665 = vmatpush3.bf16.msra.mxu1 %v4662_v48  ;;  %v3334_v48 = vld [vmem:[%s6338_s1 + $0x2f8] sm:$0xff]  ;;  %v5623_v38 = vld [vmem:[%s5307_s28 + $0x82] sm:$0xff]  ;;  %6391 = vst [vmem:[#allocation13_spill] sm:$0xff] %v5626_v39 }
  0x2e   : > { %4793 = vmatpush3.bf16.msra.mxu0 %v5380_v49  ;;  %4667 = vmatprep.subr.bf16.mxu1 %v4666_v54  ;;  %v3379_v42 = vld [vmem:[%s6338_s1 + $0x360] sm:$0xff]  ;;  %v3416_v60 = vld [vmem:[%s6338_s1 + $0x388] sm:$0xff]  ;;  %v3186_v49 = vld [vmem:[%s6338_s1 + $0x158] sm:$0xff] }
  0x2f   : > { %4795 = vmatprep.subr.bf16.mxu0 %v4794_v55  ;;  %v3415_v59 = vld [vmem:[%s6338_s1 + $0x380] sm:$0xff]  ;;  %v5803_v43 = vld [vmem:[%s5307_s28 + $0x152] sm:$0xff]  ;;  %v3224_v17 = vld [vmem:[%s6338_s1 + $0x188] sm:$0xff] }
  0x30   : > { %3947 = vmatmul.mubr.f32.vlgmr.msra.gmra.mrb[0].mxu1 %v264_v58  ;;  %v4694_v58 = vpack.c.bf16 %v262_v52, %v261_v51  ;;  %v3381_v51 = vld [vmem:[%s6338_s1 + $0x370] sm:$0xff]  ;;  %v3382_v52 = vld [vmem:[%s6338_s1 + $0x378] sm:$0xff]  ;;  %v3187_v37 = vld [vmem:[%s6338_s1 + $0x160] sm:$0xff] }
  0x31   : > { %4267 = vmatmul.mubr.f32.vlgmr.msra.gmra.mrb[0].mxu0 %v3240_v61  ;;  %4669 = vmatpush3.bf16.msra.mxu1 %v4666_v54  ;;  %v5501_v54 = vld [vmem:[%s5307_s28 + $0xc1] sm:$0xff]  ;;  %v3418_v12 = vld [vmem:[%s6338_s1 + $0x398] sm:$0xff] }
  0x32   : > { %4797 = vmatpush3.bf16.msra.mxu0 %v4794_v55  ;;  %3949 = vmatprep.mubr.f32.mxu1 %v5327_v29  ;;  %v3330_v29 = vld [vmem:[%s6338_s1 + $0x2d8] sm:$0xff]  ;;  %v4822_v55 = vpack.c.bf16 %v3334_v48, %v3333_v47  ;;  %v5651_v48 = vld [vmem:[%s5307_s28 + $0xaa] sm:$0xff]  ;;  %v3317_v23 = vld [vmem:[%s5307_s28 + $0x182] sm:$0xff] }
  0x33   : > { %4269 = vmatprep.mubr.f32.mxu0 %v3241_v63  ;;  %4799 = vmatprep.subr.bf16.mxu0 %v4798_v62  ;;  %v4814_v36 = vpack.c.bf16 %v3330_v29, %v3329_v28  ;;  %v5601_v28 = vld [vmem:[%s5307_s28 + $0x6a] sm:$0xff]  ;;  %v5604_v29 = vld [vmem:[%s5307_s28 + $0x121] sm:$0xff] }
  0x34   : > { %3950 = vmatmul.mubr.f32.gmra.mrb[2].mxu1 %v3240_v61  ;;  %4671 = vmatprep.subr.bf16.mxu1 %v4670_v0  ;;  %v5517_v61 = vld [vmem:[%s5307_s28 + $0xc9] sm:$0xff]  ;;  %6389 = vst [vmem:[#allocation11_spill] sm:$0xff] %v5604_v29  ;;  %v5648_v47 = vld [vmem:[%s5307_s28 + $0x151] sm:$0xff] }
  0x35   : > { %4270 = vmatmul.mubr.f32.gmra.mrb[2].mxu0 %v3242_v5  ;;  %3952 = vmatprep.mubr.f32.mxu1 %v3241_v63  ;;  %v4826_v63 = vpack.c.bf16 %v3368_v57, %v3367_v56  ;;  %6393 = vst [vmem:[#allocation15_spill] sm:$0xff] %v5648_v47  ;;  %v5670_v56 = vld [vmem:[%s5307_s28 + $0x169] sm:$0xff] }
  0x36   : > { %4801 = vmatpush3.bf16.msra.mxu0 %v4798_v62  ;;  %4272 = vmatprep.mubr.f32.mxu0 %v3243_v6  ;;  %v5520_v62 = vld [vmem:[%s5307_s28 + $0x1a] sm:$0xff]  ;;  %6395 = vst [vmem:[#allocation17_spill] sm:$0xff] %v5670_v56  ;;  %v5673_v57 = vld [vmem:[%s5307_s28 + $0xc2] sm:$0xff] }
  0x37   : > { %4803 = vmatprep.subr.bf16.mxu0 %v4802_v8  ;;  %4673 = vmatpush3.bf16.msra.mxu1 %v4670_v0  ;;  %v3369_v0 = vld [vmem:[%s6338_s1 + $0x310] sm:$0xff] }
  0x38   : > { %3953 = vmatmul.mubr.f32.gmra.mrb[4].mxu1 %v3242_v5  ;;  %4675 = vmatprep.subr.bf16.mxu1 %v4674_v11  ;;  %v5540_v5 = vld [vmem:[%s5307_s28 + $0x32] sm:$0xff] }
  0x39   : > { %4273 = vmatmul.mubr.f32.gmra.mrb[4].mxu0 %v3244_v15  ;;  %3955 = vmatprep.mubr.f32.mxu1 %v3243_v6  ;;  %v4830_v6 = vpack.c.bf16 %v3370_v1, %v3369_v0  ;;  %v5689_v0 = vld [vmem:[%s5307_s28 + $0xca] sm:$0xff]  ;;  %v215_v1 = vld [vmem:[%s5307_s28] sm:$0xff] }
  0x3a   : > { %4805 = vmatpush3.bf16.msra.mxu0 %v4802_v8  ;;  %4275 = vmatprep.mubr.f32.mxu0 %v3245_v16  ;;  %v3371_v8 = vld [vmem:[%s6338_s1 + $0x320] sm:$0xff] }
  0x3b   : > { %4807 = vmatprep.subr.bf16.mxu0 %v4806_v18  ;;  %4677 = vmatpush3.bf16.msra.mxu1 %v4674_v11  ;;  %v5557_v11 = vld [vmem:[%s5307_s28 + $0x3a] sm:$0xff] }
  0x3c   : > { %3956 = vmatmul.mubr.f32.gmra.mrb[6].mxu1 %v3244_v15  ;;  %4679 = vmatprep.subr.bf16.mxu1 %v4678_v21  ;;  %v4834_v15 = vpack.c.bf16 %v3372_v9, %v3371_v8  ;;  %v5695_v8 = vpack.c.bf16 %v3416_v60, %v3415_v59  ;;  %v3177_v9 = vld [vmem:[%s6338_s1 + $0x110] sm:$0xff]  ;;  %v5756_v59 = vld [vmem:[%s5307_s28 + $0x48] sm:$0xff] }
  0x3d   : > { %4276 = vmatmul.mubr.f32.gmra.mrb[6].mxu0 %v3246_v25  ;;  %3958 = vmatprep.mubr.f32.mxu1 %v3245_v16  ;;  %v3373_v16 = vld [vmem:[%s6338_s1 + $0x330] sm:$0xff]  ;;  %6399 = vst [vmem:[#allocation21_spill] sm:$0xff] %v5756_v59  ;;  %v5759_v60 = vld [vmem:[%s5307_s28 + $0x122] sm:$0xff] }
  0x3e   : > { %4809 = vmatpush3.bf16.msra.mxu0 %v4806_v18  ;;  %4278 = vmatprep.mubr.f32.mxu0 %v3247_v26  ;;  %v3374_v18 = vld [vmem:[%s6338_s1 + $0x338] sm:$0xff] }
  0x3f   : > { %4811 = vmatprep.subr.bf16.mxu0 %v4810_v27  ;;  %4681 = vmatpush3.bf16.msra.mxu1 %v4678_v21  ;;  %v5582_v21 = vld [vmem:[%s5307_s28 + $0x109] sm:$0xff]  ;;  %v4838_v24 = vpack.c.bf16 %v3374_v18, %v3373_v16 }
  0x40   : > { %3959 = vmatmul.mubr.f32.gmra.mrb[8].mxu1 %v3246_v25  ;;  %4683 = vmatprep.subr.bf16.mxu1 %v4682_v30  ;;  %6387 = vst [vmem:[#allocation9_spill] sm:$0xff] %v5582_v21  ;;  %v3375_v25 = vld [vmem:[%s6338_s1 + $0x340] sm:$0xff]  ;;  %v216_v16 = vld [vmem:[%s5307_s28 + $0x8] sm:$0xff] }
  0x41   : > { %4279 = vmatmul.mubr.f32.gmra.mrb[8].mxu0 %v3248_v34  ;;  %3961 = vmatprep.mubr.f32.mxu1 %v3247_v26  ;;  %v3376_v26 = vld [vmem:[%s6338_s1 + $0x348] sm:$0xff] }
  0x42   : > { %4813 = vmatpush3.bf16.msra.mxu0 %v4810_v27  ;;  %4281 = vmatprep.mubr.f32.mxu0 %v5469_v35  ;;  %v5597_v27 = vld [vmem:[%s5307_s28 + $0x111] sm:$0xff]  ;;  %v4842_v32 = vpack.c.bf16 %v3376_v26, %v3375_v25  ;;  %v5708_v18 = vld [vmem:[%s5307_s28 + $0xe2] sm:$0xff] }
  0x43   : > { %4815 = vmatprep.subr.bf16.mxu0 %v4814_v36  ;;  %4685 = vmatpush3.bf16.msra.mxu1 %v4682_v30  ;;  %6388 = vst [vmem:[#allocation10_spill] sm:$0xff] %v5597_v27  ;;  %v5607_v30 = vld [vmem:[%s5307_s28 + $0x7a] sm:$0xff]  ;;  %v5714_v25 = vld [vmem:[%s5307_s28 + $0xf2] sm:$0xff] }
  0x44   : > { %3962 = vmatmul.mubr.f32.gmra.mrb[10].mxu1 %v3248_v34  ;;  %4687 = vmatprep.subr.bf16.mxu1 %v4686_v40  ;;  %v3378_v34 = vld [vmem:[%s6338_s1 + $0x358] sm:$0xff] }
  0x45   : > { %4282 = vmatmul.mubr.f32.gmra.mrb[10].mxu0 %v3250_v44  ;;  %3964 = vmatprep.mubr.f32.mxu1 %v5469_v35  ;;  %v4846_v41 = vpack.c.bf16 %v3378_v34, %v3377_v33  ;;  %v3180_v33 = vld [vmem:[%s6338_s1 + $0x128] sm:$0xff]  ;;  %v5726_v34 = vld [vmem:[%s5307_s28 + $0x20] sm:$0xff] }
  0x46   : > { %4817 = vmatpush3.bf16.msra.mxu0 %v4814_v36  ;;  %4284 = vmatprep.mubr.f32.mxu0 %v3251_v45  ;;  %v5619_v36 = vld [vmem:[%s5307_s28 + $0x129] sm:$0xff] }
  0x47   : > { %4819 = vmatprep.subr.bf16.mxu0 %v4818_v46  ;;  %4689 = vmatpush3.bf16.msra.mxu1 %v4686_v40  ;;  %6390 = vst [vmem:[#allocation12_spill] sm:$0xff] %v5619_v36  ;;  %v5629_v40 = vld [vmem:[%s5307_s28 + $0x92] sm:$0xff] }
  0x48   : > { %3965 = vmatmul.mubr.f32.gmra.mrb[12].mxu1 %v3250_v44  ;;  %4691 = vmatprep.subr.bf16.mxu1 %v4690_v50  ;;  %v3380_v44 = vld [vmem:[%s6338_s1 + $0x368] sm:$0xff] }
  0x49   : > { %4285 = vmatmul.mubr.f32.gmra.mrb[12].mxu0 %v3252_v53  ;;  %3967 = vmatprep.mubr.f32.mxu1 %v3251_v45  ;;  %v5641_v45 = vld [vmem:[%s5307_s28 + $0x141] sm:$0xff] }
  0x4a   : > { %4821 = vmatpush3.bf16.msra.mxu0 %v4818_v46  ;;  %4287 = vmatprep.mubr.f32.mxu0 %v5501_v54  ;;  %6392 = vst [vmem:[#allocation14_spill] sm:$0xff] %v5641_v45  ;;  %v5645_v46 = vld [vmem:[%s5307_s28 + $0x9a] sm:$0xff] }
  0x4b   : > { %4823 = vmatprep.subr.bf16.mxu0 %v4822_v55  ;;  %4693 = vmatpush3.bf16.msra.mxu1 %v4690_v50  ;;  %v4850_v50 = vpack.c.bf16 %v3380_v44, %v3379_v42  ;;  %v5734_v42 = vld [vmem:[%s5307_s28 + $0x30] sm:$0xff] }
  0x4c   : > { %3968 = vmatmul.mubr.f32.gmra.mrb[14].mxu1 %v3252_v53  ;;  %4695 = vmatprep.subr.bf16.mxu1 %v4694_v58  ;;  %v5663_v53 = vld [vmem:[%s5307_s28 + $0x159] sm:$0xff]  ;;  %6397 = vst [vmem:[#allocation19_spill] sm:$0xff] %v5734_v42  ;;  %v5737_v44 = vld [vmem:[%s5307_s28 + $0x10a] sm:$0xff] }
  0x4d   : > { %4288 = vmatmul.mubr.f32.gmra.mrb[14].mxu0 %v5517_v61  ;;  %3970 = vmatprep.mubr.f32.mxu1 %v5501_v54  ;;  %6394 = vst [vmem:[#allocation16_spill] sm:$0xff] %v5663_v53 }
  0x4e   : > { %4825 = vmatpush3.bf16.msra.mxu0 %v4822_v55  ;;  %4346 = vmatprep.mubr.f32.mxu0 %v5520_v62  ;;  %v5667_v55 = vld [vmem:[%s5307_s28 + $0xb2] sm:$0xff] }
  0x4f   : > { %4827 = vmatprep.subr.bf16.mxu0 %v4826_v63  ;;  %4697 = vmatpush3.bf16.msra.mxu1 %v4694_v58  ;;  %v4854_v58 = vpack.c.bf16 %v3382_v52, %v3381_v51  ;;  %v3182_v51 = vld [vmem:[%s6338_s1 + $0x138] sm:$0xff] }
  0x50   : > { %3971 = vmatmul.mubr.f32.gmra.mrb[16].mxu1 %v5517_v61  ;;  %4699 = vmatprep.subr.bf16.mxu1 %v5528_v2  ;;  %v5749_v52 = vld [vmem:[%s5307_s28 + $0x38] sm:$0xff] }
  0x51   : > { %4347 = vmatmul.mubr.f32.vlgmr.msra.gmra.mrb[0].mxu0 %v5534_v3  ;;  %3973 = vmatprep.mubr.f32.mxu1 %v5537_v4  ;;  %6398 = vst [vmem:[#allocation20_spill] sm:$0xff] %v5749_v52 }
  0x52   : > { %4829 = vmatpush3.bf16.msra.mxu0 %v4826_v63  ;;  %4349 = vmatprep.mubr.f32.mxu0 %v5540_v5  ;;  %v5685_v63 = vld [vmem:[%s5307_s28 + $0x171] sm:$0xff] }
  0x53   : > { %4831 = vmatprep.subr.bf16.mxu0 %v4830_v6  ;;  %6396 = vst [vmem:[#allocation18_spill] sm:$0xff] %v5685_v63 }
  0x54   : > { %3974 = vmatmul.mubr.f32.gmra.mrb[18].mxu1 %v5553_v10 }
  0x55   : > { %4350 = vmatmul.mubr.f32.gmra.mrb[2].mxu0 %v5557_v11  ;;  %3976 = vmatprep.mubr.f32.mxu1 %v5560_v13 }
  0x56   : > { %4352 = vmatprep.mubr.f32.mxu0 %v5563_v14  ;;  %4833 = vmatpush3.bf16.msra.mxu0 %v4830_v6  ;;  %v5693_v6 = vld [vmem:[%s5307_s28 + $0xda] sm:$0xff] }
  0x57   : > { %4835 = vmatprep.subr.bf16.mxu0 %v4834_v15 }
  0x58   : > { %3977 = vmatmul.mubr.f32.gmra.mrb[20].mxu1 %v5575_v19 }
  0x59   : > { %4353 = vmatmul.mubr.f32.gmra.mrb[4].mxu0 %v5579_v20  ;;  %3979 = vmatprep.mubr.f32.mxu1 %v5582_v21  ;;  %v3422_v21 = vld [vmem:[%s6338_s1 + $0x3b8] sm:$0xff] }
  0x5a   : > { %4355 = vmatprep.mubr.f32.mxu0 %v5585_v22  ;;  %4837 = vmatpush3.bf16.msra.mxu0 %v4834_v15  ;;  %v3178_v15 = vld [vmem:[%s6338_s1 + $0x118] sm:$0xff] }
  0x5b   : > { %4839 = vmatprep.subr.bf16.mxu0 %v4838_v24  ;;  %v4702_v26 = vpack.c.bf16 %v3178_v15, %v3177_v9  ;;  %v3183_v9 = vld [vmem:[%s6338_s1 + $0x140] sm:$0xff]  ;;  %v3184_v15 = vld [vmem:[%s6338_s1 + $0x148] sm:$0xff] }
  0x5c   : > { %3980 = vmatmul.mubr.f32.gmra.mrb[22].mxu1 %v5597_v27  ;;  %v3417_v27 = vld [vmem:[%s6338_s1 + $0x390] sm:$0xff] }
  0x5d   : > { %4356 = vmatmul.mubr.f32.gmra.mrb[6].mxu0 %v5601_v28  ;;  %3982 = vmatprep.mubr.f32.mxu1 %v5604_v29 }
  0x5e   : > { %4358 = vmatprep.mubr.f32.mxu0 %v5607_v30  ;;  %4841 = vmatpush3.bf16.msra.mxu0 %v4838_v24  ;;  %v5711_v24 = vld [vmem:[%s5307_s28 + $0x18] sm:$0xff] }
  0x5f   : > { %4843 = vmatprep.subr.bf16.mxu0 %v4842_v32 }
  0x60   : > { %3983 = vmatmul.mubr.f32.gmra.mrb[24].mxu1 %v5619_v36  ;;  %v3223_v36 = vld [vmem:[%s6338_s1 + $0x180] sm:$0xff] }
  0x61   : > { %4359 = vmatmul.mubr.f32.gmra.mrb[8].mxu0 %v5623_v38  ;;  %3985 = vmatprep.mubr.f32.mxu1 %v5626_v39  ;;  %v5863_v29 = vpack.c.bf16 %v3224_v17, %v3223_v36  ;;  %v5878_v17 = vld [vmem:[%s5307_s28 + $0xd8] sm:$0xff]  ;;  %v3419_v36 = vld [vmem:[%s6338_s1 + $0x3a0] sm:$0xff] }
  0x62   : > { %4361 = vmatprep.mubr.f32.mxu0 %v5629_v40  ;;  %4845 = vmatpush3.bf16.msra.mxu0 %v4842_v32  ;;  %v3179_v32 = vld [vmem:[%s6338_s1 + $0x120] sm:$0xff] }
  0x63   : > { %4847 = vmatprep.subr.bf16.mxu0 %v4846_v41 }
  0x64   : > { %3986 = vmatmul.mubr.f32.gmra.mrb[26].mxu1 %v5641_v45  ;;  %v3190_v45 = vld [vmem:[%s6338_s1 + $0x178] sm:$0xff] }
  0x65   : > { %4362 = vmatmul.mubr.f32.gmra.mrb[10].mxu0 %v5645_v46  ;;  %3988 = vmatprep.mubr.f32.mxu1 %v5648_v47  ;;  %v3189_v47 = vld [vmem:[%s6338_s1 + $0x170] sm:$0xff] }
  0x66   : > { %4364 = vmatprep.mubr.f32.mxu0 %v5651_v48  ;;  %4849 = vmatpush3.bf16.msra.mxu0 %v4846_v41  ;;  %v5731_v41 = vld [vmem:[%s5307_s28 + $0xfa] sm:$0xff]  ;;  %v4726_v39 = vpack.c.bf16 %v3190_v45, %v3189_v47  ;;  %v3318_v45 = vld [vmem:[%s5307_s28 + $0x18a] sm:$0xff] }
  0x67   : > { %4851 = vmatprep.subr.bf16.mxu0 %v4850_v50  ;;  %v5861_v47 = vld [vmem:[%s5307_s28 + $0xc0] sm:$0xff] }
  0x68   : > { %3989 = vmatmul.mubr.f32.gmra.mrb[28].mxu1 %v5663_v53  ;;  %v5825_v53 = vld [vmem:[%s5307_s28 + $0x16a] sm:$0xff]  ;;  %6409 = vst [vmem:[#allocation31_spill] sm:$0xff] %v5861_v47 }
  0x69   : > { %4365 = vmatmul.mubr.f32.gmra.mrb[12].mxu0 %v5667_v55  ;;  %3991 = vmatprep.mubr.f32.mxu1 %v5670_v56  ;;  %v3188_v56 = vld [vmem:[%s6338_s1 + $0x168] sm:$0xff] }
  0x6a   : > { %4367 = vmatprep.mubr.f32.mxu0 %v5673_v57  ;;  %4853 = vmatpush3.bf16.msra.mxu0 %v4850_v50  ;;  %v4706_v50 = vpack.c.bf16 %v3180_v33, %v3179_v32  ;;  %v5778_v32 = vld [vmem:[%s5307_s28 + $0x60] sm:$0xff]  ;;  %v4722_v31 = vpack.c.bf16 %v3188_v56, %v3187_v37  ;;  %v5841_v37 = vld [vmem:[%s5307_s28 + $0x172] sm:$0xff]  ;;  %v5844_v56 = vld [vmem:[%s5307_s28 + $0xa8] sm:$0xff] }
  0x6b   : > { %4855 = vmatprep.subr.bf16.mxu0 %v4854_v58  ;;  %6401 = vst [vmem:[#allocation23_spill] sm:$0xff] %v5778_v32  ;;  %v5781_v33 = vld [vmem:[%s5307_s28 + $0x13a] sm:$0xff]  ;;  %6407 = vst [vmem:[#allocation29_spill] sm:$0xff] %v5844_v56 }
  0x6c   : > { %3992 = vmatmul.mubr.f32.gmra.mrb[30].mxu1 %v5685_v63 }
  0x6d   : > { %4368 = vmatmul.mubr.f32.gmra.mrb[14].mxu0 %v5689_v0  ;;  %4026 = vmatprep.mubr.f32.mxu1 %v215_v1 }
  0x6e   : > { %4370 = vmatprep.mubr.f32.mxu0 %v5693_v6  ;;  %4857 = vmatpush3.bf16.msra.mxu0 %v4854_v58  ;;  %v5753_v58 = vld [vmem:[%s5307_s28 + $0x112] sm:$0xff] }
  0x6f   : > { %4859 = vmatprep.subr.bf16.mxu0 %v5695_v8 }
  0x70   : > { %4027 = vmatmul.mubr.f32.vlgmr.msra.gmra.mrb[0].mxu1 %v216_v16  ;;  %v5771_v16 = vld [vmem:[%s5307_s28 + $0x50] sm:$0xff] }
  0x71   : > { %4371 = vmatmul.mubr.f32.gmra.mrb[16].mxu0 %v5708_v18  ;;  %4701 = vmatpush3.bf16.msra.mxu1 %v5528_v2  ;;  %v3181_v2 = vld [vmem:[%s6338_s1 + $0x130] sm:$0xff]  ;;  %6400 = vst [vmem:[#allocation22_spill] sm:$0xff] %v5771_v16 }
  0x72   : > { %4029 = vmatprep.mubr.f32.mxu1 %v5711_v24  ;;  %4373 = vmatprep.mubr.f32.mxu0 %v5714_v25  ;;  %v4710_v1 = vpack.c.bf16 %v3182_v51, %v3181_v2  ;;  %v4714_v2 = vpack.c.bf16 %v3184_v15, %v3183_v9  ;;  %v3185_v51 = vld [vmem:[%s6338_s1 + $0x150] sm:$0xff]  ;;  %v5797_v9 = vld [vmem:[%s5307_s28 + $0x142] sm:$0xff]  ;;  %v5800_v15 = vld [vmem:[%s5307_s28 + $0x78] sm:$0xff] }
  0x73   : > { %4703 = vmatprep.subr.bf16.mxu1 %v4702_v26  ;;  %6403 = vst [vmem:[#allocation25_spill] sm:$0xff] %v5800_v15  ;;  %v4718_v63 = vpack.c.bf16 %v3186_v49, %v3185_v51  ;;  %v5819_v49 = vld [vmem:[%s5307_s28 + $0x15a] sm:$0xff]  ;;  %v5822_v51 = vld [vmem:[%s5307_s28 + $0x90] sm:$0xff] }
  0x74   : > { %4030 = vmatmul.mubr.f32.gmra.mrb[2].mxu1 %v5726_v34  ;;  %6405 = vst [vmem:[#allocation27_spill] sm:$0xff] %v5822_v51 }
  0x75   : > { %4374 = vmatmul.mubr.f32.gmra.mrb[18].mxu0 %v5731_v41  ;;  %4032 = vmatprep.mubr.f32.mxu1 %v5734_v42 }
  0x76   : > { %4376 = vmatprep.mubr.f32.mxu0 %v5737_v44  ;;  %4705 = vmatpush3.bf16.msra.mxu1 %v4702_v26  ;;  %v5775_v26 = vld [vmem:[%s5307_s28 + $0x12a] sm:$0xff] }
  0x77   : > { %4707 = vmatprep.subr.bf16.mxu1 %v4706_v50 }
  0x78   : > { %4033 = vmatmul.mubr.f32.gmra.mrb[4].mxu1 %v5749_v52 }
  0x79   : > { %4377 = vmatmul.mubr.f32.gmra.mrb[20].mxu0 %v5753_v58  ;;  %4035 = vmatprep.mubr.f32.mxu1 %v5756_v59 }
  0x7a   : > { %4379 = vmatprep.mubr.f32.mxu0 %v5759_v60  ;;  %4709 = vmatpush3.bf16.msra.mxu1 %v4706_v50  ;;  %v5793_v50 = vld [vmem:[%s5307_s28 + $0x68] sm:$0xff] }
  0x7b   : > { %4711 = vmatprep.subr.bf16.mxu1 %v4710_v1  ;;  %6402 = vst [vmem:[#allocation24_spill] sm:$0xff] %v5793_v50 }
  0x7c   : > { %4036 = vmatmul.mubr.f32.gmra.mrb[6].mxu1 %v5771_v16 }
  0x7d   : > { %4380 = vmatmul.mubr.f32.gmra.mrb[22].mxu0 %v5775_v26  ;;  %4038 = vmatprep.mubr.f32.mxu1 %v5778_v32 }
  0x7e   : > { %4382 = vmatprep.mubr.f32.mxu0 %v5781_v33  ;;  %4713 = vmatpush3.bf16.msra.mxu1 %v4710_v1  ;;  %v5815_v1 = vld [vmem:[%s5307_s28 + $0x80] sm:$0xff] }
  0x7f   : > { %4715 = vmatprep.subr.bf16.mxu1 %v4714_v2  ;;  %6404 = vst [vmem:[#allocation26_spill] sm:$0xff] %v5815_v1 }
  0x80   : > { %4039 = vmatmul.mubr.f32.gmra.mrb[8].mxu1 %v5793_v50 }
  0x81   : > { %4383 = vmatmul.mubr.f32.gmra.mrb[24].mxu0 %v5797_v9  ;;  %4041 = vmatprep.mubr.f32.mxu1 %v5800_v15 }
  0x82   : > { %4385 = vmatprep.mubr.f32.mxu0 %v5803_v43  ;;  %4717 = vmatpush3.bf16.msra.mxu1 %v4714_v2  ;;  %v5837_v2 = vld [vmem:[%s5307_s28 + $0x98] sm:$0xff] }
  0x83   : > { %4719 = vmatprep.subr.bf16.mxu1 %v4718_v63  ;;  %6406 = vst [vmem:[#allocation28_spill] sm:$0xff] %v5837_v2 }
  0x84   : > { %4042 = vmatmul.mubr.f32.gmra.mrb[10].mxu1 %v5815_v1 }
  0x85   : > { %4386 = vmatmul.mubr.f32.gmra.mrb[26].mxu0 %v5819_v49  ;;  %4044 = vmatprep.mubr.f32.mxu1 %v5822_v51 }
  0x86   : > { %4388 = vmatprep.mubr.f32.mxu0 %v5825_v53  ;;  %4721 = vmatpush3.bf16.msra.mxu1 %v4718_v63  ;;  %v5857_v63 = vld [vmem:[%s5307_s28 + $0xb0] sm:$0xff] }
  0x87   : > { %4723 = vmatprep.subr.bf16.mxu1 %v4722_v31  ;;  %6408 = vst [vmem:[#allocation30_spill] sm:$0xff] %v5857_v63 }
  0x88   : > { %4045 = vmatmul.mubr.f32.gmra.mrb[12].mxu1 %v5837_v2 }
  0x89   : > { %4389 = vmatmul.mubr.f32.gmra.mrb[28].mxu0 %v5841_v37  ;;  %4047 = vmatprep.mubr.f32.mxu1 %v5844_v56 }
  0x8a   : > { %4391 = vmatprep.mubr.f32.mxu0 %v3317_v23  ;;  %4725 = vmatpush3.bf16.msra.mxu1 %v4722_v31  ;;  %v5874_v23 = vld [vmem:[%s5307_s28 + $0xc8] sm:$0xff]  ;;  %v4862_v31 = vpack.c.bf16 %v3418_v12, %v3417_v27  ;;  %v5896_v12 = vld [vmem:[%s5307_s28 + $0xf0] sm:$0xff] }
  0x8b   : > { %4727 = vmatprep.subr.bf16.mxu1 %v4726_v39  ;;  %6410 = vst [vmem:[#allocation32_spill] sm:$0xff] %v5874_v23 }
  0x8c   : > { %4048 = vmatmul.mubr.f32.gmra.mrb[14].mxu1 %v5857_v63 }
  0x8d   : > { %4392 = vmatmul.mubr.f32.gmra.mrb[30].mxu0 %v3318_v45  ;;  %4050 = vmatprep.mubr.f32.mxu1 %v5861_v47  ;;  %v3420_v45 = vld [vmem:[%s6338_s1 + $0x3a8] sm:$0xff] }
  0x8e   : > { %4426 = vmatprep.mubr.f32.mxu0 %v5734_v42  ;;  %4729 = vmatpush3.bf16.msra.mxu1 %v4726_v39  ;;  %v5891_v39 = vld [vmem:[%s5307_s28 + $0xe0] sm:$0xff]  ;;  %v4866_v27 = vpack.c.bf16 %v3420_v45, %v3419_v36  ;;  %v5912_v36 = vld [vmem:[%s5307_s28 + $0x108] sm:$0xff] }
  0x8f   : > { %4731 = vmatprep.subr.bf16.mxu1 %v5863_v29  ;;  %v763_v42 = vld [vmem:[%s5307_s28 + $0xa] sm:$0xff] }
  0x90   : > { %4051 = vmatmul.mubr.f32.gmra.mrb[16].mxu1 %v5874_v23 }
  0x91   : > { %4427 = vmatmul.mubr.f32.vlgmr.msra.gmra.mrb[0].mxu0 %v5749_v52  ;;  %4053 = vmatprep.mubr.f32.mxu1 %v5878_v17  ;;  %v3421_v52 = vld [vmem:[%s6338_s1 + $0x3b0] sm:$0xff] }
  0x92   : > { %4861 = vmatpush3.bf16.msra.mxu0 %v5695_v8  ;;  %4429 = vmatprep.mubr.f32.mxu0 %v5756_v59  ;;  %v5908_v8 = vld [vmem:[%s5307_s28 + $0xf8] sm:$0xff]  ;;  %v4870_v45 = vpack.c.bf16 %v3422_v21, %v3421_v52  ;;  %v3423_v59 = vld [vmem:[%s6338_s1 + $0x3c0] sm:$0xff] }
  0x93   : > { %4863 = vmatprep.subr.bf16.mxu0 %v4862_v31  ;;  %v5928_v21 = vld [vmem:[%s5307_s28 + $0x120] sm:$0xff] }
  0x94   : > { %4054 = vmatmul.mubr.f32.gmra.mrb[18].mxu1 %v5891_v39 }
  0x95   : > { %4430 = vmatmul.mubr.f32.gmra.mrb[2].mxu0 %v5771_v16  ;;  %4056 = vmatprep.mubr.f32.mxu1 %v5896_v12  ;;  %v3424_v16 = vld [vmem:[%s6338_s1 + $0x3c8] sm:$0xff] }
  0x96   : > { %4432 = vmatprep.mubr.f32.mxu0 %v5778_v32  ;;  %4865 = vmatpush3.bf16.msra.mxu0 %v4862_v31  ;;  %v5924_v31 = vld [vmem:[%s5307_s28 + $0x110] sm:$0xff]  ;;  %v4874_v52 = vpack.c.bf16 %v3424_v16, %v3423_v59  ;;  %v5944_v59 = vld [vmem:[%s5307_s28 + $0x138] sm:$0xff] }
  0x97   : > { %4867 = vmatprep.subr.bf16.mxu0 %v4866_v27  ;;  %v3425_v32 = vld [vmem:[%s6338_s1 + $0x3d0] sm:$0xff] }
  0x98   : > { %4057 = vmatmul.mubr.f32.gmra.mrb[20].mxu1 %v5908_v8 }
  0x99   : > { %4433 = vmatmul.mubr.f32.gmra.mrb[4].mxu0 %v5793_v50  ;;  %4059 = vmatprep.mubr.f32.mxu1 %v5912_v36  ;;  %v3426_v50 = vld [vmem:[%s6338_s1 + $0x3d8] sm:$0xff] }
  0x9a   : > { %4435 = vmatprep.mubr.f32.mxu0 %v5800_v15  ;;  %4869 = vmatpush3.bf16.msra.mxu0 %v4866_v27  ;;  %v5940_v15 = vld [vmem:[%s5307_s28 + $0x128] sm:$0xff]  ;;  %v4878_v16 = vpack.c.bf16 %v3426_v50, %v3425_v32  ;;  %v3427_v27 = vld [vmem:[%s6338_s1 + $0x3e0] sm:$0xff]  ;;  %v5960_v32 = vld [vmem:[%s5307_s28 + $0x150] sm:$0xff] }
  0x9b   : > { %4871 = vmatprep.subr.bf16.mxu0 %v4870_v45 }
  0x9c   : > { %4060 = vmatmul.mubr.f32.gmra.mrb[22].mxu1 %v5924_v31 }
  0x9d   : > { %4436 = vmatmul.mubr.f32.gmra.mrb[6].mxu0 %v5815_v1  ;;  %4062 = vmatprep.mubr.f32.mxu1 %v5928_v21  ;;  %v3428_v1 = vld [vmem:[%s6338_s1 + $0x3e8] sm:$0xff] }
  0x9e   : > { %4438 = vmatprep.mubr.f32.mxu0 %v5822_v51  ;;  %4873 = vmatpush3.bf16.msra.mxu0 %v4870_v45  ;;  %v5956_v51 = vld [vmem:[%s5307_s28 + $0x140] sm:$0xff]  ;;  %v4882_v50 = vpack.c.bf16 %v3428_v1, %v3427_v27  ;;  %v3429_v45 = vld [vmem:[%s6338_s1 + $0x3f0] sm:$0xff]  ;;  %v5976_v1 = vld [vmem:[%s5307_s28 + $0x168] sm:$0xff] }
  0x9f   : > { %4875 = vmatprep.subr.bf16.mxu0 %v4874_v52  ;;  %v3463_v27 = vld [vmem:[%s6338_s1 + $0x400] sm:$0xff] }
  0xa0   : > { %4063 = vmatmul.mubr.f32.gmra.mrb[24].mxu1 %v5940_v15 }
  0xa1   : > { %4439 = vmatmul.mubr.f32.gmra.mrb[8].mxu0 %v5837_v2  ;;  %4065 = vmatprep.mubr.f32.mxu1 %v5944_v59  ;;  %v3430_v2 = vld [vmem:[%s6338_s1 + $0x3f8] sm:$0xff] }
  0xa2   : > { %4441 = vmatprep.mubr.f32.mxu0 %v5844_v56  ;;  %4877 = vmatpush3.bf16.msra.mxu0 %v4874_v52  ;;  %v5972_v56 = vld [vmem:[%s5307_s28 + $0x158] sm:$0xff]  ;;  %v4886_v52 = vpack.c.bf16 %v3430_v2, %v3429_v45  ;;  %v762_v2 = vld [vmem:[%s5307_s28 + $0x2] sm:$0xff]  ;;  %v3225_v45 = vld [vmem:[%s6338_s1 + $0x190] sm:$0xff] }
  0xa3   : > { %4879 = vmatprep.subr.bf16.mxu0 %v4878_v16 }
  0xa4   : > { %4066 = vmatmul.mubr.f32.gmra.mrb[26].mxu1 %v5956_v51 }
  0xa5   : > { %4442 = vmatmul.mubr.f32.gmra.mrb[10].mxu0 %v5857_v63  ;;  %4068 = vmatprep.mubr.f32.mxu1 %v5960_v32  ;;  %v3464_v63 = vld [vmem:[%s6338_s1 + $0x408] sm:$0xff] }
  0xa6   : > { %4444 = vmatprep.mubr.f32.mxu0 %v5861_v47  ;;  %4881 = vmatpush3.bf16.msra.mxu0 %v4878_v16  ;;  %v5988_v47 = vld [vmem:[%s5307_s28 + $0x170] sm:$0xff]  ;;  %v5992_v16 = vpack.c.bf16 %v3464_v63, %v3463_v27  ;;  %v3227_v63 = vld [vmem:[%s6338_s1 + $0x1a0] sm:$0xff]  ;;  %v3228_v27 = vld [vmem:[%s6338_s1 + $0x1a8] sm:$0xff] }
  0xa7   : > { %4883 = vmatprep.subr.bf16.mxu0 %v4882_v50 }
  0xa8   : > { %4069 = vmatmul.mubr.f32.gmra.mrb[28].mxu1 %v5972_v56 }
  0xa9   : > { %4445 = vmatmul.mubr.f32.gmra.mrb[12].mxu0 %v5874_v23  ;;  %4071 = vmatprep.mubr.f32.mxu1 %v5976_v1  ;;  %v3226_v23 = vld [vmem:[%s6338_s1 + $0x198] sm:$0xff] }
  0xaa   : > { %4447 = vmatprep.mubr.f32.mxu0 %v5878_v17  ;;  %4885 = vmatpush3.bf16.msra.mxu0 %v4882_v50  ;;  %v4734_v50 = vpack.c.bf16 %v3226_v23, %v3225_v45  ;;  %v4738_v23 = vpack.c.bf16 %v3228_v27, %v3227_v63  ;;  %v3236_v45 = vld [vmem:[%s6338_s1 + $0x1e8] sm:$0xff]  ;;  %v3238_v63 = vld [vmem:[%s6338_s1 + $0x1f8] sm:$0xff] }
  0xab   : > { %4887 = vmatprep.subr.bf16.mxu0 %v4886_v52  ;;  %v3365_v27 = vld [vmem:[%s5307_s28 + $0x198] sm:$0xff] }
  0xac   : > { %4072 = vmatmul.mubr.f32.gmra.mrb[30].mxu1 %v5988_v47 }
  0xad   : > { %4448 = vmatmul.mubr.f32.gmra.mrb[14].mxu0 %v5891_v39  ;;  %4106 = vmatprep.mubr.f32.mxu1 %v762_v2  ;;  %v3234_v2 = vld [vmem:[%s6338_s1 + $0x1d8] sm:$0xff] }
  0xae   : > { %4450 = vmatprep.mubr.f32.mxu0 %v5896_v12  ;;  %4889 = vmatpush3.bf16.msra.mxu0 %v4886_v52  ;;  %v3230_v52 = vld [vmem:[%s6338_s1 + $0x1b8] sm:$0xff] }
  0xaf   : > { %4891 = vmatprep.subr.bf16.mxu0 %v5992_v16 }
  0xb0   : > { %4107 = vmatmul.mubr.f32.vlgmr.msra.gmra.mrb[0].mxu1 %v763_v42  ;;  %v3229_v42 = vld [vmem:[%s6338_s1 + $0x1b0] sm:$0xff] }
  0xb1   : > { %4451 = vmatmul.mubr.f32.gmra.mrb[16].mxu0 %v5908_v8  ;;  %4733 = vmatpush3.bf16.msra.mxu1 %v5863_v29  ;;  %v3232_v29 = vld [vmem:[%s6338_s1 + $0x1c8] sm:$0xff] }
  0xb2   : > { %4109 = vmatprep.mubr.f32.mxu1 %v5520_v62  ;;  %4453 = vmatprep.mubr.f32.mxu0 %v5912_v36  ;;  %v4742_v62 = vpack.c.bf16 %v3230_v52, %v3229_v42  ;;  %v3465_v42 = vld [vmem:[%s6338_s1 + $0x410] sm:$0xff] }
  0xb3   : > { %4735 = vmatprep.subr.bf16.mxu1 %v4734_v50  ;;  %v3385_v52 = vld [vmem:[%s5307_s28 + $0x49] sm:$0xff] }
  0xb4   : > { %4110 = vmatmul.mubr.f32.gmra.mrb[2].mxu1 %v5534_v3  ;;  %v3231_v3 = vld [vmem:[%s6338_s1 + $0x1c0] sm:$0xff] }
  0xb5   : > { %4454 = vmatmul.mubr.f32.gmra.mrb[18].mxu0 %v5924_v31  ;;  %4112 = vmatprep.mubr.f32.mxu1 %v5540_v5  ;;  %v4746_v5 = vpack.c.bf16 %v3232_v29, %v3231_v3  ;;  %v3468_v3 = vld [vmem:[%s6338_s1 + $0x428] sm:$0xff] }
  0xb6   : > { %4456 = vmatprep.mubr.f32.mxu0 %v5928_v21  ;;  %4737 = vmatpush3.bf16.msra.mxu1 %v4734_v50  ;;  %v3237_v50 = vld [vmem:[%s6338_s1 + $0x1f0] sm:$0xff]  ;;  %v3387_v29 = vld [vmem:[%s5307_s28 + $0x61] sm:$0xff] }
  0xb7   : > { %4739 = vmatprep.subr.bf16.mxu1 %v4738_v23 }
  0xb8   : > { %4113 = vmatmul.mubr.f32.gmra.mrb[4].mxu1 %v5557_v11  ;;  %v3233_v11 = vld [vmem:[%s6338_s1 + $0x1d0] sm:$0xff] }
  0xb9   : > { %4457 = vmatmul.mubr.f32.gmra.mrb[20].mxu0 %v5940_v15  ;;  %4115 = vmatprep.mubr.f32.mxu1 %v5563_v14  ;;  %v4750_v14 = vpack.c.bf16 %v3234_v2, %v3233_v11  ;;  %v3470_v11 = vld [vmem:[%s6338_s1 + $0x438] sm:$0xff] }
  0xba   : > { %4459 = vmatprep.mubr.f32.mxu0 %v5944_v59  ;;  %4741 = vmatpush3.bf16.msra.mxu1 %v4738_v23  ;;  %v3366_v23 = vld [vmem:[%s5307_s28 + $0x1a0] sm:$0xff] }
  0xbb   : > { %4743 = vmatprep.subr.bf16.mxu1 %v4742_v62 }
  0xbc   : > { %4116 = vmatmul.mubr.f32.gmra.mrb[6].mxu1 %v5579_v20  ;;  %v3235_v20 = vld [vmem:[%s6338_s1 + $0x1e0] sm:$0xff] }
  0xbd   : > { %4460 = vmatmul.mubr.f32.gmra.mrb[22].mxu0 %v5956_v51  ;;  %4118 = vmatprep.mubr.f32.mxu1 %v5585_v22  ;;  %v6056_v22 = vld [vmem:[%s5307_s28 + $0x180] sm:$0xff] }
  0xbe   : > { %4462 = vmatprep.mubr.f32.mxu0 %v5960_v32  ;;  %4745 = vmatpush3.bf16.msra.mxu1 %v4742_v62 }
  0xbf   : > { %4747 = vmatprep.subr.bf16.mxu1 %v4746_v5 }
  0xc0   : > { %4119 = vmatmul.mubr.f32.gmra.mrb[8].mxu1 %v5601_v28  ;;  %v4754_v28 = vpack.c.bf16 %v3236_v45, %v3235_v20  ;;  %v3474_v45 = vld [vmem:[%s6338_s1 + $0x458] sm:$0xff] }
  0xc1   : > { %4463 = vmatmul.mubr.f32.gmra.mrb[24].mxu0 %v5972_v56  ;;  %4121 = vmatprep.mubr.f32.mxu1 %v5607_v30  ;;  %v6069_v30 = vld [vmem:[%s5307_s28 + $0x188] sm:$0xff] }
  0xc2   : > { %4465 = vmatprep.mubr.f32.mxu0 %v5976_v1  ;;  %4749 = vmatpush3.bf16.msra.mxu1 %v4746_v5  ;;  %v3469_v5 = vld [vmem:[%s6338_s1 + $0x430] sm:$0xff] }
  0xc3   : > { %4751 = vmatprep.subr.bf16.mxu1 %v4750_v14  ;;  %v4902_v2 = vpack.c.bf16 %v3470_v11, %v3469_v5  ;;  %v6193_v5 = vld [vmem:[%s5307_s28 + $0x189] sm:$0xff]  ;;  %v3413_v11 = vld [vmem:[%s5307_s28 + $0x199] sm:$0xff] }
  0xc4   : > { %4122 = vmatmul.mubr.f32.gmra.mrb[10].mxu1 %v5623_v38  ;;  %v4758_v38 = vpack.c.bf16 %v3238_v63, %v3237_v50  ;;  %v3476_v63 = vld [vmem:[%s6338_s1 + $0x468] sm:$0xff] }
  0xc5   : > { %4466 = vmatmul.mubr.f32.gmra.mrb[26].mxu0 %v5988_v47  ;;  %4124 = vmatprep.mubr.f32.mxu1 %v5629_v40  ;;  %v3383_v40 = vld [vmem:[%s5307_s28 + $0x31] sm:$0xff] }
  0xc6   : > { %4468 = vmatprep.mubr.f32.mxu0 %v6056_v22  ;;  %4753 = vmatpush3.bf16.msra.mxu1 %v4750_v14  ;;  %v3472_v14 = vld [vmem:[%s6338_s1 + $0x448] sm:$0xff] }
  0xc7   : > { %4755 = vmatprep.subr.bf16.mxu1 %v4754_v28 }
  0xc8   : > { %4125 = vmatmul.mubr.f32.gmra.mrb[12].mxu1 %v5645_v46  ;;  %v3466_v46 = vld [vmem:[%s6338_s1 + $0x418] sm:$0xff] }
  0xc9   : > { %4469 = vmatmul.mubr.f32.gmra.mrb[28].mxu0 %v6069_v30  ;;  %4127 = vmatprep.mubr.f32.mxu1 %v5651_v48  ;;  %v3384_v48 = vld [vmem:[%s5307_s28 + $0x39] sm:$0xff]  ;;  %v4894_v62 = vpack.c.bf16 %v3466_v46, %v3465_v42 }
  0xca   : > { %4471 = vmatprep.mubr.f32.mxu0 %v3365_v27  ;;  %4757 = vmatpush3.bf16.msra.mxu1 %v4754_v28  ;;  %v3393_v28 = vld [vmem:[%s5307_s28 + $0xa9] sm:$0xff]  ;;  %v3478_v27 = vld [vmem:[%s6338_s1 + $0x478] sm:$0xff]  ;;  %v6429_v46 = vld [vmem:[#allocation26_spill] sm:$0xff] }
  0xcb   : > { %4759 = vmatprep.subr.bf16.mxu1 %v4758_v38  ;;  %v6428_v42 = vld [vmem:[#allocation5_spill] sm:$0xff] }
  0xcc   : > { %4128 = vmatmul.mubr.f32.gmra.mrb[14].mxu1 %v5667_v55  ;;  %v3467_v55 = vld [vmem:[%s6338_s1 + $0x420] sm:$0xff] }
  0xcd   : > { %4472 = vmatmul.mubr.f32.gmra.mrb[30].mxu0 %v3366_v23  ;;  %4130 = vmatprep.mubr.f32.mxu1 %v5673_v57  ;;  %v3386_v57 = vld [vmem:[%s5307_s28 + $0x51] sm:$0xff] }
  0xce   : > { %4506 = vmatprep.mubr.f32.mxu0 %v3383_v40  ;;  %4761 = vmatpush3.bf16.msra.mxu1 %v4758_v38  ;;  %v6425_v38 = vld [vmem:[#allocation14_spill] sm:$0xff]  ;;  %v6426_v23 = vld [vmem:[#allocation25_spill] sm:$0xff]  ;;  %v6427_v40 = vld [vmem:[#allocation15_spill] sm:$0xff] }
  0xcf   : > { %4922 = vmatprep.subr.bf16.mxu1 %v5262_v7 }
  0xd0   : > { %4131 = vmatmul.mubr.f32.gmra.mrb[16].mxu1 %v5689_v0  ;;  %v4898_v0 = vpack.c.bf16 %v3468_v3, %v3467_v55  ;;  %v6185_v55 = vld [vmem:[%s5307_s28 + $0x181] sm:$0xff] }
  0xd1   : > { %4507 = vmatmul.mubr.f32.vlgmr.msra.gmra.mrb[0].mxu0 %v3384_v48  ;;  %4133 = vmatprep.mubr.f32.mxu1 %v5693_v6  ;;  %v3388_v6 = vld [vmem:[%s5307_s28 + $0x69] sm:$0xff]  ;;  %v6433_v3 = vld [vmem:[#allocation6_spill] sm:$0xff] }
  0xd2   : > { %4893 = vmatpush3.bf16.msra.mxu0 %v5992_v16  ;;  %4509 = vmatprep.mubr.f32.mxu0 %v3385_v52  ;;  %v3389_v16 = vld [vmem:[%s5307_s28 + $0x79] sm:$0xff]  ;;  %v6430_v48 = vld [vmem:[#allocation16_spill] sm:$0xff]  ;;  %v6431_v52 = vld [vmem:[#allocation27_spill] sm:$0xff] }
  0xd3   : > { %4895 = vmatprep.subr.bf16.mxu0 %v4894_v62 }
  0xd4   : > { %4134 = vmatmul.mubr.f32.gmra.mrb[18].mxu1 %v5708_v18  ;;  %v3471_v18 = vld [vmem:[%s6338_s1 + $0x440] sm:$0xff] }
  0xd5   : > { %4510 = vmatmul.mubr.f32.gmra.mrb[2].mxu0 %v3386_v57  ;;  %4136 = vmatprep.mubr.f32.mxu1 %v5714_v25  ;;  %v3390_v25 = vld [vmem:[%s5307_s28 + $0x81] sm:$0xff]  ;;  %v4906_v20 = vpack.c.bf16 %v3472_v14, %v3471_v18  ;;  %v6434_v57 = vld [vmem:[#allocation28_spill] sm:$0xff] }
  0xd6   : > { %4512 = vmatprep.mubr.f32.mxu0 %v3387_v29  ;;  %4897 = vmatpush3.bf16.msra.mxu0 %v4894_v62  ;;  %v6432_v62 = vld [vmem:[#allocation17_spill] sm:$0xff]  ;;  %v6435_v29 = vld [vmem:[#allocation18_spill] sm:$0xff] }
  0xd7   : > { %4899 = vmatprep.subr.bf16.mxu0 %v4898_v0  ;;  %v3414_v18 = vld [vmem:[%s5307_s28 + $0x1a1] sm:$0xff]  ;;  %v3431_v14 = vld [vmem:[%s5307_s28 + $0x32] sm:$0xff] }
  0xd8   : > { %4137 = vmatmul.mubr.f32.gmra.mrb[20].mxu1 %v5731_v41  ;;  %v3473_v41 = vld [vmem:[%s6338_s1 + $0x450] sm:$0xff] }
  0xd9   : > { %4513 = vmatmul.mubr.f32.gmra.mrb[4].mxu0 %v3388_v6  ;;  %4139 = vmatprep.mubr.f32.mxu1 %v5737_v44  ;;  %v3392_v44 = vld [vmem:[%s5307_s28 + $0x99] sm:$0xff]  ;;  %v4910_v50 = vpack.c.bf16 %v3474_v45, %v3473_v41  ;;  %v6437_v6 = vld [vmem:[#allocation7_spill] sm:$0xff] }
  0xda   : > { %4515 = vmatprep.mubr.f32.mxu0 %v3389_v16  ;;  %4901 = vmatpush3.bf16.msra.mxu0 %v4898_v0  ;;  %v6436_v0 = vld [vmem:[#allocation29_spill] sm:$0xff]  ;;  %v6438_v16 = vld [vmem:[#allocation30_spill] sm:$0xff]  ;;  %v3433_v45 = vld [vmem:[%s5307_s28 + $0x4a] sm:$0xff] }
  0xdb   : > { %4903 = vmatprep.subr.bf16.mxu0 %v4902_v2  ;;  %v3432_v41 = vld [vmem:[%s5307_s28 + $0x3a] sm:$0xff] }
  0xdc   : > { %4140 = vmatmul.mubr.f32.gmra.mrb[22].mxu1 %v5753_v58  ;;  %v3475_v58 = vld [vmem:[%s6338_s1 + $0x460] sm:$0xff] }
  0xdd   : > { %4516 = vmatmul.mubr.f32.gmra.mrb[6].mxu0 %v3390_v25  ;;  %4142 = vmatprep.mubr.f32.mxu1 %v5759_v60  ;;  %v4914_v60 = vpack.c.bf16 %v3476_v63, %v3475_v58  ;;  %v6440_v25 = vld [vmem:[#allocation8_spill] sm:$0xff]  ;;  %v3448_v58 = vld [vmem:[%s5307_s28 + $0xfa] sm:$0xff] }
  0xde   : > { %4518 = vmatprep.mubr.f32.mxu0 %v5469_v35  ;;  %4905 = vmatpush3.bf16.msra.mxu0 %v4902_v2  ;;  %v3394_v35 = vld [vmem:[%s5307_s28 + $0xb1] sm:$0xff]  ;;  %v6439_v2 = vld [vmem:[#allocation31_spill] sm:$0xff]  ;;  %v3258_v63 = vld [vmem:[%s5307_s28 + $0xf9] sm:$0xff] }
  0xdf   : > { %4907 = vmatprep.subr.bf16.mxu0 %v4906_v20 }
  0xe0   : > { %4143 = vmatmul.mubr.f32.gmra.mrb[24].mxu1 %v5775_v26  ;;  %v3477_v26 = vld [vmem:[%s6338_s1 + $0x470] sm:$0xff] }
  0xe1   : > { %4519 = vmatmul.mubr.f32.gmra.mrb[8].mxu0 %v3392_v44  ;;  %4145 = vmatprep.mubr.f32.mxu1 %v5781_v33  ;;  %v4918_v33 = vpack.c.bf16 %v3478_v27, %v3477_v26  ;;  %v3434_v44 = vld [vmem:[%s5307_s28 + $0x52] sm:$0xff]  ;;  %v3452_v27 = vld [vmem:[%s5307_s28 + $0x12a] sm:$0xff] }
  0xe2   : > { %4521 = vmatprep.mubr.f32.mxu0 %v3393_v28  ;;  %4909 = vmatpush3.bf16.msra.mxu0 %v4906_v20  ;;  %v6441_v20 = vld [vmem:[#allocation32_spill] sm:$0xff]  ;;  %v3435_v28 = vld [vmem:[%s5307_s28 + $0x62] sm:$0xff] }
  0xe3   : > { %4911 = vmatprep.subr.bf16.mxu0 %v4910_v50  ;;  %v3260_v26 = vld [vmem:[%s5307_s28 + $0x111] sm:$0xff] }
  0xe4   : > { %4146 = vmatmul.mubr.f32.gmra.mrb[26].mxu1 %v5797_v9  ;;  %v6422_v9 = vld [vmem:[#allocation13_spill] sm:$0xff] }
  0xe5   : > { %4522 = vmatmul.mubr.f32.gmra.mrb[10].mxu0 %v3394_v35  ;;  %4148 = vmatprep.mubr.f32.mxu1 %v5803_v43  ;;  %v6411_v43 = vld [vmem:[#allocation19_spill] sm:$0xff]  ;;  %v3450_v35 = vld [vmem:[%s5307_s28 + $0x112] sm:$0xff] }
  0xe6   : > { %4524 = vmatprep.mubr.f32.mxu0 %v5501_v54  ;;  %4913 = vmatpush3.bf16.msra.mxu0 %v4910_v50  ;;  %v6412_v54 = vld [vmem:[#allocation9_spill] sm:$0xff] }
  0xe7   : > { %4915 = vmatprep.subr.bf16.mxu0 %v4914_v60  ;;  %v3437_v50 = vld [vmem:[%s5307_s28 + $0x7a] sm:$0xff] }
  0xe8   : > { %4149 = vmatmul.mubr.f32.gmra.mrb[28].mxu1 %v5819_v49  ;;  %v6423_v49 = vld [vmem:[#allocation4_spill] sm:$0xff] }
  0xe9   : > { %4525 = vmatmul.mubr.f32.gmra.mrb[12].mxu0 %v5517_v61  ;;  %4151 = vmatprep.mubr.f32.mxu1 %v5825_v53  ;;  %v6413_v61 = vld [vmem:[#allocation2_spill] sm:$0xff]  ;;  %v6416_v53 = vld [vmem:[#allocation21_spill] sm:$0xff] }
  0xea   : > { %4527 = vmatprep.mubr.f32.mxu0 %v5537_v4  ;;  %4917 = vmatpush3.bf16.msra.mxu0 %v4914_v60  ;;  %v6414_v4 = vld [vmem:[#allocation20_spill] sm:$0xff]  ;;  %v3451_v60 = vld [vmem:[%s5307_s28 + $0x122] sm:$0xff] }
  0xeb   : > { %4919 = vmatprep.subr.bf16.mxu0 %v4918_v33 }
  0xec   : > { %4152 = vmatmul.mubr.f32.gmra.mrb[30].mxu1 %v5841_v37  ;;  %v6424_v37 = vld [vmem:[#allocation24_spill] sm:$0xff] }
  0xed   : > { %4528 = vmatmul.mubr.f32.gmra.mrb[14].mxu0 %v5553_v10  ;;  %4186 = vmatprep.mubr.f32.mxu1 %v5711_v24  ;;  %v6415_v10 = vld [vmem:[#allocation10_spill] sm:$0xff]  ;;  %v6418_v24 = vld [vmem:[#allocation3_spill] sm:$0xff] }
  0xee   : > { %4530 = vmatprep.mubr.f32.mxu0 %v5560_v13  ;;  %4921 = vmatpush3.bf16.msra.mxu0 %v4918_v33  ;;  %v6417_v13 = vld [vmem:[#allocation11_spill] sm:$0xff] }
  0xef   : > { %v3261_v33 = vld [vmem:[%s5307_s28 + $0x121] sm:$0xff] }
  0xf0   : > { %4187 = vmatmul.mubr.f32.vlgmr.msra.gmra.mrb[0].mxu1 %v5726_v34  ;;  %v6421_v34 = vld [vmem:[#allocation23_spill] sm:$0xff] }
  0xf1   : > { %4531 = vmatmul.mubr.f32.gmra.mrb[16].mxu0 %v5575_v19  ;;  %4930 = vmatpush3.bf16.msra.mxu1 %v5262_v7  ;;  %v6419_v19 = vld [vmem:[#allocation22_spill] sm:$0xff]  ;;  %v6420_v7 = vld [vmem:[#allocation12_spill] sm:$0xff] }
  0xf2   : > { %4189 = vmatprep.mubr.f32.mxu1 %v6411_v43  ;;  %4533 = vmatprep.mubr.f32.mxu0 %v6412_v54  ;;  %v3453_v43 = vld [vmem:[%s5307_s28 + $0x13a] sm:$0xff]  ;;  %v3262_v54 = vld [vmem:[%s5307_s28 + $0x129] sm:$0xff] }
  0xf3   : > { %4923 = vmatprep.subr.bf16.mxu1 %v6413_v61 }
  0xf4   : > { %4190 = vmatmul.mubr.f32.gmra.mrb[2].mxu1 %v6414_v4  ;;  %v3263_v4 = vld [vmem:[%s5307_s28 + $0x139] sm:$0xff] }
  0xf5   : > { %4534 = vmatmul.mubr.f32.gmra.mrb[18].mxu0 %v6415_v10  ;;  %4192 = vmatprep.mubr.f32.mxu1 %v6416_v53  ;;  %v3455_v10 = vld [vmem:[%s5307_s28 + $0x152] sm:$0xff]  ;;  %v3264_v53 = vld [vmem:[%s5307_s28 + $0x141] sm:$0xff] }
  0xf6   : > { %4536 = vmatprep.mubr.f32.mxu0 %v6417_v13  ;;  %4931 = vmatpush3.bf16.msra.mxu1 %v6413_v61  ;;  %v3454_v61 = vld [vmem:[%s5307_s28 + $0x142] sm:$0xff]  ;;  %v3456_v13 = vld [vmem:[%s5307_s28 + $0x15a] sm:$0xff] }
  0xf7   : > { %4924 = vmatprep.subr.bf16.mxu1 %v6418_v24 }
  0xf8   : > { %4193 = vmatmul.mubr.f32.gmra.mrb[4].mxu1 %v6419_v19  ;;  %v3457_v19 = vld [vmem:[%s5307_s28 + $0x16a] sm:$0xff] }
  0xf9   : > { %4537 = vmatmul.mubr.f32.gmra.mrb[20].mxu0 %v6420_v7  ;;  %4195 = vmatprep.mubr.f32.mxu1 %v6421_v34  ;;  %v3266_v7 = vld [vmem:[%s5307_s28 + $0x159] sm:$0xff] }
  0xfa   : > { %4539 = vmatprep.mubr.f32.mxu0 %v6422_v9  ;;  %4932 = vmatpush3.bf16.msra.mxu1 %v6418_v24  ;;  %v3265_v24 = vld [vmem:[%s5307_s28 + $0x151] sm:$0xff]  ;;  %v3267_v9 = vld [vmem:[%s5307_s28 + $0x169] sm:$0xff] }
  0xfb   : > { %4925 = vmatprep.subr.bf16.mxu1 %v6423_v49  ;;  %v3458_v34 = vld [vmem:[%s5307_s28 + $0x172] sm:$0xff] }
  0xfc   : > { %4196 = vmatmul.mubr.f32.gmra.mrb[6].mxu1 %v6424_v37  ;;  %v3268_v37 = vld [vmem:[%s5307_s28 + $0x171] sm:$0xff] }
  0xfd   : > { %4540 = vmatmul.mubr.f32.gmra.mrb[22].mxu0 %v6425_v38  ;;  %4198 = vmatprep.mubr.f32.mxu1 %v6426_v23  ;;  %v3460_v38 = vld [vmem:[%s5307_s28 + $0x18a] sm:$0xff]  ;;  %v3461_v23 = vld [vmem:[%s5307_s28 + $0x19a] sm:$0xff] }
  0xfe   : > { %4542 = vmatprep.mubr.f32.mxu0 %v6427_v40  ;;  %4933 = vmatpush3.bf16.msra.mxu1 %v6423_v49  ;;  %v3459_v49 = vld [vmem:[%s5307_s28 + $0x182] sm:$0xff] }
  0xff   : > { %4926 = vmatprep.subr.bf16.mxu1 %v6428_v42  ;;  %v3462_v40 = vld [vmem:[%s5307_s28 + $0x1a2] sm:$0xff] }
 0x100   : > { %4199 = vmatmul.mubr.f32.gmra.mrb[8].mxu1 %v6429_v46 }
 0x101   : > { %4543 = vmatmul.mubr.f32.gmra.mrb[24].mxu0 %v6430_v48  ;;  %4201 = vmatprep.mubr.f32.mxu1 %v6431_v52 }
 0x102   : > { %4545 = vmatprep.mubr.f32.mxu0 %v6432_v62  ;;  %4934 = vmatpush3.bf16.msra.mxu1 %v6428_v42 }
 0x103   : > { %4927 = vmatprep.subr.bf16.mxu1 %v6433_v3 }
 0x104   : > { %4202 = vmatmul.mubr.f32.gmra.mrb[10].mxu1 %v6434_v57 }
 0x105   : > { %4546 = vmatmul.mubr.f32.gmra.mrb[26].mxu0 %v6435_v29  ;;  %4204 = vmatprep.mubr.f32.mxu1 %v6436_v0 }
 0x106   : > { %4548 = vmatprep.mubr.f32.mxu0 %v6185_v55  ;;  %4935 = vmatpush3.bf16.msra.mxu1 %v6433_v3 }
 0x107   : > { %4928 = vmatprep.subr.bf16.mxu1 %v6437_v6 }
 0x108   : > { %4205 = vmatmul.mubr.f32.gmra.mrb[12].mxu1 %v6438_v16 }
 0x109   : > { %4549 = vmatmul.mubr.f32.gmra.mrb[28].mxu0 %v6193_v5  ;;  %4207 = vmatprep.mubr.f32.mxu1 %v6439_v2 }
 0x10a   : > { %4551 = vmatprep.mubr.f32.mxu0 %v3413_v11  ;;  %4936 = vmatpush3.bf16.msra.mxu1 %v6437_v6 }
 0x10b   : > { %4929 = vmatprep.subr.bf16.mxu1 %v6440_v25 }
 0x10c   : > { %4208 = vmatmul.mubr.f32.gmra.mrb[14].mxu1 %v6441_v20 }
 0x10d   : > { %4552 = vmatmul.mubr.f32.gmra.mrb[30].mxu0 %v3414_v18  ;;  %4210 = vmatprep.mubr.f32.mxu1 %v5878_v17  ;;  %v3436_v17 = vld [vmem:[%s5307_s28 + $0x6a] sm:$0xff] }
 0x10e   : > { %4586 = vmatprep.mubr.f32.mxu0 %v3431_v14  ;;  %4937 = vmatpush3.bf16.msra.mxu1 %v6440_v25 }
 0x110   : > { %4211 = vmatmul.mubr.f32.gmra.mrb[16].mxu1 %v5891_v39  ;;  %v3438_v39 = vld [vmem:[%s5307_s28 + $0x82] sm:$0xff] }
 0x111   : > { %4587 = vmatmul.mubr.f32.vlgmr.msra.gmra.mrb[0].mxu0 %v3432_v41  ;;  %4213 = vmatprep.mubr.f32.mxu1 %v5896_v12  ;;  %v3439_v12 = vld [vmem:[%s5307_s28 + $0x92] sm:$0xff] }
 0x112   : > { %4589 = vmatprep.mubr.f32.mxu0 %v3433_v45 }
 0x114   : > { %4214 = vmatmul.mubr.f32.gmra.mrb[18].mxu1 %v5908_v8  ;;  %v3440_v8 = vld [vmem:[%s5307_s28 + $0x9a] sm:$0xff] }
 0x115   : > { %4590 = vmatmul.mubr.f32.gmra.mrb[2].mxu0 %v3434_v44  ;;  %4216 = vmatprep.mubr.f32.mxu1 %v5912_v36  ;;  %v3441_v36 = vld [vmem:[%s5307_s28 + $0xaa] sm:$0xff] }
 0x116   : > { %4592 = vmatprep.mubr.f32.mxu0 %v3435_v28 }
 0x118   : > { %4217 = vmatmul.mubr.f32.gmra.mrb[20].mxu1 %v5924_v31  ;;  %v3442_v31 = vld [vmem:[%s5307_s28 + $0xb2] sm:$0xff] }
 0x119   : > { %4593 = vmatmul.mubr.f32.gmra.mrb[4].mxu0 %v3436_v17  ;;  %4219 = vmatprep.mubr.f32.mxu1 %v5928_v21  ;;  %v3443_v21 = vld [vmem:[%s5307_s28 + $0xc2] sm:$0xff] }
 0x11a   : > { %4595 = vmatprep.mubr.f32.mxu0 %v3437_v50 }
 0x11c   : > { %4220 = vmatmul.mubr.f32.gmra.mrb[22].mxu1 %v5940_v15  ;;  %v3444_v15 = vld [vmem:[%s5307_s28 + $0xca] sm:$0xff] }
 0x11d   : > { %4596 = vmatmul.mubr.f32.gmra.mrb[6].mxu0 %v3438_v39  ;;  %4222 = vmatprep.mubr.f32.mxu1 %v5944_v59  ;;  %v3446_v59 = vld [vmem:[%s5307_s28 + $0xe2] sm:$0xff] }
 0x11e   : > { %4598 = vmatprep.mubr.f32.mxu0 %v3439_v12 }
 0x120   : > { %4223 = vmatmul.mubr.f32.gmra.mrb[24].mxu1 %v5956_v51  ;;  %v3445_v51 = vld [vmem:[%s5307_s28 + $0xda] sm:$0xff] }
 0x121   : > { %4599 = vmatmul.mubr.f32.gmra.mrb[8].mxu0 %v3440_v8  ;;  %4225 = vmatprep.mubr.f32.mxu1 %v5960_v32  ;;  %v3447_v32 = vld [vmem:[%s5307_s28 + $0xf2] sm:$0xff] }
 0x122   : > { %4601 = vmatprep.mubr.f32.mxu0 %v3441_v36 }
 0x124   : > { %4226 = vmatmul.mubr.f32.gmra.mrb[26].mxu1 %v5972_v56  ;;  %v3255_v56 = vld [vmem:[%s5307_s28 + $0xd9] sm:$0xff] }
 0x125   : > { %4602 = vmatmul.mubr.f32.gmra.mrb[10].mxu0 %v3442_v31  ;;  %4228 = vmatprep.mubr.f32.mxu1 %v5976_v1  ;;  %v3256_v1 = vld [vmem:[%s5307_s28 + $0xe1] sm:$0xff] }
 0x126   : > { %4604 = vmatprep.mubr.f32.mxu0 %v3443_v21 }
 0x128   : > { %4229 = vmatmul.mubr.f32.gmra.mrb[28].mxu1 %v5988_v47  ;;  %v3257_v47 = vld [vmem:[%s5307_s28 + $0xf1] sm:$0xff] }
 0x129   : > { %4605 = vmatmul.mubr.f32.gmra.mrb[12].mxu0 %v3444_v15  ;;  %4231 = vmatprep.mubr.f32.mxu1 %v6056_v22  ;;  %v3449_v22 = vld [vmem:[%s5307_s28 + $0x10a] sm:$0xff] }
 0x12a   : > { %4607 = vmatprep.mubr.f32.mxu0 %v3445_v51 }
 0x12c   : > { %4232 = vmatmul.mubr.f32.gmra.mrb[30].mxu1 %v6069_v30  ;;  %v3259_v30 = vld [vmem:[%s5307_s28 + $0x109] sm:$0xff]  ;;  %s3481_s28 = sshll.u32 %s6443_s16, 8 }
 0x12d   : > { %4608 = vmatmul.mubr.f32.gmra.mrb[14].mxu0 %v3446_v59  ;;  %4290 = vmatprep.mubr.f32.mxu1 %v3255_v56  ;;  %s6286_s8 = scalar_lea.vmem %s6339_s2, %s3481_s28 }
 0x12e   : > { %4610 = vmatprep.mubr.f32.mxu0 %v3447_v32 }
 0x130   : > { %4291 = vmatmul.mubr.f32.vlgmr.msra.gmra.mrb[16].mxu1 %v3256_v1 }
 0x131   : > { %4611 = vmatmul.mubr.f32.gmra.mrb[16].mxu0 %v3448_v58  ;;  %4293 = vmatprep.mubr.f32.mxu1 %v3257_v47 }
 0x132   : > { %4613 = vmatprep.mubr.f32.mxu0 %v3449_v22 }
 0x134   : > { %4294 = vmatmul.mubr.f32.gmra.mrb[18].mxu1 %v3258_v63 }
 0x135   : > { %4614 = vmatmul.mubr.f32.gmra.mrb[18].mxu0 %v3450_v35  ;;  %4296 = vmatprep.mubr.f32.mxu1 %v3259_v30 }
 0x136   : > { %4616 = vmatprep.mubr.f32.mxu0 %v3451_v60 }
 0x138   : > { %4297 = vmatmul.mubr.f32.gmra.mrb[20].mxu1 %v3260_v26 }
 0x139   : > { %4617 = vmatmul.mubr.f32.gmra.mrb[20].mxu0 %v3452_v27  ;;  %4299 = vmatprep.mubr.f32.mxu1 %v3261_v33 }
 0x13a   : > { %4619 = vmatprep.mubr.f32.mxu0 %v3453_v43 }
 0x13c   : > { %4300 = vmatmul.mubr.f32.gmra.mrb[22].mxu1 %v3262_v54 }
 0x13d   : > { %4620 = vmatmul.mubr.f32.gmra.mrb[22].mxu0 %v3454_v61  ;;  %4302 = vmatprep.mubr.f32.mxu1 %v3263_v4 }
 0x13e   : > { %4622 = vmatprep.mubr.f32.mxu0 %v3455_v10 }
 0x140   : > { %4303 = vmatmul.mubr.f32.gmra.mrb[24].mxu1 %v3264_v53 }
 0x141   : > { %4623 = vmatmul.mubr.f32.gmra.mrb[24].mxu0 %v3456_v13  ;;  %4305 = vmatprep.mubr.f32.mxu1 %v3265_v24 }
 0x142   : > { %4625 = vmatprep.mubr.f32.mxu0 %v3457_v19 }
 0x144   : > { %4306 = vmatmul.mubr.f32.gmra.mrb[26].mxu1 %v3266_v7 }
 0x145   : > { %4626 = vmatmul.mubr.f32.gmra.mrb[26].mxu0 %v3458_v34  ;;  %4308 = vmatprep.mubr.f32.mxu1 %v3267_v9 }
 0x146   : > { %4628 = vmatprep.mubr.f32.mxu0 %v3459_v49 }
 0x148   : > { %4309 = vmatmul.mubr.f32.gmra.mrb[28].mxu1 %v3268_v37 }
 0x149   : > { %4629 = vmatmul.mubr.f32.gmra.mrb[28].mxu0 %v3460_v38  ;;  %4311 = vmatprep.mubr.f32.mxu1 %v6185_v55 }
 0x14a   : > { %4631 = vmatprep.mubr.f32.mxu0 %v3461_v23 }
 0x14c   : > { %4312 = vmatmul.mubr.f32.gmra.mrb[30].mxu1 %v6193_v5 }
 0x14d   : > { %4632 = vmatmul.mubr.f32.gmra.mrb[30].mxu0 %v3462_v40 }
 0x1c3   : > { %v4188_v42 = vpop.f32.mrb[0].mxu1 }
 0x1c4   : > { %v1184_v46 = vpop.f32.mrb[1].mxu1 }
 0x1c7   : > { %v4191_v48 = vpop.f32.mrb[2].mxu1 }
 0x1c8   : > { %v1194_v52 = vpop.f32.mrb[3].mxu1 }
 0x1cb   : > { %v4194_v62 = vpop.f32.mrb[4].mxu1 }
 0x1cc   : > { %v1204_v3 = vpop.f32.mrb[5].mxu1 }
 0x1cf   : > { %v4197_v57 = vpop.f32.mrb[6].mxu1 }
 0x1d0   : > { %v1214_v29 = vpop.f32.mrb[7].mxu1 }
 0x1d3   : > { %v4200_v0 = vpop.f32.mrb[8].mxu1 }
 0x1d4   : > { %v1224_v11 = vpop.f32.mrb[9].mxu1 }
 0x1d7   : > { %v6270_v6 = vpop.f32.mrb[10].mxu1 }
 0x1d8   : > { %v6272_v16 = vpop.f32.mrb[11].mxu1 }
 0x1db   : > { %v6274_v55 = vpop.f32.mrb[12].mxu1 }
 0x1dc   : > { %v6276_v2 = vpop.f32.mrb[13].mxu1 }
 0x1df   : > { %v6278_v5 = vpop.f32.mrb[14].mxu1 }
 0x1e0   : > { %v6280_v18 = vpop.f32.mrb[15].mxu1 }
 0x1e4   : > { %v4588_v14 = vpop.f32.mrb[0].mxu0 }
 0x1e5   : > { %v4938_v25 = vadd.f32 %v4588_v14, %v4188_v42  ;;  %v2715_v20 = vpop.f32.mrb[1].mxu0 }
 0x1e6   : > { %v4939_v41 = vadd.f32 %v2715_v20, %v1184_v46 }
 0x1e7   : > { %2907 = vst [vmem:[%s6286_s8 + $0x8] sm:$0xff] %v4938_v25  ;;  %v2977_v45 = vmul.f32 %v4938_v25, %v4938_v25 }
 0x1e8   : > { %2906 = vst [vmem:[%s6286_s8] sm:$0xff] %v4939_v41  ;;  %v2938_v44 = vadd.f32 %v4939_v41, %v4938_v25  ;;  %v2976_v28 = vmul.f32 %v4939_v41, %v4939_v41  ;;  %v4591_v17 = vpop.f32.mrb[2].mxu0 }
 0x1e9   : > { %v4940_v50 = vadd.f32 %v4591_v17, %v4191_v48  ;;  %v2725_v39 = vpop.f32.mrb[3].mxu0 }
 0x1ea   : > { %v3008_v12 = vadd.f32 %v2977_v45, %v2976_v28  ;;  %v4941_v8 = vadd.f32 %v2725_v39, %v1194_v52 }
 0x1eb   : > { %2909 = vst [vmem:[%s6286_s8 + $0x18] sm:$0xff] %v4940_v50  ;;  %v2979_v59 = vmul.f32 %v4940_v50, %v4940_v50 }
 0x1ec   : > { %2908 = vst [vmem:[%s6286_s8 + $0x10] sm:$0xff] %v4941_v8  ;;  %v2939_v36 = vadd.f32 %v4941_v8, %v2938_v44  ;;  %v2978_v31 = vmul.f32 %v4941_v8, %v4941_v8  ;;  %v4594_v21 = vpop.f32.mrb[4].mxu0 }
 0x1ed   : > { %v4942_v15 = vadd.f32 %v4594_v21, %v4194_v62  ;;  %v2735_v51 = vpop.f32.mrb[5].mxu0 }
 0x1ee   : > { %v3009_v56 = vadd.f32 %v3008_v12, %v2978_v31  ;;  %v4943_v32 = vadd.f32 %v2735_v51, %v1204_v3  ;;  %v2940_v1 = vadd.f32 %v4940_v50, %v2939_v36 }
 0x1ef   : > { %2911 = vst [vmem:[%s6286_s8 + $0x28] sm:$0xff] %v4942_v15  ;;  %v2981_v60 = vmul.f32 %v4942_v15, %v4942_v15 }
 0x1f0   : > { %2910 = vst [vmem:[%s6286_s8 + $0x20] sm:$0xff] %v4943_v32  ;;  %v2941_v58 = vadd.f32 %v4943_v32, %v2940_v1  ;;  %v2980_v47 = vmul.f32 %v4943_v32, %v4943_v32  ;;  %v3010_v22 = vadd.f32 %v3009_v56, %v2979_v59  ;;  %v4597_v63 = vpop.f32.mrb[6].mxu0 }
 0x1f1   : > { %v4944_v35 = vadd.f32 %v4597_v63, %v4197_v57  ;;  %v2745_v30 = vpop.f32.mrb[7].mxu0 }
 0x1f2   : > { %v3011_v26 = vadd.f32 %v3010_v22, %v2980_v47  ;;  %v4945_v27 = vadd.f32 %v2745_v30, %v1214_v29  ;;  %v2942_v33 = vadd.f32 %v4942_v15, %v2941_v58 }
 0x1f3   : > { %2913 = vst [vmem:[%s6286_s8 + $0x38] sm:$0xff] %v4944_v35  ;;  %v2983_v13 = vmul.f32 %v4944_v35, %v4944_v35 }
 0x1f4   : > { %2912 = vst [vmem:[%s6286_s8 + $0x30] sm:$0xff] %v4945_v27  ;;  %v2943_v43 = vadd.f32 %v4945_v27, %v2942_v33  ;;  %v2982_v54 = vmul.f32 %v4945_v27, %v4945_v27  ;;  %v3012_v61 = vadd.f32 %v3011_v26, %v2981_v60  ;;  %v4600_v4 = vpop.f32.mrb[8].mxu0 }
 0x1f5   : > { %v4946_v10 = vadd.f32 %v4600_v4, %v4200_v0  ;;  %v2755_v53 = vpop.f32.mrb[9].mxu0 }
 0x1f6   : > { %v3013_v24 = vadd.f32 %v3012_v61, %v2982_v54  ;;  %v4947_v19 = vadd.f32 %v2755_v53, %v1224_v11  ;;  %v2944_v7 = vadd.f32 %v4944_v35, %v2943_v43 }
 0x1f7   : > { %2915 = vst [vmem:[%s6286_s8 + $0x48] sm:$0xff] %v4946_v10  ;;  %v2985_v40 = vmul.f32 %v4946_v10, %v4946_v10 }
 0x1f8   : > { %2914 = vst [vmem:[%s6286_s8 + $0x40] sm:$0xff] %v4947_v19  ;;  %v2945_v34 = vadd.f32 %v4947_v19, %v2944_v7  ;;  %v2984_v9 = vmul.f32 %v4947_v19, %v4947_v19  ;;  %v3014_v49 = vadd.f32 %v3013_v24, %v2983_v13  ;;  %v4603_v37 = vpop.f32.mrb[10].mxu0 }
 0x1f9   : > { %v4948_v38 = vadd.f32 %v4603_v37, %v6270_v6  ;;  %v2765_v23 = vpop.f32.mrb[11].mxu0 }
 0x1fa   : > { %v3015_v42 = vadd.f32 %v3014_v49, %v2984_v9  ;;  %v4949_v46 = vadd.f32 %v2765_v23, %v6272_v16  ;;  %v2946_v48 = vadd.f32 %v4946_v10, %v2945_v34 }
 0x1fb   : > { %2917 = vst [vmem:[%s6286_s8 + $0x58] sm:$0xff] %v4948_v38  ;;  %v2987_v11 = vmul.f32 %v4948_v38, %v4948_v38 }
 0x1fc   : > { %2916 = vst [vmem:[%s6286_s8 + $0x50] sm:$0xff] %v4949_v46  ;;  %v2947_v52 = vadd.f32 %v4949_v46, %v2946_v48  ;;  %v2986_v62 = vmul.f32 %v4949_v46, %v4949_v46  ;;  %v3016_v3 = vadd.f32 %v3015_v42, %v2985_v40  ;;  %v4606_v57 = vpop.f32.mrb[12].mxu0 }
 0x1fd   : > { %v4950_v29 = vadd.f32 %v4606_v57, %v6274_v55  ;;  %v2775_v0 = vpop.f32.mrb[13].mxu0 }
 0x1fe   : > { %v3017_v6 = vadd.f32 %v3016_v3, %v2986_v62  ;;  %v4951_v14 = vadd.f32 %v2775_v0, %v6276_v2  ;;  %v2948_v25 = vadd.f32 %v4948_v38, %v2947_v52 }
 0x1ff   : > { %2919 = vst [vmem:[%s6286_s8 + $0x68] sm:$0xff] %v4950_v29  ;;  %v2989_v17 = vmul.f32 %v4950_v29, %v4950_v29 }
 0x200   : > { %2918 = vst [vmem:[%s6286_s8 + $0x60] sm:$0xff] %v4951_v14  ;;  %v2949_v16 = vadd.f32 %v4951_v14, %v2948_v25  ;;  %v2988_v20 = vmul.f32 %v4951_v14, %v4951_v14  ;;  %v3018_v41 = vadd.f32 %v3017_v6, %v2987_v11  ;;  %v4609_v45 = vpop.f32.mrb[14].mxu0 }
 0x201   : > { %v4952_v44 = vadd.f32 %v4609_v45, %v6278_v5  ;;  %v2785_v28 = vpop.f32.mrb[15].mxu0 }
 0x202   : > { %v3019_v50 = vadd.f32 %v3018_v41, %v2988_v20  ;;  %v4953_v55 = vadd.f32 %v2785_v28, %v6280_v18  ;;  %v2950_v39 = vadd.f32 %v4950_v29, %v2949_v16 }
 0x203   : > { %2921 = vst [vmem:[%s6286_s8 + $0x78] sm:$0xff] %v4952_v44  ;;  %v4292_v2 = vpop.f32.mrb[16].mxu1  ;;  %v2991_v59 = vmul.f32 %v4952_v44, %v4952_v44 }
 0x204   : > { %2920 = vst [vmem:[%s6286_s8 + $0x70] sm:$0xff] %v4953_v55  ;;  %v2951_v12 = vadd.f32 %v4953_v55, %v2950_v39  ;;  %v2990_v8 = vmul.f32 %v4953_v55, %v4953_v55  ;;  %v3020_v36 = vadd.f32 %v3019_v50, %v2989_v17  ;;  %v4612_v31 = vpop.f32.mrb[16].mxu0  ;;  %v1570_v21 = vpop.f32.mrb[17].mxu1 }
 0x205   : > { %v4954_v15 = vadd.f32 %v4612_v31, %v4292_v2  ;;  %v2795_v51 = vpop.f32.mrb[17].mxu0 }
 0x206   : > { %v3021_v5 = vadd.f32 %v3020_v36, %v2990_v8  ;;  %v4955_v56 = vadd.f32 %v2795_v51, %v1570_v21  ;;  %v2952_v32 = vadd.f32 %v4952_v44, %v2951_v12 }
 0x207   : > { %2923 = vst [vmem:[%s6286_s8 + $0x88] sm:$0xff] %v4954_v15  ;;  %v4295_v18 = vpop.f32.mrb[18].mxu1  ;;  %v2993_v60 = vmul.f32 %v4954_v15, %v4954_v15 }
 0x208   : > { %2922 = vst [vmem:[%s6286_s8 + $0x80] sm:$0xff] %v4955_v56  ;;  %v2953_v1 = vadd.f32 %v4955_v56, %v2952_v32  ;;  %v2992_v58 = vmul.f32 %v4955_v56, %v4955_v56  ;;  %v3022_v47 = vadd.f32 %v3021_v5, %v2991_v59  ;;  %v4615_v22 = vpop.f32.mrb[18].mxu0  ;;  %v1580_v63 = vpop.f32.mrb[19].mxu1 }
 0x209   : > { %v4956_v35 = vadd.f32 %v4615_v22, %v4295_v18  ;;  %v2805_v30 = vpop.f32.mrb[19].mxu0 }
 0x20a   : > { %v3023_v26 = vadd.f32 %v3022_v47, %v2992_v58  ;;  %v4957_v27 = vadd.f32 %v2805_v30, %v1580_v63  ;;  %v2954_v33 = vadd.f32 %v4954_v15, %v2953_v1 }
 0x20b   : > { %2925 = vst [vmem:[%s6286_s8 + $0x98] sm:$0xff] %v4956_v35  ;;  %v4298_v43 = vpop.f32.mrb[20].mxu1  ;;  %v2995_v19 = vmul.f32 %v4956_v35, %v4956_v35 }
 0x20c   : > { %2924 = vst [vmem:[%s6286_s8 + $0x90] sm:$0xff] %v4957_v27  ;;  %v2955_v54 = vadd.f32 %v4957_v27, %v2954_v33  ;;  %v2994_v61 = vmul.f32 %v4957_v27, %v4957_v27  ;;  %v3024_v4 = vadd.f32 %v3023_v26, %v2993_v60  ;;  %v4618_v10 = vpop.f32.mrb[20].mxu0  ;;  %v1590_v53 = vpop.f32.mrb[21].mxu1 }
 0x20d   : > { %v4958_v13 = vadd.f32 %v4618_v10, %v4298_v43  ;;  %v2815_v24 = vpop.f32.mrb[21].mxu0 }
 0x20e   : > { %v3025_v7 = vadd.f32 %v3024_v4, %v2994_v61  ;;  %v4959_v34 = vadd.f32 %v2815_v24, %v1590_v53  ;;  %v2956_v9 = vadd.f32 %v4956_v35, %v2955_v54 }
 0x20f   : > { %2927 = vst [vmem:[%s6286_s8 + $0xa8] sm:$0xff] %v4958_v13  ;;  %v4301_v49 = vpop.f32.mrb[22].mxu1  ;;  %v2997_v52 = vmul.f32 %v4958_v13, %v4958_v13 }
 0x210   : > { %2926 = vst [vmem:[%s6286_s8 + $0xa0] sm:$0xff] %v4959_v34  ;;  %v2957_v37 = vadd.f32 %v4959_v34, %v2956_v9  ;;  %v2996_v38 = vmul.f32 %v4959_v34, %v4959_v34  ;;  %v3026_v23 = vadd.f32 %v3025_v7, %v2995_v19  ;;  %v4621_v40 = vpop.f32.mrb[22].mxu0  ;;  %v1600_v42 = vpop.f32.mrb[23].mxu1 }
 0x211   : > { %v4960_v46 = vadd.f32 %v4621_v40, %v4301_v49  ;;  %v2825_v48 = vpop.f32.mrb[23].mxu0 }
 0x212   : > { %v3027_v62 = vadd.f32 %v3026_v23, %v2996_v38  ;;  %v4961_v3 = vadd.f32 %v2825_v48, %v1600_v42  ;;  %v2958_v57 = vadd.f32 %v4958_v13, %v2957_v37 }
 0x213   : > { %2929 = vst [vmem:[%s6286_s8 + $0xb8] sm:$0xff] %v4960_v46  ;;  %v4304_v29 = vpop.f32.mrb[24].mxu1  ;;  %v2999_v41 = vmul.f32 %v4960_v46, %v4960_v46 }
 0x214   : > { %2928 = vst [vmem:[%s6286_s8 + $0xb0] sm:$0xff] %v4961_v3  ;;  %v2959_v0 = vadd.f32 %v4961_v3, %v2958_v57  ;;  %v2998_v11 = vmul.f32 %v4961_v3, %v4961_v3  ;;  %v3028_v6 = vadd.f32 %v3027_v62, %v2997_v52  ;;  %v4624_v14 = vpop.f32.mrb[24].mxu0  ;;  %v1610_v25 = vpop.f32.mrb[25].mxu1 }
 0x215   : > { %v4962_v16 = vadd.f32 %v4624_v14, %v4304_v29  ;;  %v2835_v20 = vpop.f32.mrb[25].mxu0 }
 0x216   : > { %v3029_v45 = vadd.f32 %v3028_v6, %v2998_v11  ;;  %v4963_v44 = vadd.f32 %v2835_v20, %v1610_v25  ;;  %v2960_v28 = vadd.f32 %v4960_v46, %v2959_v0 }
 0x217   : > { %2931 = vst [vmem:[%s6286_s8 + $0xc8] sm:$0xff] %v4962_v16  ;;  %v4307_v17 = vpop.f32.mrb[26].mxu1  ;;  %v3001_v31 = vmul.f32 %v4962_v16, %v4962_v16 }
 0x218   : > { %2930 = vst [vmem:[%s6286_s8 + $0xc0] sm:$0xff] %v4963_v44  ;;  %v2961_v50 = vadd.f32 %v4963_v44, %v2960_v28  ;;  %v3000_v55 = vmul.f32 %v4963_v44, %v4963_v44  ;;  %v3030_v39 = vadd.f32 %v3029_v45, %v2999_v41  ;;  %v4627_v2 = vpop.f32.mrb[26].mxu0  ;;  %v1620_v12 = vpop.f32.mrb[27].mxu1 }
 0x219   : > { %v4964_v8 = vadd.f32 %v4627_v2, %v4307_v17  ;;  %v2845_v36 = vpop.f32.mrb[27].mxu0 }
 0x21a   : > { %v3031_v21 = vadd.f32 %v3030_v39, %v3000_v55  ;;  %v4965_v15 = vadd.f32 %v2845_v36, %v1620_v12  ;;  %v2962_v51 = vadd.f32 %v4962_v16, %v2961_v50 }
 0x21b   : > { %2933 = vst [vmem:[%s6286_s8 + $0xd8] sm:$0xff] %v4964_v8  ;;  %v4310_v59 = vpop.f32.mrb[28].mxu1  ;;  %v3003_v22 = vmul.f32 %v4964_v8, %v4964_v8 }
 0x21c   : > { %2932 = vst [vmem:[%s6286_s8 + $0xd0] sm:$0xff] %v4965_v15  ;;  %v2963_v5 = vadd.f32 %v4965_v15, %v2962_v51  ;;  %v3002_v56 = vmul.f32 %v4965_v15, %v4965_v15  ;;  %v3032_v32 = vadd.f32 %v3031_v21, %v3001_v31  ;;  %v4630_v18 = vpop.f32.mrb[28].mxu0  ;;  %v1630_v1 = vpop.f32.mrb[29].mxu1 }
 0x21d   : > { %v4966_v58 = vadd.f32 %v4630_v18, %v4310_v59  ;;  %v2855_v47 = vpop.f32.mrb[29].mxu0 }
 0x21e   : > { %v3033_v63 = vadd.f32 %v3032_v32, %v3002_v56  ;;  %v4967_v35 = vadd.f32 %v2855_v47, %v1630_v1  ;;  %v2964_v30 = vadd.f32 %v4964_v8, %v2963_v5 }
 0x21f   : > { %2935 = vst [vmem:[%s6286_s8 + $0xe8] sm:$0xff] %v4966_v58  ;;  %v4313_v60 = vpop.f32.mrb[30].mxu1  ;;  %v3005_v10 = vmul.f32 %v4966_v58, %v4966_v58 }
 0x220   : > { %2934 = vst [vmem:[%s6286_s8 + $0xe0] sm:$0xff] %v4967_v35  ;;  %v2965_v26 = vadd.f32 %v4967_v35, %v2964_v30  ;;  %v3004_v27 = vmul.f32 %v4967_v35, %v4967_v35  ;;  %v3034_v33 = vadd.f32 %v3033_v63, %v3003_v22  ;;  %v4633_v43 = vpop.f32.mrb[30].mxu0  ;;  %v1640_v54 = vpop.f32.mrb[31].mxu1 }
 0x221   : > { %v4968_v61 = vadd.f32 %v4633_v43, %v4313_v60  ;;  %v2865_v4 = vpop.f32.mrb[31].mxu0 }
 0x222   : > { %v3035_v53 = vadd.f32 %v3034_v33, %v3004_v27  ;;  %v4969_v13 = vadd.f32 %v2865_v4, %v1640_v54  ;;  %v2966_v24 = vadd.f32 %v4966_v58, %v2965_v26 }
 0x223   : > { %2937 = vst [vmem:[%s6286_s8 + $0xf8] sm:$0xff] %v4968_v61  ;;  %v3007_v9 = vmul.f32 %v4968_v61, %v4968_v61 }
 0x224   : > { %2936 = vst [vmem:[%s6286_s8 + $0xf0] sm:$0xff] %v4969_v13  ;;  %v2967_v19 = vadd.f32 %v4969_v13, %v2966_v24  ;;  %v3006_v7 = vmul.f32 %v4969_v13, %v4969_v13  ;;  %v3036_v34 = vadd.f32 %v3035_v53, %v3005_v10 }
 0x226   : > { %v2968_v49 = vadd.f32 %v4968_v61, %v2967_v19  ;;  %v3037_v37 = vadd.f32 %v3036_v34, %v3006_v7 }
 0x228   : > { %v2969_v38 = vrot.slane %v2968_v49, 4  ;;  %v3038_v23 = vadd.f32 %v3037_v37, %v3007_v9 }
 0x22a   : > { %v2970_v40 = vadd.f32 %v2969_v38, %v2968_v49  ;;  %v3039_v42 = vrot.slane %v3038_v23, 4 }
 0x22c   : > { %v2971_v46 = vrot.slane %v2970_v40, 2  ;;  %v3040_v48 = vadd.f32 %v3039_v42, %v3038_v23 }
 0x22e   : > { %v2972_v52 = vadd.f32 %v2971_v46, %v2970_v40  ;;  %v3041_v62 = vrot.slane %v3040_v48, 2 }
 0x230   : > { %v2973_v3 = vrot.slane %v2972_v52, 1  ;;  %v3042_v57 = vadd.f32 %v3041_v62, %v3040_v48 }
 0x232   : > { %v2974_v29 = vadd.f32 %v2973_v3, %v2972_v52  ;;  %v3043_v0 = vrot.slane %v3042_v57, 1 }
 0x234   : > { %2975 = vst [vmem:[%s211_s11] sm:$0x1] %v2974_v29  ;;  %v3044_v11 = vadd.f32 %v3043_v0, %v3042_v57 }
 0x236   : > { %3045 = vst [vmem:[%s214_s14] sm:$0x1] %v3044_v11 }
 0x237 PF: > { %s15_s15 = sadd.s32 1, %s5209_s15  }
 0x238   : > { %p12_p4 = scmp.ge.s32.totalorder %s15_s15, 4  }
 0x23a   :  { %14 = sbr.rel (!%p12_p4) target bundleno = 1 (0x1), region = 92 }

// kernel: residual_block.4
= control target key start
LH: loop header
LB: loop body
LE: loop exit
PB: predicated region body
PF: predicated region fallthrough
CT: control target
= control target key end

     0   :  { %s5345_s21 = smov 0   ;;  %s6624_s0 = inlined_call_operand.vmem [shape: f32[2,16,16,128], index: 0, kind: input, shape index: {}]   ;;  %s6625_s1 = inlined_call_operand.vmem [shape: f32[1,128], index: 1, kind: input, shape index: {}]   ;;  %s6626_s2 = inlined_call_operand.vmem [shape: f32[1,128], index: 2, kind: input, shape index: {}]   ;;  %s6627_s3 = inlined_call_operand.vmem [shape: f32[9,128,128], index: 3, kind: input, shape index: {}]   ;;  %s6628_s4 = inlined_call_operand.vmem [shape: f32[2,16,16,128], index: 4, kind: output, shape index: {0}]   ;;  %s6629_s5 = inlined_call_operand.vmem [shape: f32[2,1,128], index: 5, kind: output, shape index: {1}]   ;;  %s6630_s6 = inlined_call_operand.vmem [shape: f32[2,1,128], index: 6, kind: output, shape index: {2}]  }
   0x1 LB: > { %s3433_s22 = sadd.s32 4294967295, %s5307_s21   ;;  %p3437_p0 = scmp.ge.s32.totalorder %s5307_s21, 1  ;;  %s5307_s21 = sphi %s5345_s21, %s17_s21  }
   0x2   : > { %p217_p1 = scmp.lt.s32.totalorder %s5307_s21, 3 }
   0x4   : > { %p218_p2 = pnand %p3437_p0, %p217_p1 }
   0x6   : > { %221 = sbr.rel (%p218_p2) target bundleno = 568 (0x238), region = 36 }
   0xd   : > { %v3444_v0 = vld [vmem:[%s6627_s3 + $0x80] sm:$0xff]  ;;  %v3445_v1 = vld [vmem:[%s6627_s3 + $0x88] sm:$0xff]  ;;  %p5364_p3 = scmp.lt.s32.totalorder %s3433_s22, 1  ;;  %v3446_v5 = vld [vmem:[%s6627_s3 + $0x90] sm:$0xff]  ;;  %v5309_v7 = vmov 0.0  }
   0xe   : > { %v3492_v2 = vld [vmem:[%s6627_s3 + $0x200] sm:$0xff]  ;;  %v5368_v3 = vpack.c.bf16 %v3445_v1, %v3444_v0  ;;  %v3493_v4 = vld [vmem:[%s6627_s3 + $0x208] sm:$0xff]  ;;  %v3447_v6 = vld [vmem:[%s6627_s3 + $0x98] sm:$0xff]  ;;  %411 = vst [vmem:[#allocation2] sm:$0xff] %v5309_v7 }
   0xf   : > { %412 = vst [vmem:[#allocation2 + $0x8] sm:$0xff] %v5309_v7  ;;  %413 = vst [vmem:[#allocation2 + $0x10] sm:$0x3] %v5309_v7  ;;  %v5433_v8 = vpack.c.bf16 %v3493_v4, %v3492_v2  ;;  %v4732_v9 = vpack.c.bf16 %v3447_v6, %v3446_v5  ;;  %v3494_v10 = vld [vmem:[%s6627_s3 + $0x210] sm:$0xff]  ;;  %v3495_v11 = vld [vmem:[%s6627_s3 + $0x218] sm:$0xff]  ;;  %s6690_s22 = smov (!%p5364_p3, %s3433_s22), 1 }
  0x10   : > { %414 = vst [vmem:[#allocation2 + $0x18] sm:$0xff] %v5309_v7  ;;  %415 = vst [vmem:[#allocation2 + $0x20] sm:$0xff] %v5309_v7  ;;  %v3448_v12 = vld [vmem:[%s6627_s3 + $0xa0] sm:$0xff]  ;;  %4729 = vmatprep.subr.bf16.mxu1 %v5368_v3  ;;  %v5451_v13 = vpack.c.bf16 %v3495_v11, %v3494_v10  ;;  %v3449_v14 = vld [vmem:[%s6627_s3 + $0xa8] sm:$0xff]  ;;  %s3574_s26 = sshll.u32 %s6690_s22, 8  ;;  %s265_s9 = scalar_lea.vmem %s6629_s5, %s6690_s22 }
  0x11   : > { %416 = vst [vmem:[#allocation2 + $0x28] sm:$0x3] %v5309_v7  ;;  %417 = vst [vmem:[#allocation2 + $0x30] sm:$0xff] %v5309_v7  ;;  %v3496_v15 = vld [vmem:[%s6627_s3 + $0x220] sm:$0xff]  ;;  %v3497_v16 = vld [vmem:[%s6627_s3 + $0x228] sm:$0xff]  ;;  %4857 = vmatprep.subr.bf16.mxu0 %v5433_v8  ;;  %4731 = vmatpush3.bf16.msra.mxu1 %v5368_v3  ;;  %v4736_v17 = vpack.c.bf16 %v3449_v14, %v3448_v12  ;;  %s5486_s13 = scalar_lea.vmem %s6624_s0, %s3574_s26  ;;  %s6574_s7 = scalar_lea.vmem %s6628_s4, %s3574_s26 }
  0x12   : > { %418 = vst [vmem:[#allocation2 + $0x38] sm:$0xff] %v5309_v7  ;;  %419 = vst [vmem:[#allocation2 + $0x40] sm:$0x3] %v5309_v7  ;;  %4859 = vmatpush3.bf16.msra.mxu0 %v5433_v8  ;;  %4733 = vmatprep.subr.bf16.mxu1 %v4732_v9  ;;  %v5467_v18 = vpack.c.bf16 %v3497_v16, %v3496_v15  ;;  %v3450_v19 = vld [vmem:[%s6627_s3 + $0xb0] sm:$0xff]  ;;  %v3451_v20 = vld [vmem:[%s6627_s3 + $0xb8] sm:$0xff]  ;;  %s268_s12 = scalar_lea.vmem %s6630_s6, %s6690_s22 }
  0x13   : > { %420 = vst [vmem:[#allocation2 + $0x48] sm:$0xff] %v5309_v7  ;;  %421 = vst [vmem:[#allocation2 + $0x50] sm:$0xff] %v5309_v7  ;;  %4861 = vmatprep.subr.bf16.mxu0 %v5451_v13  ;;  %v3498_v21 = vld [vmem:[%s6627_s3 + $0x230] sm:$0xff]  ;;  %v3499_v22 = vld [vmem:[%s6627_s3 + $0x238] sm:$0xff]  ;;  %v4740_v23 = vpack.c.bf16 %v3451_v20, %v3450_v19 }
  0x14   : > { %422 = vst [vmem:[#allocation2 + $0x58] sm:$0x3] %v5309_v7  ;;  %423 = vst [vmem:[#allocation2 + $0x60] sm:$0xff] %v5309_v7  ;;  %v3452_v24 = vld [vmem:[%s6627_s3 + $0xc0] sm:$0xff]  ;;  %v3453_v25 = vld [vmem:[%s6627_s3 + $0xc8] sm:$0xff]  ;;  %v5496_v26 = vpack.c.bf16 %v3499_v22, %v3498_v21 }
  0x15   : > { %424 = vst [vmem:[#allocation2 + $0x68] sm:$0xff] %v5309_v7  ;;  %425 = vst [vmem:[#allocation2 + $0x70] sm:$0x3] %v5309_v7  ;;  %4735 = vmatpush3.bf16.msra.mxu1 %v4732_v9  ;;  %v3500_v27 = vld [vmem:[%s6627_s3 + $0x240] sm:$0xff]  ;;  %v3501_v28 = vld [vmem:[%s6627_s3 + $0x248] sm:$0xff]  ;;  %v4744_v34 = vpack.c.bf16 %v3453_v25, %v3452_v24 }
  0x16   : > { %426 = vst [vmem:[#allocation2 + $0x78] sm:$0xff] %v5309_v7  ;;  %427 = vst [vmem:[#allocation2 + $0x80] sm:$0xff] %v5309_v7  ;;  %4863 = vmatpush3.bf16.msra.mxu0 %v5451_v13  ;;  %4737 = vmatprep.subr.bf16.mxu1 %v4736_v17  ;;  %v546_v29 = vld [vmem:[#allocation2 + $0x1] sm:$0xff]  ;;  %v5508_v31 = vld [vmem:[%s6625_s1] ss:$0 sm:$0xff]  ;;  %v5522_v37 = vpack.c.bf16 %v3501_v28, %v3500_v27 }
  0x17   : > { %428 = vst [vmem:[#allocation2 + $0x88] sm:$0x3] %v5309_v7  ;;  %429 = vst [vmem:[#allocation2 + $0x90] sm:$0xff] %v5309_v7  ;;  %4865 = vmatprep.subr.bf16.mxu0 %v5467_v18  ;;  %4040 = vmatprep.mubr.f32.mxu1 %v546_v29  ;;  %v269_v30 = vld [vmem:[%s5486_s13] sm:$0xff]  ;;  %v3454_v35 = vld [vmem:[%s6627_s3 + $0xd0] sm:$0xff] }
  0x18   : > { %430 = vst [vmem:[#allocation2 + $0x98] sm:$0xff] %v5309_v7  ;;  %431 = vst [vmem:[#allocation2 + $0xa0] sm:$0x3] %v5309_v7  ;;  %v5513_v32 = vld [vmem:[%s6626_s2] ss:$0 sm:$0xff]  ;;  %v308_v33 = vmul.f32 %v5508_v31, %v269_v30  ;;  %v270_v36 = vld [vmem:[%s5486_s13 + $0x8] sm:$0xff] }
  0x19   : > { %432 = vst [vmem:[#allocation2 + $0xa8] sm:$0xff] %v5309_v7  ;;  %433 = vst [vmem:[#allocation2 + $0xb0] sm:$0xff] %v5309_v7  ;;  %4739 = vmatpush3.bf16.msra.mxu1 %v4736_v17  ;;  %v3455_v38 = vld [vmem:[%s6627_s3 + $0xd8] sm:$0xff]  ;;  %v309_v40 = vmul.f32 %v5508_v31, %v270_v36  ;;  %v271_v41 = vld [vmem:[%s5486_s13 + $0x10] sm:$0xff] }
  0x1a   : > { %434 = vst [vmem:[#allocation2 + $0xb8] sm:$0x3] %v5309_v7  ;;  %435 = vst [vmem:[#allocation2 + $0xc0] sm:$0xff] %v5309_v7  ;;  %4867 = vmatpush3.bf16.msra.mxu0 %v5467_v18  ;;  %4741 = vmatprep.subr.bf16.mxu1 %v4740_v23  ;;  %v347_v39 = vadd.f32 %v5513_v32, %v308_v33  ;;  %v272_v42 = vld [vmem:[%s5486_s13 + $0x18] sm:$0xff]  ;;  %v3502_v43 = vld [vmem:[%s6627_s3 + $0x250] sm:$0xff]  ;;  %v310_v45 = vmul.f32 %v5508_v31, %v271_v41 }
  0x1b   : > { %436 = vst [vmem:[#allocation2 + $0xc8] sm:$0xff] %v5309_v7  ;;  %437 = vst [vmem:[#allocation2 + $0xd0] sm:$0x3] %v5309_v7  ;;  %4869 = vmatprep.subr.bf16.mxu0 %v5496_v26  ;;  %v3503_v44 = vld [vmem:[%s6627_s3 + $0x258] sm:$0xff]  ;;  %v311_v46 = vmul.f32 %v5508_v31, %v272_v42  ;;  %v273_v47 = vld [vmem:[%s5486_s13 + $0x20] sm:$0xff]  ;;  %v348_v49 = vadd.f32 %v5513_v32, %v309_v40  ;;  %v4748_v52 = vpack.c.bf16 %v3455_v38, %v3454_v35 }
  0x1c   : > { %438 = vst [vmem:[#allocation2 + $0xd8] sm:$0xff] %v5309_v7  ;;  %439 = vst [vmem:[#allocation2 + $0xe0] sm:$0xff] %v5309_v7  ;;  %v5540_v48 = vmax.f32 %v347_v39, 0.0  ;;  %v312_v50 = vmul.f32 %v5508_v31, %v273_v47  ;;  %v274_v51 = vld [vmem:[%s5486_s13 + $0x28] sm:$0xff]  ;;  %v349_v53 = vadd.f32 %v5513_v32, %v310_v45  ;;  %v275_v55 = vld [vmem:[%s5486_s13 + $0x30] sm:$0xff]  ;;  %v5551_v57 = vpack.c.bf16 %v3503_v44, %v3502_v43 }
  0x1d   : > { %440 = vst [vmem:[#allocation2 + $0xe8] sm:$0x3] %v5309_v7  ;;  %441 = vst [vmem:[#allocation2 + $0xf0] sm:$0xff] %v5309_v7  ;;  %4743 = vmatpush3.bf16.msra.mxu1 %v4740_v23  ;;  %v350_v54 = vadd.f32 %v5513_v32, %v311_v46  ;;  %v276_v56 = vld [vmem:[%s5486_s13 + $0x38] sm:$0xff]  ;;  %v3456_v58 = vld [vmem:[%s6627_s3 + $0xe0] sm:$0xff]  ;;  %v5561_v60 = vmax.f32 %v348_v49, 0.0  ;;  %v313_v62 = vmul.f32 %v5508_v31, %v274_v51 }
  0x1e   : > { %442 = vst [vmem:[#allocation2 + $0xf8] sm:$0xff] %v5309_v7  ;;  %443 = vst [vmem:[#allocation2 + $0x100] sm:$0x3] %v5309_v7  ;;  %4871 = vmatpush3.bf16.msra.mxu0 %v5496_v26  ;;  %4745 = vmatprep.subr.bf16.mxu1 %v4744_v34  ;;  %v3457_v59 = vld [vmem:[%s6627_s3 + $0xe8] sm:$0xff]  ;;  %v351_v61 = vadd.f32 %v5513_v32, %v312_v50  ;;  %v277_v63 = vld [vmem:[%s5486_s13 + $0x40] sm:$0xff]  ;;  %v5572_v2 = vmax.f32 %v349_v53, 0.0  ;;  %v314_v4 = vmul.f32 %v5508_v31, %v275_v55 }
  0x1f   : > { %444 = vst [vmem:[#allocation2 + $0x108] sm:$0xff] %v5309_v7  ;;  %445 = vst [vmem:[#allocation2 + $0x110] sm:$0xff] %v5309_v7  ;;  %4873 = vmatprep.subr.bf16.mxu0 %v5522_v37  ;;  %4360 = vmatprep.mubr.f32.mxu0 %v5540_v48  ;;  %v3504_v0 = vld [vmem:[%s6627_s3 + $0x260] sm:$0xff]  ;;  %v3505_v1 = vld [vmem:[%s6627_s3 + $0x268] sm:$0xff]  ;;  %v5574_v3 = vmax.f32 %v350_v54, 0.0  ;;  %v315_v5 = vmul.f32 %v5508_v31, %v276_v56  ;;  %v352_v10 = vadd.f32 %v5513_v32, %v313_v62 }
  0x20   : > { %446 = vst [vmem:[#allocation2 + $0x118] sm:$0x3] %v5309_v7  ;;  %447 = vst [vmem:[#allocation2 + $0x120] sm:$0xff] %v5309_v7  ;;  %v278_v6 = vld [vmem:[%s5486_s13 + $0x48] sm:$0xff]  ;;  %v5580_v9 = vmax.f32 %v351_v61, 0.0  ;;  %v316_v11 = vmul.f32 %v5508_v31, %v277_v63  ;;  %v279_v12 = vld [vmem:[%s5486_s13 + $0x50] sm:$0xff]  ;;  %v4752_v14 = vpack.c.bf16 %v3457_v59, %v3456_v58  ;;  %v353_v15 = vadd.f32 %v5513_v32, %v314_v4 }
  0x21   : > { %448 = vst [vmem:[#allocation2 + $0x128] sm:$0xff] %v5309_v7  ;;  %449 = vst [vmem:[#allocation2 + $0x130] sm:$0x3] %v5309_v7  ;;  %4747 = vmatpush3.bf16.msra.mxu1 %v4744_v34  ;;  %v354_v16 = vadd.f32 %v5513_v32, %v315_v5  ;;  %v280_v17 = vld [vmem:[%s5486_s13 + $0x58] sm:$0xff]  ;;  %v5592_v19 = vpack.c.bf16 %v3505_v1, %v3504_v0  ;;  %v3458_v20 = vld [vmem:[%s6627_s3 + $0xf0] sm:$0xff]  ;;  %v5601_v22 = vmax.f32 %v352_v10, 0.0 }
  0x22   : > { %450 = vst [vmem:[#allocation2 + $0x138] sm:$0xff] %v5309_v7  ;;  %451 = vst [vmem:[#allocation2 + $0x140] sm:$0xff] %v5309_v7  ;;  %4875 = vmatpush3.bf16.msra.mxu0 %v5522_v37  ;;  %4749 = vmatprep.subr.bf16.mxu1 %v4748_v52  ;;  %v3459_v21 = vld [vmem:[%s6627_s3 + $0xf8] sm:$0xff]  ;;  %v355_v23 = vadd.f32 %v5513_v32, %v316_v11  ;;  %v317_v24 = vmul.f32 %v5508_v31, %v278_v6  ;;  %v281_v25 = vld [vmem:[%s5486_s13 + $0x60] sm:$0xff]  ;;  %v5612_v29 = vmax.f32 %v353_v15, 0.0 }
  0x23   : > { %452 = vst [vmem:[#allocation2 + $0x148] sm:$0x3] %v5309_v7  ;;  %453 = vst [vmem:[#allocation2 + $0x150] sm:$0xff] %v5309_v7  ;;  %4877 = vmatprep.subr.bf16.mxu0 %v5551_v57  ;;  %v3506_v27 = vld [vmem:[%s6627_s3 + $0x270] sm:$0xff]  ;;  %v3507_v28 = vld [vmem:[%s6627_s3 + $0x278] sm:$0xff]  ;;  %v5614_v30 = vmax.f32 %v354_v16, 0.0  ;;  %v318_v33 = vmul.f32 %v5508_v31, %v279_v12  ;;  %v319_v34 = vmul.f32 %v5508_v31, %v280_v17 }
  0x24   : > { %454 = vst [vmem:[#allocation2 + $0x158] sm:$0xff] %v5309_v7  ;;  %455 = vst [vmem:[#allocation2 + $0x160] sm:$0x3] %v5309_v7  ;;  %v282_v35 = vld [vmem:[%s5486_s13 + $0x68] sm:$0xff]  ;;  %v5620_v36 = vmax.f32 %v355_v23, 0.0  ;;  %v356_v38 = vadd.f32 %v5513_v32, %v317_v24  ;;  %v320_v39 = vmul.f32 %v5508_v31, %v281_v25  ;;  %v283_v40 = vld [vmem:[%s5486_s13 + $0x70] sm:$0xff]  ;;  %v4756_v42 = vpack.c.bf16 %v3459_v21, %v3458_v20 }
  0x25   : > { %456 = vst [vmem:[#allocation2 + $0x168] sm:$0xff] %v5309_v7  ;;  %457 = vst [vmem:[#allocation2 + $0x170] sm:$0xff] %v5309_v7  ;;  %4751 = vmatpush3.bf16.msra.mxu1 %v4748_v52  ;;  %v284_v41 = vld [vmem:[%s5486_s13 + $0x78] sm:$0xff]  ;;  %v530_v43 = vld [vmem:[%s6627_s3] sm:$0xff]  ;;  %v357_v45 = vadd.f32 %v5513_v32, %v318_v33  ;;  %v358_v46 = vadd.f32 %v5513_v32, %v319_v34  ;;  %v5638_v47 = vpack.c.bf16 %v3507_v28, %v3506_v27 }
  0x26   : > { %458 = vst [vmem:[#allocation2 + $0x178] sm:$0x3] %v5309_v7  ;;  %459 = vst [vmem:[#allocation2 + $0x180] sm:$0xff] %v5309_v7  ;;  %4879 = vmatpush3.bf16.msra.mxu0 %v5551_v57  ;;  %4753 = vmatprep.subr.bf16.mxu1 %v4752_v14  ;;  %v531_v44 = vld [vmem:[%s6627_s3 + $0x8] sm:$0xff]  ;;  %v3508_v49 = vld [vmem:[%s6627_s3 + $0x280] sm:$0xff]  ;;  %v5647_v51 = vmax.f32 %v356_v38, 0.0  ;;  %v359_v52 = vadd.f32 %v5513_v32, %v320_v39  ;;  %v321_v53 = vmul.f32 %v5508_v31, %v282_v35 }
  0x27   : > { %460 = vst [vmem:[#allocation2 + $0x188] sm:$0xff] %v5309_v7  ;;  %461 = vst [vmem:[#allocation2 + $0x190] sm:$0x3] %v5309_v7  ;;  %4881 = vmatprep.subr.bf16.mxu0 %v5592_v19  ;;  %v3509_v50 = vld [vmem:[%s6627_s3 + $0x288] sm:$0xff]  ;;  %v5651_v54 = vmax.f32 %v357_v45, 0.0  ;;  %v5653_v55 = vmax.f32 %v358_v46, 0.0  ;;  %v322_v56 = vmul.f32 %v5508_v31, %v283_v40  ;;  %v323_v58 = vmul.f32 %v5508_v31, %v284_v41 }
  0x28   : > { %462 = vst [vmem:[#allocation2 + $0x198] sm:$0xff] %v5309_v7  ;;  %463 = vst [vmem:[#allocation2 + $0x1a0] sm:$0xff] %v5309_v7  ;;  %v285_v59 = vld [vmem:[%s5486_s13 + $0x80] sm:$0xff]  ;;  %v286_v61 = vld [vmem:[%s5486_s13 + $0x88] sm:$0xff]  ;;  %v4760_v62 = vpack.c.bf16 %v531_v44, %v530_v43  ;;  %v5666_v1 = vmax.f32 %v359_v52, 0.0  ;;  %v360_v4 = vadd.f32 %v5513_v32, %v321_v53  ;;  %v4888_v6 = vpack.c.bf16 %v3509_v50, %v3508_v49 }
  0x29   : > { %464 = vst [vmem:[#allocation2 + $0x1a8] sm:$0x3] %v5309_v7  ;;  %6655 = vst [vmem:[#allocation3_spill] sm:$0xff] %v5496_v26  ;;  %4755 = vmatpush3.bf16.msra.mxu1 %v4752_v14  ;;  %v3510_v63 = vld [vmem:[%s6627_s3 + $0x290] sm:$0xff]  ;;  %v3511_v0 = vld [vmem:[%s6627_s3 + $0x298] sm:$0xff]  ;;  %v361_v12 = vadd.f32 %v5513_v32, %v322_v56  ;;  %v362_v14 = vadd.f32 %v5513_v32, %v323_v58  ;;  %v324_v17 = vmul.f32 %v5508_v31, %v285_v59 }
  0x2a   : > { %6656 = vst [vmem:[#allocation4_spill] sm:$0xff] %v5522_v37  ;;  %6657 = vst [vmem:[#allocation5_spill] sm:$0xff] %v5551_v57  ;;  %v287_v5 = vld [vmem:[%s5486_s13 + $0x90] sm:$0xff]  ;;  %4883 = vmatpush3.bf16.msra.mxu0 %v5592_v19  ;;  %4757 = vmatprep.subr.bf16.mxu1 %v4756_v42  ;;  %v533_v11 = vld [vmem:[%s6627_s3 + $0x18] sm:$0xff]  ;;  %v5684_v16 = vmax.f32 %v360_v4, 0.0  ;;  %v325_v20 = vmul.f32 %v5508_v31, %v286_v61  ;;  %v5690_v24 = vpack.c.bf16 %v3511_v0, %v3510_v63 }
  0x2b   : > { %466 = vst [vmem:[#allocation2 + $0x19] sm:$0xff] %v5540_v48  ;;  %467 = vst [vmem:[#allocation2 + $0x21] sm:$0xff] %v5561_v60  ;;  %v532_v10 = vld [vmem:[%s6627_s3 + $0x10] sm:$0xff]  ;;  %v288_v15 = vld [vmem:[%s5486_s13 + $0x98] sm:$0xff]  ;;  %4885 = vmatprep.subr.bf16.mxu0 %v5638_v47  ;;  %v326_v21 = vmul.f32 %v5508_v31, %v287_v5  ;;  %v5692_v25 = vmax.f32 %v361_v12, 0.0  ;;  %v5694_v27 = vmax.f32 %v362_v14, 0.0  ;;  %v5702_v38 = vadd.f32 %v5513_v32, %v324_v17 }
  0x2c   : > { %468 = vst [vmem:[#allocation2 + $0x31] sm:$0xff] %v5572_v2  ;;  %469 = vst [vmem:[#allocation2 + $0x39] sm:$0xff] %v5574_v3  ;;  %v289_v23 = vld [vmem:[%s5486_s13 + $0xa0] sm:$0xff]  ;;  %v327_v28 = vmul.f32 %v5508_v31, %v288_v15  ;;  %v290_v33 = vld [vmem:[%s5486_s13 + $0xa8] sm:$0xff]  ;;  %v5698_v35 = vpack.c.bf16 %v533_v11, %v532_v10  ;;  %v5705_v39 = vadd.f32 %v5513_v32, %v325_v20 }
  0x2d   : > { %6658 = vst [vmem:[#allocation6_spill] sm:$0xff] %v5592_v19  ;;  %470 = vst [vmem:[#allocation2 + $0x49] sm:$0xff] %v5580_v9  ;;  %4759 = vmatpush3.bf16.msra.mxu1 %v4756_v42  ;;  %v547_v34 = vld [vmem:[#allocation2 + $0x9] sm:$0xff]  ;;  %v5708_v40 = vadd.f32 %v5513_v32, %v326_v21  ;;  %v3512_v42 = vld [vmem:[%s6627_s3 + $0x2a0] sm:$0xff]  ;;  %v328_v45 = vmul.f32 %v5508_v31, %v289_v23  ;;  %v329_v46 = vmul.f32 %v5508_v31, %v290_v33 }
  0x2e   : > { %471 = vst [vmem:[#allocation2 + $0x51] sm:$0xff] %v5601_v22  ;;  %472 = vst [vmem:[#allocation2 + $0x61] sm:$0xff] %v5612_v29  ;;  %v291_v41 = vld [vmem:[%s5486_s13 + $0xb0] sm:$0xff]  ;;  %4887 = vmatpush3.bf16.msra.mxu0 %v5638_v47  ;;  %4761 = vmatprep.subr.bf16.mxu1 %v4760_v62  ;;  %v3513_v43 = vld [vmem:[%s6627_s3 + $0x2a8] sm:$0xff]  ;;  %v5721_v44 = vadd.f32 %v5513_v32, %v327_v28  ;;  %v395_v50 = vmax.f32 %v5702_v38, 0.0  ;;  %v396_v52 = vmax.f32 %v5705_v39, 0.0 }
  0x2f   : > { %473 = vst [vmem:[#allocation2 + $0x69] sm:$0xff] %v5614_v30  ;;  %6659 = vst [vmem:[#allocation7_spill] sm:$0xff] %v5638_v47  ;;  %v292_v49 = vld [vmem:[%s5486_s13 + $0xb8] sm:$0xff]  ;;  %4889 = vmatprep.subr.bf16.mxu0 %v4888_v6  ;;  %v397_v53 = vmax.f32 %v5708_v40, 0.0  ;;  %v330_v56 = vmul.f32 %v5508_v31, %v291_v41  ;;  %v293_v58 = vld [vmem:[%s5486_s13 + $0xc0] sm:$0xff]  ;;  %v5733_v61 = vadd.f32 %v5513_v32, %v328_v45 }
  0x30   : > { %474 = vst [vmem:[#allocation2 + $0x79] sm:$0xff] %v5620_v36  ;;  %475 = vst [vmem:[#allocation2 + $0x81] sm:$0xff] %v5647_v51  ;;  %4041 = vmatmul.mubr.f32.vlgmr.msra.gmra.mrb[0].mxu1 %v547_v34  ;;  %v398_v59 = vmax.f32 %v5721_v44, 0.0  ;;  %v5736_v63 = vadd.f32 %v5513_v32, %v329_v46  ;;  %v331_v0 = vmul.f32 %v5508_v31, %v292_v49  ;;  %v294_v4 = vld [vmem:[%s5486_s13 + $0xc8] sm:$0xff]  ;;  %v534_v10 = vld [vmem:[%s6627_s3 + $0x20] sm:$0xff] }
  0x31   : > { %476 = vst [vmem:[#allocation2 + $0x91] sm:$0xff] %v5651_v54  ;;  %477 = vst [vmem:[#allocation2 + $0x99] sm:$0xff] %v5653_v55  ;;  %4361 = vmatmul.mubr.f32.vlgmr.msra.gmra.mrb[0].mxu0 %v5561_v60  ;;  %4763 = vmatpush3.bf16.msra.mxu1 %v4760_v62  ;;  %v5741_v5 = vpack.c.bf16 %v3513_v43, %v3512_v42  ;;  %v535_v11 = vld [vmem:[%s6627_s3 + $0x28] sm:$0xff]  ;;  %v5756_v62 = vadd.f32 %v5513_v32, %v330_v56  ;;  %v295_v12 = vld [vmem:[%s5486_s13 + $0xd0] sm:$0xff]  ;;  %v399_v14 = vmax.f32 %v5733_v61, 0.0 }
  0x32   : > { %478 = vst [vmem:[#allocation2 + $0xa9] sm:$0xff] %v5666_v1  ;;  %479 = vst [vmem:[#allocation2 + $0xb1] sm:$0xff] %v5684_v16  ;;  %4891 = vmatpush3.bf16.msra.mxu0 %v4888_v6  ;;  %4043 = vmatprep.mubr.f32.mxu1 %v5540_v48  ;;  %v400_v15 = vmax.f32 %v5736_v63, 0.0  ;;  %v5765_v17 = vadd.f32 %v5513_v32, %v331_v0  ;;  %v332_v20 = vmul.f32 %v5508_v31, %v293_v58  ;;  %v296_v21 = vld [vmem:[%s5486_s13 + $0xd8] sm:$0xff]  ;;  %v297_v33 = vld [vmem:[%s5486_s13 + $0xe0] sm:$0xff] }
  0x33   : > { %480 = vst [vmem:[#allocation2 + $0xc1] sm:$0xff] %v5692_v25  ;;  %481 = vst [vmem:[#allocation2 + $0xc9] sm:$0xff] %v5694_v27  ;;  %4363 = vmatprep.mubr.f32.mxu0 %v5572_v2  ;;  %4893 = vmatprep.subr.bf16.mxu0 %v5690_v24  ;;  %v401_v48 = vmax.f32 %v5756_v62, 0.0  ;;  %v333_v6 = vmul.f32 %v5508_v31, %v294_v4  ;;  %v334_v23 = vmul.f32 %v5508_v31, %v295_v12  ;;  %v3514_v34 = vld [vmem:[%s6627_s3 + $0x2b0] sm:$0xff]  ;;  %v3515_v41 = vld [vmem:[%s6627_s3 + $0x2b8] sm:$0xff] }
  0x34   : > { %482 = vst [vmem:[#allocation2 + $0xd9] sm:$0xff] %v395_v50  ;;  %483 = vst [vmem:[#allocation2 + $0xe1] sm:$0xff] %v396_v52  ;;  %v335_v28 = vmul.f32 %v5508_v31, %v296_v21  ;;  %4044 = vmatmul.mubr.f32.gmra.mrb[2].mxu1 %v5561_v60  ;;  %4765 = vmatprep.subr.bf16.mxu1 %v5698_v35  ;;  %v4768_v42 = vpack.c.bf16 %v535_v11, %v534_v10  ;;  %v402_v43 = vmax.f32 %v5765_v17, 0.0  ;;  %v298_v45 = vld [vmem:[%s5486_s13 + $0xe8] sm:$0xff]  ;;  %v536_v46 = vld [vmem:[%s6627_s3 + $0x30] sm:$0xff] }
  0x35   : > { %484 = vst [vmem:[#allocation2 + $0xf1] sm:$0xff] %v397_v53  ;;  %485 = vst [vmem:[#allocation2 + $0xf9] sm:$0xff] %v398_v59  ;;  %v5790_v60 = vadd.f32 %v5513_v32, %v332_v20  ;;  %4364 = vmatmul.mubr.f32.gmra.mrb[2].mxu0 %v5574_v3  ;;  %4046 = vmatprep.mubr.f32.mxu1 %v5572_v2  ;;  %v537_v49 = vld [vmem:[%s6627_s3 + $0x38] sm:$0xff]  ;;  %v5804_v56 = vadd.f32 %v5513_v32, %v333_v6  ;;  %v3516_v21 = vld [vmem:[%s6627_s3 + $0x2c0] sm:$0xff] }
  0x36   : > { %486 = vst [vmem:[#allocation2 + $0x109] sm:$0xff] %v399_v14  ;;  %487 = vst [vmem:[#allocation2 + $0x111] sm:$0xff] %v400_v15  ;;  %v5807_v58 = vadd.f32 %v5513_v32, %v334_v23  ;;  %v5810_v0 = vadd.f32 %v5513_v32, %v335_v28  ;;  %4895 = vmatpush3.bf16.msra.mxu0 %v5690_v24  ;;  %4366 = vmatprep.mubr.f32.mxu0 %v5580_v9  ;;  %v3517_v6 = vld [vmem:[%s6627_s3 + $0x2c8] sm:$0xff]  ;;  %v3531_v38 = vld [vmem:[%s6627_s3 + $0x338] sm:$0xff] }
  0x37   : > { %488 = vst [vmem:[#allocation2 + $0x121] sm:$0xff] %v401_v48  ;;  %489 = vst [vmem:[#allocation2 + $0x129] sm:$0xff] %v402_v43  ;;  %v403_v2 = vmax.f32 %v5790_v60, 0.0  ;;  %v336_v4 = vmul.f32 %v5508_v31, %v297_v33  ;;  %v337_v10 = vmul.f32 %v5508_v31, %v298_v45  ;;  %4897 = vmatprep.subr.bf16.mxu0 %v5741_v5  ;;  %4767 = vmatpush3.bf16.msra.mxu1 %v5698_v35  ;;  %v539_v33 = vld [vmem:[%s6627_s3 + $0x48] sm:$0xff]  ;;  %v3518_v45 = vld [vmem:[%s6627_s3 + $0x2d0] sm:$0xff] }
  0x38   : > { %v4900_v11 = vpack.c.bf16 %v3515_v41, %v3514_v34  ;;  %v404_v12 = vmax.f32 %v5804_v56, 0.0  ;;  %v405_v24 = vmax.f32 %v5807_v58, 0.0  ;;  %v406_v20 = vmax.f32 %v5810_v0, 0.0  ;;  %4047 = vmatmul.mubr.f32.gmra.mrb[4].mxu1 %v5574_v3  ;;  %4769 = vmatprep.subr.bf16.mxu1 %v4768_v42  ;;  %v538_v3 = vld [vmem:[%s6627_s3 + $0x40] sm:$0xff]  ;;  %v3533_v40 = vld [vmem:[%s6627_s3 + $0x348] sm:$0xff]  ;;  %v3535_v61 = vld [vmem:[%s6627_s3 + $0x358] sm:$0xff] }
  0x39   : > { %v4772_v23 = vpack.c.bf16 %v537_v49, %v536_v46  ;;  %490 = vst [vmem:[#allocation2 + $0x139] sm:$0xff] %v403_v2  ;;  %v5834_v35 = vadd.f32 %v5513_v32, %v336_v4  ;;  %v5837_v28 = vadd.f32 %v5513_v32, %v337_v10  ;;  %4367 = vmatmul.mubr.f32.gmra.mrb[4].mxu0 %v5601_v22  ;;  %v3519_v46 = vld [vmem:[%s6627_s3 + $0x2d8] sm:$0xff]  ;;  %v3521_v4 = vld [vmem:[%s6627_s3 + $0x2e8] sm:$0xff] }
  0x3a   : > { %4049 = vmatprep.mubr.f32.mxu1 %v5580_v9  ;;  %491 = vst [vmem:[#allocation2 + $0x141] sm:$0xff] %v404_v12  ;;  %492 = vst [vmem:[#allocation2 + $0x151] sm:$0xff] %v405_v24  ;;  %4899 = vmatpush3.bf16.msra.mxu0 %v5741_v5  ;;  %v4904_v41 = vpack.c.bf16 %v3517_v6, %v3516_v21  ;;  %v4776_v5 = vpack.c.bf16 %v539_v33, %v538_v3  ;;  %v3522_v6 = vld [vmem:[%s6627_s3 + $0x2f0] sm:$0xff]  ;;  %v300_v33 = vld [vmem:[%s5486_s13 + $0xf8] sm:$0xff] }
  0x3b   : > { %493 = vst [vmem:[#allocation2 + $0x159] sm:$0xff] %v406_v20  ;;  %4369 = vmatprep.mubr.f32.mxu0 %v5612_v29  ;;  %v407_v9 = vmax.f32 %v5834_v35, 0.0  ;;  %v408_v34 = vmax.f32 %v5837_v28, 0.0  ;;  %4901 = vmatprep.subr.bf16.mxu0 %v4900_v11  ;;  %v4908_v49 = vpack.c.bf16 %v3519_v46, %v3518_v45  ;;  %v299_v3 = vld [vmem:[%s5486_s13 + $0xf0] sm:$0xff]  ;;  %v339_v46 = vmul.f32 %v5508_v31, %v300_v33  ;;  %v5989_v39 = vld [vmem:[#allocation2 + $0x62] sm:$0xff]  ;;  %v6005_v44 = vld [vmem:[#allocation2 + $0x7a] sm:$0xff] }
  0x3c   : > { %4771 = vmatpush3.bf16.msra.mxu1 %v4768_v42  ;;  %v541_v42 = vld [vmem:[%s6627_s3 + $0x58] sm:$0xff]  ;;  %v338_v45 = vmul.f32 %v5508_v31, %v299_v3  ;;  %v3525_v31 = vld [vmem:[%s6627_s3 + $0x308] sm:$0xff] }
  0x3d   : > { %4050 = vmatmul.mubr.f32.gmra.mrb[6].mxu1 %v5601_v22  ;;  %4773 = vmatprep.subr.bf16.mxu1 %v4772_v23  ;;  %494 = vst [vmem:[#allocation2 + $0x169] sm:$0xff] %v407_v9  ;;  %495 = vst [vmem:[#allocation2 + $0x171] sm:$0xff] %v408_v34  ;;  %v540_v22 = vld [vmem:[%s6627_s3 + $0x50] sm:$0xff]  ;;  %v5971_v3 = vld [vmem:[#allocation2 + $0x3a] sm:$0xff] }
  0x3e   : > { %4370 = vmatmul.mubr.f32.gmra.mrb[6].mxu0 %v5614_v30  ;;  %4052 = vmatprep.mubr.f32.mxu1 %v5612_v29  ;;  %v3520_v29 = vld [vmem:[%s6627_s3 + $0x2e0] sm:$0xff]  ;;  %v4780_v10 = vpack.c.bf16 %v541_v42, %v540_v22  ;;  %v5917_v22 = vadd.f32 %v5513_v32, %v339_v46  ;;  %v6021_v63 = vld [vmem:[#allocation2 + $0x92] sm:$0xff]  ;;  %v3537_v62 = vld [vmem:[%s6627_s3 + $0x368] sm:$0xff] }
  0x3f   : > { %4903 = vmatpush3.bf16.msra.mxu0 %v4900_v11  ;;  %4372 = vmatprep.mubr.f32.mxu0 %v5620_v36  ;;  %v543_v11 = vld [vmem:[%s6627_s3 + $0x68] sm:$0xff]  ;;  %v4912_v21 = vpack.c.bf16 %v3521_v4, %v3520_v29  ;;  %v3524_v42 = vld [vmem:[%s6627_s3 + $0x300] sm:$0xff]  ;;  %v3539_v60 = vld [vmem:[%s6627_s3 + $0x378] sm:$0xff] }
  0x40   : > { %4905 = vmatprep.subr.bf16.mxu0 %v4904_v41  ;;  %4775 = vmatpush3.bf16.msra.mxu1 %v4772_v23  ;;  %6661 = vst [vmem:[#allocation9_spill] sm:$0xff] %v5917_v22  ;;  %v6631_v4 = vmax.f32 %v5917_v22, 0.0  ;;  %v3536_v46 = vld [vmem:[%s6627_s3 + $0x360] sm:$0xff]  ;;  %v6037_v17 = vld [vmem:[#allocation2 + $0xaa] sm:$0xff]  ;;  %v3463_v35 = vld [vmem:[%s6627_s3 + $0x118] sm:$0xff] }
  0x41   : > { %4053 = vmatmul.mubr.f32.gmra.mrb[8].mxu1 %v5614_v30  ;;  %4777 = vmatprep.subr.bf16.mxu1 %v4776_v5  ;;  %v542_v30 = vld [vmem:[%s6627_s3 + $0x60] sm:$0xff]  ;;  %v3541_v58 = vld [vmem:[%s6627_s3 + $0x388] sm:$0xff]  ;;  %v6088_v28 = vld [vmem:[#allocation2 + $0xf2] sm:$0xff] }
  0x42   : > { %4373 = vmatmul.mubr.f32.gmra.mrb[8].mxu0 %v5647_v51  ;;  %4055 = vmatprep.mubr.f32.mxu1 %v5620_v36  ;;  %v3523_v36 = vld [vmem:[%s6627_s3 + $0x2f8] sm:$0xff]  ;;  %v4784_v23 = vpack.c.bf16 %v543_v11, %v542_v30  ;;  %v4920_v30 = vpack.c.bf16 %v3525_v31, %v3524_v42  ;;  %497 = vst [vmem:[#allocation2 + $0x189] sm:$0xff] %v6631_v4  ;;  %v6053_v56 = vld [vmem:[#allocation2 + $0xc2] sm:$0xff]  ;;  %v3462_v31 = vld [vmem:[%s6627_s3 + $0x110] sm:$0xff] }
  0x43   : > { %4907 = vmatpush3.bf16.msra.mxu0 %v4904_v41  ;;  %4375 = vmatprep.mubr.f32.mxu0 %v5651_v54  ;;  %v544_v41 = vld [vmem:[%s6627_s3 + $0x70] sm:$0xff]  ;;  %v3527_v11 = vld [vmem:[%s6627_s3 + $0x318] sm:$0xff]  ;;  %v3540_v42 = vld [vmem:[%s6627_s3 + $0x380] sm:$0xff] }
  0x44   : > { %4909 = vmatprep.subr.bf16.mxu0 %v4908_v49  ;;  %4779 = vmatpush3.bf16.msra.mxu1 %v4776_v5  ;;  %v4916_v5 = vpack.c.bf16 %v3523_v36, %v3522_v6  ;;  %v5955_v6 = vld [vmem:[#allocation2 + $0x22] sm:$0xff]  ;;  %v6069_v0 = vld [vmem:[#allocation2 + $0xda] sm:$0xff]  ;;  %v6207_v4 = vld [vmem:[#allocation2 + $0xb0] sm:$0xff] }
  0x45   : > { %4056 = vmatmul.mubr.f32.gmra.mrb[10].mxu1 %v5647_v51  ;;  %4781 = vmatprep.subr.bf16.mxu1 %v4780_v10  ;;  %v545_v51 = vld [vmem:[%s6627_s3 + $0x78] sm:$0xff]  ;;  %6668 = vst [vmem:[#allocation16_spill] sm:$0xff] %v6207_v4  ;;  %v6236_v22 = vld [vmem:[#allocation2 + $0xe0] sm:$0xff]  ;;  %v3549_v57 = vld [vmem:[%s6627_s3 + $0x3c8] sm:$0xff] }
  0x46   : > { %4376 = vmatmul.mubr.f32.gmra.mrb[10].mxu0 %v5653_v55  ;;  %4058 = vmatprep.mubr.f32.mxu1 %v5651_v54  ;;  %v5914_v54 = vadd.f32 %v5513_v32, %v338_v45  ;;  %v3460_v32 = vld [vmem:[%s6627_s3 + $0x100] sm:$0xff]  ;;  %v3534_v45 = vld [vmem:[%s6627_s3 + $0x350] sm:$0xff]  ;;  %v3543_v47 = vld [vmem:[%s6627_s3 + $0x398] sm:$0xff] }
  0x47   : > { %4911 = vmatpush3.bf16.msra.mxu0 %v4908_v49  ;;  %4378 = vmatprep.mubr.f32.mxu0 %v5666_v1  ;;  %v4788_v49 = vpack.c.bf16 %v545_v51, %v544_v41  ;;  %v3530_v41 = vld [vmem:[%s6627_s3 + $0x330] sm:$0xff]  ;;  %v3532_v51 = vld [vmem:[%s6627_s3 + $0x340] sm:$0xff]  ;;  %v3547_v19 = vld [vmem:[%s6627_s3 + $0x3b8] sm:$0xff] }
  0x48   : > { %4913 = vmatprep.subr.bf16.mxu0 %v4912_v21  ;;  %4783 = vmatpush3.bf16.msra.mxu1 %v4780_v10  ;;  %6660 = vst [vmem:[#allocation8_spill] sm:$0xff] %v5914_v54  ;;  %v6632_v29 = vmax.f32 %v5914_v54, 0.0  ;;  %v5937_v10 = vld [vmem:[#allocation2 + $0x1a] sm:$0xff]  ;;  %v6265_v37 = vld [vmem:[#allocation2 + $0x110] sm:$0xff] }
  0x49   : > { %4059 = vmatmul.mubr.f32.gmra.mrb[12].mxu1 %v5653_v55  ;;  %4785 = vmatprep.subr.bf16.mxu1 %v4784_v23  ;;  %v3461_v55 = vld [vmem:[%s6627_s3 + $0x108] sm:$0xff]  ;;  %v3548_v54 = vld [vmem:[%s6627_s3 + $0x3c0] sm:$0xff] }
  0x4a   : > { %4379 = vmatmul.mubr.f32.gmra.mrb[12].mxu0 %v5684_v16  ;;  %4061 = vmatprep.mubr.f32.mxu1 %v5666_v1  ;;  %496 = vst [vmem:[#allocation2 + $0x181] sm:$0xff] %v6632_v29  ;;  %v3526_v1 = vld [vmem:[%s6627_s3 + $0x310] sm:$0xff]  ;;  %v6209_v29 = vld [vmem:[#allocation2 + $0xc0] sm:$0xff] }
  0x4b   : > { %4915 = vmatpush3.bf16.msra.mxu0 %v4912_v21  ;;  %4381 = vmatprep.mubr.f32.mxu0 %v5692_v25  ;;  %v5950_v21 = vpack.c.bf16 %v3461_v55, %v3460_v32  ;;  %v4924_v36 = vpack.c.bf16 %v3527_v11, %v3526_v1  ;;  %v3464_v32 = vld [vmem:[%s6627_s3 + $0x120] sm:$0xff]  ;;  %v3465_v55 = vld [vmem:[%s6627_s3 + $0x128] sm:$0xff]  ;;  %6669 = vst [vmem:[#allocation17_spill] sm:$0xff] %v6209_v29 }
  0x4c   : > { %4917 = vmatprep.subr.bf16.mxu0 %v4916_v5  ;;  %4787 = vmatpush3.bf16.msra.mxu1 %v4784_v23  ;;  %v3528_v23 = vld [vmem:[%s6627_s3 + $0x320] sm:$0xff]  ;;  %v6108_v11 = vld [vmem:[#allocation2 + $0x10a] sm:$0xff] }
  0x4d   : > { %4062 = vmatmul.mubr.f32.gmra.mrb[14].mxu1 %v5684_v16  ;;  %4789 = vmatprep.subr.bf16.mxu1 %v4788_v49  ;;  %v5957_v16 = vld [vmem:[#allocation2 + $0x32] sm:$0xff]  ;;  %v6104_v1 = vld [vmem:[#allocation2 + $0xfa] sm:$0xff]  ;;  %v1046_v26 = vld [vmem:[#allocation2 + $0xa] sm:$0xff] }
  0x4e   : > { %4382 = vmatmul.mubr.f32.gmra.mrb[14].mxu0 %v5694_v27  ;;  %4064 = vmatprep.mubr.f32.mxu1 %v5692_v25  ;;  %v3529_v25 = vld [vmem:[%s6627_s3 + $0x328] sm:$0xff] }
  0x4f   : > { %4919 = vmatpush3.bf16.msra.mxu0 %v4916_v5  ;;  %4440 = vmatprep.mubr.f32.mxu0 %v5937_v10  ;;  %v4928_v33 = vpack.c.bf16 %v3529_v25, %v3528_v23  ;;  %v3538_v5 = vld [vmem:[%s6627_s3 + $0x370] sm:$0xff]  ;;  %v3467_v23 = vld [vmem:[%s6627_s3 + $0x138] sm:$0xff] }
  0x50   : > { %4921 = vmatprep.subr.bf16.mxu0 %v4920_v30  ;;  %4791 = vmatpush3.bf16.msra.mxu1 %v4788_v49  ;;  %v6086_v49 = vld [vmem:[#allocation2 + $0x18] sm:$0xff] }
  0x51   : > { %4065 = vmatmul.mubr.f32.gmra.mrb[16].mxu1 %v5694_v27  ;;  %4793 = vmatprep.subr.bf16.mxu1 %v5950_v21  ;;  %v5973_v27 = vld [vmem:[#allocation2 + $0x4a] sm:$0xff]  ;;  %v6119_v25 = vld [vmem:[#allocation2 + $0x38] sm:$0xff] }
  0x52   : > { %4441 = vmatmul.mubr.f32.vlgmr.msra.gmra.mrb[0].mxu0 %v5955_v6  ;;  %4067 = vmatprep.mubr.f32.mxu1 %v395_v50  ;;  %v5987_v50 = vld [vmem:[#allocation2 + $0x52] sm:$0xff] }
  0x53   : > { %4923 = vmatpush3.bf16.msra.mxu0 %v4920_v30  ;;  %4443 = vmatprep.mubr.f32.mxu0 %v5957_v16  ;;  %v6100_v30 = vld [vmem:[#allocation2 + $0x20] sm:$0xff] }
  0x54   : > { %4925 = vmatprep.subr.bf16.mxu0 %v4924_v36 }
  0x55   : > { %4068 = vmatmul.mubr.f32.gmra.mrb[18].mxu1 %v396_v52  ;;  %v4932_v52 = vpack.c.bf16 %v3531_v38, %v3530_v41  ;;  %v6124_v41 = vld [vmem:[#allocation2 + $0x48] sm:$0xff] }
  0x56   : > { %4444 = vmatmul.mubr.f32.gmra.mrb[2].mxu0 %v5971_v3  ;;  %4070 = vmatprep.mubr.f32.mxu1 %v397_v53  ;;  %v6003_v53 = vld [vmem:[#allocation2 + $0x6a] sm:$0xff]  ;;  %v6126_v38 = vld [vmem:[#allocation2 + $0x122] sm:$0xff] }
  0x57   : > { %4446 = vmatprep.mubr.f32.mxu0 %v5973_v27  ;;  %4927 = vmatpush3.bf16.msra.mxu0 %v4924_v36  ;;  %v4800_v36 = vpack.c.bf16 %v3465_v55, %v3464_v32  ;;  %v6176_v32 = vld [vmem:[#allocation2 + $0x15a] sm:$0xff]  ;;  %v6178_v55 = vld [vmem:[#allocation2 + $0x90] sm:$0xff] }
  0x58   : > { %4929 = vmatprep.subr.bf16.mxu0 %v4928_v33  ;;  %6665 = vst [vmem:[#allocation13_spill] sm:$0xff] %v6178_v55 }
  0x59   : > { %4071 = vmatmul.mubr.f32.gmra.mrb[20].mxu1 %v398_v59  ;;  %v4936_v59 = vpack.c.bf16 %v3533_v40, %v3532_v51  ;;  %v3468_v51 = vld [vmem:[%s6627_s3 + $0x140] sm:$0xff]  ;;  %v3469_v40 = vld [vmem:[%s6627_s3 + $0x148] sm:$0xff] }
  0x5a   : > { %4447 = vmatmul.mubr.f32.gmra.mrb[4].mxu0 %v5987_v50  ;;  %4073 = vmatprep.mubr.f32.mxu1 %v399_v14  ;;  %v6019_v14 = vld [vmem:[#allocation2 + $0x82] sm:$0xff] }
  0x5b   : > { %4449 = vmatprep.mubr.f32.mxu0 %v5989_v39  ;;  %4931 = vmatpush3.bf16.msra.mxu0 %v4928_v33  ;;  %v6122_v33 = vld [vmem:[#allocation2 + $0x112] sm:$0xff] }
  0x5c   : > { %4933 = vmatprep.subr.bf16.mxu0 %v4932_v52 }
  0x5d   : > { %4074 = vmatmul.mubr.f32.gmra.mrb[22].mxu1 %v400_v15  ;;  %v4940_v15 = vpack.c.bf16 %v3535_v61, %v3534_v45  ;;  %v6140_v45 = vld [vmem:[#allocation2 + $0x12a] sm:$0xff]  ;;  %v6142_v61 = vld [vmem:[#allocation2 + $0x60] sm:$0xff] }
  0x5e   : > { %4450 = vmatmul.mubr.f32.gmra.mrb[6].mxu0 %v6003_v53  ;;  %4076 = vmatprep.mubr.f32.mxu1 %v401_v48  ;;  %v6035_v48 = vld [vmem:[#allocation2 + $0x9a] sm:$0xff] }
  0x5f   : > { %4452 = vmatprep.mubr.f32.mxu0 %v6005_v44  ;;  %4935 = vmatpush3.bf16.msra.mxu0 %v4932_v52 }
  0x60   : > { %4937 = vmatprep.subr.bf16.mxu0 %v4936_v59 }
  0x61   : > { %4077 = vmatmul.mubr.f32.gmra.mrb[24].mxu1 %v402_v43  ;;  %v4944_v43 = vpack.c.bf16 %v3537_v62, %v3536_v46  ;;  %v4808_v46 = vpack.c.bf16 %v3469_v40, %v3468_v51  ;;  %v3470_v62 = vld [vmem:[%s6627_s3 + $0x150] sm:$0xff]  ;;  %v6191_v51 = vld [vmem:[#allocation2 + $0x98] sm:$0xff] }
  0x62   : > { %4453 = vmatmul.mubr.f32.gmra.mrb[8].mxu0 %v6019_v14  ;;  %4079 = vmatprep.mubr.f32.mxu1 %v403_v2  ;;  %v6051_v2 = vld [vmem:[#allocation2 + $0xb2] sm:$0xff]  ;;  %6666 = vst [vmem:[#allocation14_spill] sm:$0xff] %v6191_v51 }
  0x63   : > { %4455 = vmatprep.mubr.f32.mxu0 %v6021_v63  ;;  %4939 = vmatpush3.bf16.msra.mxu0 %v4936_v59  ;;  %v6137_v59 = vld [vmem:[#allocation2 + $0x50] sm:$0xff] }
  0x64   : > { %4941 = vmatprep.subr.bf16.mxu0 %v4940_v15  ;;  %v6194_v40 = vld [vmem:[#allocation2 + $0x172] sm:$0xff] }
  0x65   : > { %4080 = vmatmul.mubr.f32.gmra.mrb[26].mxu1 %v404_v12  ;;  %v4948_v12 = vpack.c.bf16 %v3539_v60, %v3538_v5  ;;  %v6155_v5 = vld [vmem:[#allocation2 + $0x68] sm:$0xff] }
  0x66   : > { %4456 = vmatmul.mubr.f32.gmra.mrb[10].mxu0 %v6035_v48  ;;  %4082 = vmatprep.mubr.f32.mxu1 %v405_v24  ;;  %v6067_v24 = vld [vmem:[#allocation2 + $0xca] sm:$0xff]  ;;  %6662 = vst [vmem:[#allocation10_spill] sm:$0xff] %v6155_v5  ;;  %v6158_v60 = vld [vmem:[#allocation2 + $0x142] sm:$0xff] }
  0x67   : > { %4458 = vmatprep.mubr.f32.mxu0 %v6037_v17  ;;  %4943 = vmatpush3.bf16.msra.mxu0 %v4940_v15  ;;  %v6144_v15 = vld [vmem:[#allocation2 + $0x13a] sm:$0xff] }
  0x68   : > { %4945 = vmatprep.subr.bf16.mxu0 %v4944_v43 }
  0x69   : > { %4083 = vmatmul.mubr.f32.gmra.mrb[28].mxu1 %v406_v20  ;;  %v6071_v20 = vpack.c.bf16 %v3541_v58, %v3540_v42  ;;  %v6162_v42 = vld [vmem:[#allocation2 + $0x152] sm:$0xff] }
  0x6a   : > { %4459 = vmatmul.mubr.f32.gmra.mrb[12].mxu0 %v6051_v2  ;;  %4085 = vmatprep.mubr.f32.mxu1 %v407_v9  ;;  %v6084_v9 = vld [vmem:[#allocation2 + $0xe2] sm:$0xff] }
  0x6b   : > { %4461 = vmatprep.mubr.f32.mxu0 %v6053_v56  ;;  %4947 = vmatpush3.bf16.msra.mxu0 %v4944_v43  ;;  %v3471_v43 = vld [vmem:[%s6627_s3 + $0x158] sm:$0xff] }
  0x6c   : > { %4949 = vmatprep.subr.bf16.mxu0 %v4948_v12  ;;  %v4812_v58 = vpack.c.bf16 %v3471_v43, %v3470_v62  ;;  %v1993_v62 = vld [vmem:[#allocation2 + $0x182] sm:$0xff] }
  0x6d   : > { %4086 = vmatmul.mubr.f32.gmra.mrb[30].mxu1 %v408_v34  ;;  %v4796_v34 = vpack.c.bf16 %v3463_v35, %v3462_v31  ;;  %v3472_v31 = vld [vmem:[%s6627_s3 + $0x160] sm:$0xff]  ;;  %v3473_v35 = vld [vmem:[%s6627_s3 + $0x168] sm:$0xff] }
  0x6e   : > { %4462 = vmatmul.mubr.f32.gmra.mrb[14].mxu0 %v6067_v24  ;;  %4120 = vmatprep.mubr.f32.mxu1 %v5309_v7 }
  0x6f   : > { %4464 = vmatprep.mubr.f32.mxu0 %v6069_v0  ;;  %4951 = vmatpush3.bf16.msra.mxu0 %v4948_v12  ;;  %v6160_v12 = vld [vmem:[#allocation2 + $0x78] sm:$0xff] }
  0x70   : > { %4953 = vmatprep.subr.bf16.mxu0 %v6071_v20  ;;  %6663 = vst [vmem:[#allocation11_spill] sm:$0xff] %v6160_v12 }
  0x71   : > { %4121 = vmatmul.mubr.f32.vlgmr.msra.gmra.mrb[0].mxu1 %v5309_v7  ;;  %v6106_v7 = vld [vmem:[#allocation2 + $0x30] sm:$0xff] }
  0x72   : > { %4465 = vmatmul.mubr.f32.gmra.mrb[16].mxu0 %v6084_v9  ;;  %4795 = vmatpush3.bf16.msra.mxu1 %v5950_v21  ;;  %v3466_v21 = vld [vmem:[%s6627_s3 + $0x130] sm:$0xff] }
  0x73   : > { %4123 = vmatprep.mubr.f32.mxu1 %v6086_v49  ;;  %4467 = vmatprep.mubr.f32.mxu0 %v6088_v28  ;;  %v4804_v52 = vpack.c.bf16 %v3467_v23, %v3466_v21  ;;  %v4816_v21 = vpack.c.bf16 %v3473_v35, %v3472_v31  ;;  %v3474_v23 = vld [vmem:[%s6627_s3 + $0x170] sm:$0xff]  ;;  %v3476_v31 = vld [vmem:[%s6627_s3 + $0x180] sm:$0xff]  ;;  %v3477_v35 = vld [vmem:[%s6627_s3 + $0x188] sm:$0xff] }
  0x74   : > { %4797 = vmatprep.subr.bf16.mxu1 %v4796_v34 }
  0x75   : > { %4124 = vmatmul.mubr.f32.gmra.mrb[2].mxu1 %v6100_v30 }
  0x76   : > { %4468 = vmatmul.mubr.f32.gmra.mrb[18].mxu0 %v6104_v1  ;;  %4126 = vmatprep.mubr.f32.mxu1 %v6106_v7 }
  0x77   : > { %4470 = vmatprep.mubr.f32.mxu0 %v6108_v11  ;;  %4799 = vmatpush3.bf16.msra.mxu1 %v4796_v34  ;;  %v6173_v34 = vld [vmem:[#allocation2 + $0x80] sm:$0xff] }
  0x78   : > { %4801 = vmatprep.subr.bf16.mxu1 %v4800_v36  ;;  %6664 = vst [vmem:[#allocation12_spill] sm:$0xff] %v6173_v34 }
  0x79   : > { %4127 = vmatmul.mubr.f32.gmra.mrb[4].mxu1 %v6119_v25 }
  0x7a   : > { %4471 = vmatmul.mubr.f32.gmra.mrb[20].mxu0 %v6122_v33  ;;  %4129 = vmatprep.mubr.f32.mxu1 %v6124_v41 }
  0x7b   : > { %4473 = vmatprep.mubr.f32.mxu0 %v6126_v38  ;;  %4803 = vmatpush3.bf16.msra.mxu1 %v4800_v36  ;;  %v6180_v36 = vld [vmem:[#allocation2 + $0x16a] sm:$0xff] }
  0x7c   : > { %4805 = vmatprep.subr.bf16.mxu1 %v4804_v52 }
  0x7d   : > { %4130 = vmatmul.mubr.f32.gmra.mrb[6].mxu1 %v6137_v59 }
  0x7e   : > { %4474 = vmatmul.mubr.f32.gmra.mrb[22].mxu0 %v6140_v45  ;;  %4132 = vmatprep.mubr.f32.mxu1 %v6142_v61 }
  0x7f   : > { %4476 = vmatprep.mubr.f32.mxu0 %v6144_v15  ;;  %4807 = vmatpush3.bf16.msra.mxu1 %v4804_v52  ;;  %v3475_v52 = vld [vmem:[%s6627_s3 + $0x178] sm:$0xff] }
  0x80   : > { %4809 = vmatprep.subr.bf16.mxu1 %v4808_v46  ;;  %v4820_v43 = vpack.c.bf16 %v3475_v52, %v3474_v23  ;;  %v6211_v23 = vpack.c.bf16 %v3477_v35, %v3476_v31  ;;  %v3542_v52 = vld [vmem:[%s6627_s3 + $0x390] sm:$0xff]  ;;  %v3544_v35 = vld [vmem:[%s6627_s3 + $0x3a0] sm:$0xff] }
  0x81   : > { %4133 = vmatmul.mubr.f32.gmra.mrb[8].mxu1 %v6155_v5  ;;  %v4956_v31 = vpack.c.bf16 %v3543_v47, %v3542_v52  ;;  %v6240_v47 = vld [vmem:[#allocation2 + $0xf0] sm:$0xff] }
  0x82   : > { %4477 = vmatmul.mubr.f32.gmra.mrb[24].mxu0 %v6158_v60  ;;  %4135 = vmatprep.mubr.f32.mxu1 %v6160_v12  ;;  %v3546_v52 = vld [vmem:[%s6627_s3 + $0x3b0] sm:$0xff] }
  0x83   : > { %4479 = vmatprep.mubr.f32.mxu0 %v6162_v42  ;;  %4811 = vmatpush3.bf16.msra.mxu1 %v4808_v46  ;;  %v6196_v46 = vld [vmem:[#allocation2 + $0xa8] sm:$0xff] }
  0x84   : > { %4813 = vmatprep.subr.bf16.mxu1 %v4812_v58  ;;  %6667 = vst [vmem:[#allocation15_spill] sm:$0xff] %v6196_v46 }
  0x85   : > { %4136 = vmatmul.mubr.f32.gmra.mrb[10].mxu1 %v6173_v34 }
  0x86   : > { %4480 = vmatmul.mubr.f32.gmra.mrb[26].mxu0 %v6176_v32  ;;  %4138 = vmatprep.mubr.f32.mxu1 %v6178_v55 }
  0x87   : > { %4482 = vmatprep.mubr.f32.mxu0 %v6180_v36  ;;  %4815 = vmatpush3.bf16.msra.mxu1 %v4812_v58  ;;  %v1994_v58 = vld [vmem:[#allocation2 + $0x18a] sm:$0xff] }
  0x88   : > { %4817 = vmatprep.subr.bf16.mxu1 %v4816_v21 }
  0x89   : > { %4139 = vmatmul.mubr.f32.gmra.mrb[12].mxu1 %v6191_v51 }
  0x8a   : > { %4483 = vmatmul.mubr.f32.gmra.mrb[28].mxu0 %v6194_v40  ;;  %4141 = vmatprep.mubr.f32.mxu1 %v6196_v46 }
  0x8b   : > { %4485 = vmatprep.mubr.f32.mxu0 %v1993_v62  ;;  %4819 = vmatpush3.bf16.msra.mxu1 %v4816_v21  ;;  %v6221_v62 = vld [vmem:[#allocation2 + $0xc8] sm:$0xff]  ;;  %v6224_v21 = vld [vmem:[#allocation2 + $0xd8] sm:$0xff] }
  0x8c   : > { %4821 = vmatprep.subr.bf16.mxu1 %v4820_v43  ;;  %6670 = vst [vmem:[#allocation18_spill] sm:$0xff] %v6221_v62 }
  0x8d   : > { %4142 = vmatmul.mubr.f32.gmra.mrb[14].mxu1 %v6207_v4 }
  0x8e   : > { %4486 = vmatmul.mubr.f32.gmra.mrb[30].mxu0 %v1994_v58  ;;  %4144 = vmatprep.mubr.f32.mxu1 %v6209_v29  ;;  %v3545_v58 = vld [vmem:[%s6627_s3 + $0x3a8] sm:$0xff] }
  0x8f   : > { %4520 = vmatprep.mubr.f32.mxu0 %v6106_v7  ;;  %4823 = vmatpush3.bf16.msra.mxu1 %v4820_v43  ;;  %v4960_v43 = vpack.c.bf16 %v3545_v58, %v3544_v35  ;;  %v6254_v35 = vld [vmem:[#allocation2 + $0x108] sm:$0xff]  ;;  %v4964_v58 = vpack.c.bf16 %v3547_v19, %v3546_v52  ;;  %v4968_v19 = vpack.c.bf16 %v3549_v57, %v3548_v54  ;;  %v3550_v52 = vld [vmem:[%s6627_s3 + $0x3d0] sm:$0xff]  ;;  %v3552_v54 = vld [vmem:[%s6627_s3 + $0x3e0] sm:$0xff] }
  0x90   : > { %4825 = vmatprep.subr.bf16.mxu1 %v6211_v23 }
  0x91   : > { %4145 = vmatmul.mubr.f32.gmra.mrb[16].mxu1 %v6221_v62 }
  0x92   : > { %4521 = vmatmul.mubr.f32.vlgmr.msra.gmra.mrb[0].mxu0 %v6119_v25  ;;  %4147 = vmatprep.mubr.f32.mxu1 %v6224_v21 }
  0x93   : > { %4955 = vmatpush3.bf16.msra.mxu0 %v6071_v20  ;;  %4523 = vmatprep.mubr.f32.mxu0 %v6124_v41  ;;  %v6251_v20 = vld [vmem:[#allocation2 + $0xf8] sm:$0xff] }
  0x94   : > { %4957 = vmatprep.subr.bf16.mxu0 %v4956_v31 }
  0x95   : > { %4148 = vmatmul.mubr.f32.gmra.mrb[18].mxu1 %v6236_v22 }
  0x96   : > { %4524 = vmatmul.mubr.f32.gmra.mrb[2].mxu0 %v6137_v59  ;;  %4150 = vmatprep.mubr.f32.mxu1 %v6240_v47 }
  0x97   : > { %4526 = vmatprep.mubr.f32.mxu0 %v6142_v61  ;;  %4959 = vmatpush3.bf16.msra.mxu0 %v4956_v31  ;;  %v6268_v31 = vld [vmem:[#allocation2 + $0x120] sm:$0xff] }
  0x98   : > { %4961 = vmatprep.subr.bf16.mxu0 %v4960_v43 }
  0x99   : > { %4151 = vmatmul.mubr.f32.gmra.mrb[20].mxu1 %v6251_v20 }
  0x9a   : > { %4527 = vmatmul.mubr.f32.gmra.mrb[4].mxu0 %v6155_v5  ;;  %4153 = vmatprep.mubr.f32.mxu1 %v6254_v35  ;;  %v3551_v5 = vld [vmem:[%s6627_s3 + $0x3d8] sm:$0xff] }
  0x9b   : > { %4529 = vmatprep.mubr.f32.mxu0 %v6160_v12  ;;  %4963 = vmatpush3.bf16.msra.mxu0 %v4960_v43  ;;  %v6279_v12 = vld [vmem:[#allocation2 + $0x128] sm:$0xff]  ;;  %v6282_v43 = vld [vmem:[#allocation2 + $0x138] sm:$0xff]  ;;  %v4972_v57 = vpack.c.bf16 %v3551_v5, %v3550_v52  ;;  %v3554_v52 = vld [vmem:[%s6627_s3 + $0x3f0] sm:$0xff] }
  0x9c   : > { %4965 = vmatprep.subr.bf16.mxu0 %v4964_v58 }
  0x9d   : > { %4154 = vmatmul.mubr.f32.gmra.mrb[22].mxu1 %v6265_v37 }
  0x9e   : > { %4530 = vmatmul.mubr.f32.gmra.mrb[6].mxu0 %v6173_v34  ;;  %4156 = vmatprep.mubr.f32.mxu1 %v6268_v31  ;;  %v3553_v34 = vld [vmem:[%s6627_s3 + $0x3e8] sm:$0xff] }
  0x9f   : > { %4532 = vmatprep.mubr.f32.mxu0 %v6178_v55  ;;  %4967 = vmatpush3.bf16.msra.mxu0 %v4964_v58  ;;  %v6293_v55 = vld [vmem:[#allocation2 + $0x140] sm:$0xff]  ;;  %v6296_v58 = vld [vmem:[#allocation2 + $0x150] sm:$0xff]  ;;  %v4976_v5 = vpack.c.bf16 %v3553_v34, %v3552_v54 }
  0xa0   : > { %4969 = vmatprep.subr.bf16.mxu0 %v4968_v19  ;;  %v3556_v54 = vld [vmem:[%s6627_s3 + $0x400] sm:$0xff] }
  0xa1   : > { %4157 = vmatmul.mubr.f32.gmra.mrb[24].mxu1 %v6279_v12 }
  0xa2   : > { %4533 = vmatmul.mubr.f32.gmra.mrb[8].mxu0 %v6191_v51  ;;  %4159 = vmatprep.mubr.f32.mxu1 %v6282_v43  ;;  %v3555_v51 = vld [vmem:[%s6627_s3 + $0x3f8] sm:$0xff] }
  0xa3   : > { %4535 = vmatprep.mubr.f32.mxu0 %v6196_v46  ;;  %4971 = vmatpush3.bf16.msra.mxu0 %v4968_v19  ;;  %v6307_v46 = vld [vmem:[#allocation2 + $0x158] sm:$0xff]  ;;  %v6310_v19 = vld [vmem:[#allocation2 + $0x168] sm:$0xff]  ;;  %v4980_v34 = vpack.c.bf16 %v3555_v51, %v3554_v52  ;;  %v3478_v52 = vld [vmem:[%s6627_s3 + $0x190] sm:$0xff] }
  0xa4   : > { %4973 = vmatprep.subr.bf16.mxu0 %v4972_v57 }
  0xa5   : > { %4160 = vmatmul.mubr.f32.gmra.mrb[26].mxu1 %v6293_v55 }
  0xa6   : > { %4536 = vmatmul.mubr.f32.gmra.mrb[10].mxu0 %v6207_v4  ;;  %4162 = vmatprep.mubr.f32.mxu1 %v6296_v58  ;;  %v3557_v4 = vld [vmem:[%s6627_s3 + $0x408] sm:$0xff] }
  0xa7   : > { %4538 = vmatprep.mubr.f32.mxu0 %v6209_v29  ;;  %4975 = vmatpush3.bf16.msra.mxu0 %v4972_v57  ;;  %v6321_v29 = vld [vmem:[#allocation2 + $0x170] sm:$0xff]  ;;  %v1045_v57 = vld [vmem:[#allocation2 + $0x2] sm:$0xff]  ;;  %v6324_v51 = vpack.c.bf16 %v3557_v4, %v3556_v54 }
  0xa8   : > { %4977 = vmatprep.subr.bf16.mxu0 %v4976_v5  ;;  %v3480_v4 = vld [vmem:[%s6627_s3 + $0x1a0] sm:$0xff]  ;;  %v3481_v54 = vld [vmem:[%s6627_s3 + $0x1a8] sm:$0xff] }
  0xa9   : > { %4163 = vmatmul.mubr.f32.gmra.mrb[28].mxu1 %v6307_v46 }
  0xaa   : > { %4539 = vmatmul.mubr.f32.gmra.mrb[12].mxu0 %v6221_v62  ;;  %4165 = vmatprep.mubr.f32.mxu1 %v6310_v19  ;;  %v3479_v62 = vld [vmem:[%s6627_s3 + $0x198] sm:$0xff] }
  0xab   : > { %4541 = vmatprep.mubr.f32.mxu0 %v6224_v21  ;;  %4979 = vmatpush3.bf16.msra.mxu0 %v4976_v5  ;;  %v4828_v5 = vpack.c.bf16 %v3479_v62, %v3478_v52  ;;  %v4832_v62 = vpack.c.bf16 %v3481_v54, %v3480_v4  ;;  %v3489_v52 = vld [vmem:[%s6627_s3 + $0x1e8] sm:$0xff]  ;;  %v3491_v4 = vld [vmem:[%s6627_s3 + $0x1f8] sm:$0xff] }
  0xac   : > { %4981 = vmatprep.subr.bf16.mxu0 %v4980_v34 }
  0xad   : > { %4166 = vmatmul.mubr.f32.gmra.mrb[30].mxu1 %v6321_v29 }
  0xae   : > { %4542 = vmatmul.mubr.f32.gmra.mrb[14].mxu0 %v6236_v22  ;;  %4200 = vmatprep.mubr.f32.mxu1 %v1045_v57  ;;  %v3487_v57 = vld [vmem:[%s6627_s3 + $0x1d8] sm:$0xff] }
  0xaf   : > { %4544 = vmatprep.mubr.f32.mxu0 %v6240_v47  ;;  %4983 = vmatpush3.bf16.msra.mxu0 %v4980_v34  ;;  %v3483_v34 = vld [vmem:[%s6627_s3 + $0x1b8] sm:$0xff] }
  0xb0   : > { %4985 = vmatprep.subr.bf16.mxu0 %v6324_v51 }
  0xb1   : > { %4201 = vmatmul.mubr.f32.vlgmr.msra.gmra.mrb[0].mxu1 %v1046_v26  ;;  %v3482_v26 = vld [vmem:[%s6627_s3 + $0x1b0] sm:$0xff] }
  0xb2   : > { %4545 = vmatmul.mubr.f32.gmra.mrb[16].mxu0 %v6251_v20  ;;  %4827 = vmatpush3.bf16.msra.mxu1 %v6211_v23  ;;  %v3485_v23 = vld [vmem:[%s6627_s3 + $0x1c8] sm:$0xff] }
  0xb3   : > { %4203 = vmatprep.mubr.f32.mxu1 %v5937_v10  ;;  %4547 = vmatprep.mubr.f32.mxu0 %v6254_v35  ;;  %v4836_v10 = vpack.c.bf16 %v3483_v34, %v3482_v26  ;;  %v3559_v26 = vld [vmem:[%s6627_s3 + $0x418] sm:$0xff] }
  0xb4   : > { %4829 = vmatprep.subr.bf16.mxu1 %v4828_v5 }
  0xb5   : > { %4204 = vmatmul.mubr.f32.gmra.mrb[2].mxu1 %v5955_v6  ;;  %v3484_v6 = vld [vmem:[%s6627_s3 + $0x1c0] sm:$0xff] }
  0xb6   : > { %4548 = vmatmul.mubr.f32.gmra.mrb[18].mxu0 %v6265_v37  ;;  %4206 = vmatprep.mubr.f32.mxu1 %v5957_v16  ;;  %v4840_v16 = vpack.c.bf16 %v3485_v23, %v3484_v6  ;;  %v2580_v6 = vld [vmem:[#allocation2 + $0x61] sm:$0xff] }
  0xb7   : > { %4550 = vmatprep.mubr.f32.mxu0 %v6268_v31  ;;  %4831 = vmatpush3.bf16.msra.mxu1 %v4828_v5 }
  0xb8   : > { %4833 = vmatprep.subr.bf16.mxu1 %v4832_v62 }
  0xb9   : > { %4207 = vmatmul.mubr.f32.gmra.mrb[4].mxu1 %v5971_v3  ;;  %v3486_v3 = vld [vmem:[%s6627_s3 + $0x1d0] sm:$0xff] }
  0xba   : > { %4551 = vmatmul.mubr.f32.gmra.mrb[20].mxu0 %v6279_v12  ;;  %4209 = vmatprep.mubr.f32.mxu1 %v5973_v27  ;;  %v4844_v27 = vpack.c.bf16 %v3487_v57, %v3486_v3  ;;  %v3565_v57 = vld [vmem:[%s6627_s3 + $0x448] sm:$0xff] }
  0xbb   : > { %4553 = vmatprep.mubr.f32.mxu0 %v6282_v43  ;;  %4835 = vmatpush3.bf16.msra.mxu1 %v4832_v62  ;;  %v2576_v62 = vld [vmem:[#allocation2 + $0x31] sm:$0xff] }
  0xbc   : > { %4837 = vmatprep.subr.bf16.mxu1 %v4836_v10 }
  0xbd   : > { %4210 = vmatmul.mubr.f32.gmra.mrb[6].mxu1 %v5987_v50  ;;  %v3488_v50 = vld [vmem:[%s6627_s3 + $0x1e0] sm:$0xff] }
  0xbe   : > { %4554 = vmatmul.mubr.f32.gmra.mrb[22].mxu0 %v6293_v55  ;;  %4212 = vmatprep.mubr.f32.mxu1 %v5989_v39  ;;  %v6386_v39 = vld [vmem:[#allocation2 + $0x180] sm:$0xff]  ;;  %v4848_v5 = vpack.c.bf16 %v3489_v52, %v3488_v50  ;;  %v3567_v52 = vld [vmem:[%s6627_s3 + $0x458] sm:$0xff] }
  0xbf   : > { %4556 = vmatprep.mubr.f32.mxu0 %v6296_v58  ;;  %4839 = vmatpush3.bf16.msra.mxu1 %v4836_v10  ;;  %v3561_v10 = vld [vmem:[%s6627_s3 + $0x428] sm:$0xff] }
  0xc0   : > { %4841 = vmatprep.subr.bf16.mxu1 %v4840_v16 }
  0xc1   : > { %4213 = vmatmul.mubr.f32.gmra.mrb[8].mxu1 %v6003_v53  ;;  %v3490_v53 = vld [vmem:[%s6627_s3 + $0x1f0] sm:$0xff] }
  0xc2   : > { %4557 = vmatmul.mubr.f32.gmra.mrb[24].mxu0 %v6307_v46  ;;  %4215 = vmatprep.mubr.f32.mxu1 %v6005_v44  ;;  %v6398_v44 = vld [vmem:[#allocation2 + $0x188] sm:$0xff]  ;;  %v4852_v54 = vpack.c.bf16 %v3491_v4, %v3490_v53 }
  0xc3   : > { %4559 = vmatprep.mubr.f32.mxu0 %v6310_v19  ;;  %4843 = vmatpush3.bf16.msra.mxu1 %v4840_v16  ;;  %v3563_v16 = vld [vmem:[%s6627_s3 + $0x438] sm:$0xff]  ;;  %v3569_v4 = vld [vmem:[%s6627_s3 + $0x468] sm:$0xff] }
  0xc4   : > { %4845 = vmatprep.subr.bf16.mxu1 %v4844_v27 }
  0xc5   : > { %4216 = vmatmul.mubr.f32.gmra.mrb[10].mxu1 %v6019_v14  ;;  %v5297_v14 = vld [vmem:[#allocation2] sm:$0xff] }
  0xc6   : > { %4560 = vmatmul.mubr.f32.gmra.mrb[26].mxu0 %v6321_v29  ;;  %4218 = vmatprep.mubr.f32.mxu1 %v6021_v63  ;;  %v3558_v63 = vld [vmem:[%s6627_s3 + $0x410] sm:$0xff] }
  0xc7   : > { %4562 = vmatprep.mubr.f32.mxu0 %v6386_v39  ;;  %4847 = vmatpush3.bf16.msra.mxu1 %v4844_v27  ;;  %v4988_v34 = vpack.c.bf16 %v3559_v26, %v3558_v63  ;;  %v2584_v27 = vld [vmem:[#allocation2 + $0x91] sm:$0xff]  ;;  %v6461_v63 = vld [vmem:[#allocation2 + $0xd9] sm:$0xff] }
  0xc8   : > { %4849 = vmatprep.subr.bf16.mxu1 %v4848_v5 }
  0xc9   : > { %4219 = vmatmul.mubr.f32.gmra.mrb[12].mxu1 %v6035_v48  ;;  %v2577_v48 = vld [vmem:[#allocation2 + $0x39] sm:$0xff] }
  0xca   : > { %4563 = vmatmul.mubr.f32.gmra.mrb[28].mxu0 %v6398_v44  ;;  %4221 = vmatprep.mubr.f32.mxu1 %v6037_v17  ;;  %v2578_v17 = vld [vmem:[#allocation2 + $0x49] sm:$0xff] }
  0xcb   : > { %4565 = vmatprep.mubr.f32.mxu0 %v5297_v14  ;;  %4851 = vmatpush3.bf16.msra.mxu1 %v4848_v5  ;;  %v2586_v5 = vld [vmem:[#allocation2 + $0xa9] sm:$0xff] }
  0xcc   : > { %4853 = vmatprep.subr.bf16.mxu1 %v4852_v54 }
  0xcd   : > { %4222 = vmatmul.mubr.f32.gmra.mrb[14].mxu1 %v6051_v2  ;;  %v3560_v2 = vld [vmem:[%s6627_s3 + $0x420] sm:$0xff] }
  0xce   : > { %4566 = vmatmul.mubr.f32.gmra.mrb[30].mxu0 %v5297_v14  ;;  %4224 = vmatprep.mubr.f32.mxu1 %v6053_v56  ;;  %v2579_v56 = vld [vmem:[#allocation2 + $0x51] sm:$0xff]  ;;  %v4992_v23 = vpack.c.bf16 %v3561_v10, %v3560_v2  ;;  %v6677_v2 = vld [vmem:[#allocation5_spill] sm:$0xff]  ;;  %v6678_v10 = vld [vmem:[#allocation14_spill] sm:$0xff] }
  0xcf   : > { %4600 = vmatprep.mubr.f32.mxu0 %v2576_v62  ;;  %4855 = vmatpush3.bf16.msra.mxu1 %v4852_v54  ;;  %v2588_v54 = vld [vmem:[#allocation2 + $0xc1] sm:$0xff]  ;;  %v3571_v62 = vld [vmem:[%s6627_s3 + $0x478] sm:$0xff] }
  0xd0   : > { %5016 = vmatprep.subr.bf16.mxu1 %v5433_v8 }
  0xd1   : > { %4225 = vmatmul.mubr.f32.gmra.mrb[16].mxu1 %v6067_v24  ;;  %v3562_v24 = vld [vmem:[%s6627_s3 + $0x430] sm:$0xff] }
  0xd2   : > { %4601 = vmatmul.mubr.f32.vlgmr.msra.gmra.mrb[0].mxu0 %v2577_v48  ;;  %4227 = vmatprep.mubr.f32.mxu1 %v6069_v0  ;;  %v2581_v0 = vld [vmem:[#allocation2 + $0x69] sm:$0xff]  ;;  %v4996_v3 = vpack.c.bf16 %v3563_v16, %v3562_v24  ;;  %v6468_v48 = vld [vmem:[#allocation2 + $0xf1] sm:$0xff]  ;;  %v2606_v16 = vld [vmem:[#allocation2 + $0x199] sm:$0xff] }
  0xd3   : > { %4987 = vmatpush3.bf16.msra.mxu0 %v6324_v51  ;;  %4603 = vmatprep.mubr.f32.mxu0 %v2578_v17  ;;  %v2582_v51 = vld [vmem:[#allocation2 + $0x79] sm:$0xff] }
  0xd4   : > { %4989 = vmatprep.subr.bf16.mxu0 %v4988_v34  ;;  %v5298_v17 = vld [vmem:[#allocation2 + $0x159] sm:$0xff] }
  0xd5   : > { %4228 = vmatmul.mubr.f32.gmra.mrb[18].mxu1 %v6084_v9  ;;  %v3564_v9 = vld [vmem:[%s6627_s3 + $0x440] sm:$0xff] }
  0xd6   : > { %4604 = vmatmul.mubr.f32.gmra.mrb[2].mxu0 %v2579_v56  ;;  %4230 = vmatprep.mubr.f32.mxu1 %v6088_v28  ;;  %v2583_v28 = vld [vmem:[#allocation2 + $0x81] sm:$0xff]  ;;  %v5000_v50 = vpack.c.bf16 %v3565_v57, %v3564_v9  ;;  %v5300_v56 = vld [vmem:[#allocation2 + $0x171] sm:$0xff] }
  0xd7   : > { %4606 = vmatprep.mubr.f32.mxu0 %v2580_v6  ;;  %4991 = vmatpush3.bf16.msra.mxu0 %v4988_v34  ;;  %v5299_v34 = vld [vmem:[#allocation2 + $0x169] sm:$0xff]  ;;  %v6686_v57 = vld [vmem:[#allocation17_spill] sm:$0xff] }
  0xd8   : > { %4993 = vmatprep.subr.bf16.mxu0 %v4992_v23  ;;  %v6679_v6 = vld [vmem:[#allocation15_spill] sm:$0xff] }
  0xd9   : > { %4231 = vmatmul.mubr.f32.gmra.mrb[20].mxu1 %v6104_v1  ;;  %v3566_v1 = vld [vmem:[%s6627_s3 + $0x450] sm:$0xff] }
  0xda   : > { %4607 = vmatmul.mubr.f32.gmra.mrb[4].mxu0 %v2581_v0  ;;  %4233 = vmatprep.mubr.f32.mxu1 %v6108_v11  ;;  %v2585_v11 = vld [vmem:[#allocation2 + $0x99] sm:$0xff]  ;;  %v5004_v53 = vpack.c.bf16 %v3567_v52, %v3566_v1  ;;  %v6682_v0 = vld [vmem:[#allocation6_spill] sm:$0xff] }
  0xdb   : > { %4609 = vmatprep.mubr.f32.mxu0 %v2582_v51  ;;  %4995 = vmatpush3.bf16.msra.mxu0 %v4992_v23  ;;  %v6680_v23 = vld [vmem:[#allocation8_spill] sm:$0xff]  ;;  %v6688_v1 = vld [vmem:[#allocation18_spill] sm:$0xff] }
  0xdc   : > { %4997 = vmatprep.subr.bf16.mxu0 %v4996_v3  ;;  %v6681_v24 = vmax.f32 %v6680_v23, 0.0  ;;  %v6683_v51 = vld [vmem:[#allocation16_spill] sm:$0xff] }
  0xdd   : > { %4234 = vmatmul.mubr.f32.gmra.mrb[22].mxu1 %v6122_v33  ;;  %v3568_v33 = vld [vmem:[%s6627_s3 + $0x460] sm:$0xff] }
  0xde   : > { %4610 = vmatmul.mubr.f32.gmra.mrb[6].mxu0 %v2583_v28  ;;  %4236 = vmatprep.mubr.f32.mxu1 %v6126_v38  ;;  %v2587_v38 = vld [vmem:[#allocation2 + $0xb1] sm:$0xff]  ;;  %v5008_v14 = vpack.c.bf16 %v3569_v4, %v3568_v33  ;;  %v2607_v28 = vld [vmem:[#allocation2 + $0x1a1] sm:$0xff] }
  0xdf   : > { %4612 = vmatprep.mubr.f32.mxu0 %v2584_v27  ;;  %4999 = vmatpush3.bf16.msra.mxu0 %v4996_v3  ;;  %v6684_v3 = vld [vmem:[#allocation9_spill] sm:$0xff]  ;;  %v2882_v27 = vld [vmem:[#allocation2 + $0x32] sm:$0xff] }
  0xe0   : > { %5001 = vmatprep.subr.bf16.mxu0 %v5000_v50  ;;  %v6685_v9 = vmax.f32 %v6684_v3, 0.0  ;;  %v2883_v52 = vld [vmem:[#allocation2 + $0x3a] sm:$0xff]  ;;  %v2890_v4 = vld [vmem:[#allocation2 + $0x92] sm:$0xff] }
  0xe1   : > { %4237 = vmatmul.mubr.f32.gmra.mrb[24].mxu1 %v6140_v45  ;;  %v3570_v45 = vld [vmem:[%s6627_s3 + $0x470] sm:$0xff]  ;;  %v2888_v33 = vld [vmem:[#allocation2 + $0x7a] sm:$0xff] }
  0xe2   : > { %4613 = vmatmul.mubr.f32.gmra.mrb[8].mxu0 %v2585_v11  ;;  %4239 = vmatprep.mubr.f32.mxu1 %v6144_v15  ;;  %v2589_v15 = vld [vmem:[#allocation2 + $0xc9] sm:$0xff]  ;;  %v5012_v26 = vpack.c.bf16 %v3571_v62, %v3570_v45  ;;  %v1684_v62 = vld [vmem:[#allocation2 + $0x159] sm:$0xff] }
  0xe3   : > { %4615 = vmatprep.mubr.f32.mxu0 %v2586_v5  ;;  %5003 = vmatpush3.bf16.msra.mxu0 %v5000_v50  ;;  %v6687_v50 = vld [vmem:[#allocation7_spill] sm:$0xff] }
  0xe4   : > { %5005 = vmatprep.subr.bf16.mxu0 %v5004_v53  ;;  %v2884_v11 = vld [vmem:[#allocation2 + $0x4a] sm:$0xff]  ;;  %v2885_v5 = vld [vmem:[#allocation2 + $0x52] sm:$0xff] }
  0xe5   : > { %4240 = vmatmul.mubr.f32.gmra.mrb[26].mxu1 %v6158_v60  ;;  %v6466_v60 = vld [vmem:[#allocation2 + $0xe1] sm:$0xff]  ;;  %v2908_v45 = vld [vmem:[#allocation2 + $0x16a] sm:$0xff] }
  0xe6   : > { %4616 = vmatmul.mubr.f32.gmra.mrb[10].mxu0 %v2587_v38  ;;  %4242 = vmatprep.mubr.f32.mxu1 %v6162_v42  ;;  %v6474_v42 = vld [vmem:[#allocation2 + $0xf9] sm:$0xff]  ;;  %v2905_v38 = vld [vmem:[#allocation2 + $0x142] sm:$0xff] }
  0xe7   : > { %4618 = vmatprep.mubr.f32.mxu0 %v2588_v54  ;;  %5007 = vmatpush3.bf16.msra.mxu0 %v5004_v53  ;;  %v2886_v53 = vld [vmem:[#allocation2 + $0x62] sm:$0xff]  ;;  %v2906_v54 = vld [vmem:[#allocation2 + $0x152] sm:$0xff] }
  0xe8   : > { %5009 = vmatprep.subr.bf16.mxu0 %v5008_v14 }
  0xe9   : > { %4243 = vmatmul.mubr.f32.gmra.mrb[28].mxu1 %v6176_v32  ;;  %v6476_v32 = vld [vmem:[#allocation2 + $0x109] sm:$0xff] }
  0xea   : > { %4619 = vmatmul.mubr.f32.gmra.mrb[12].mxu0 %v2589_v15  ;;  %4245 = vmatprep.mubr.f32.mxu1 %v6180_v36  ;;  %v6483_v36 = vld [vmem:[#allocation2 + $0x111] sm:$0xff] }
  0xeb   : > { %4621 = vmatprep.mubr.f32.mxu0 %v6461_v63  ;;  %5011 = vmatpush3.bf16.msra.mxu0 %v5008_v14  ;;  %v2907_v14 = vld [vmem:[#allocation2 + $0x15a] sm:$0xff]  ;;  %v2909_v15 = vld [vmem:[#allocation2 + $0x172] sm:$0xff] }
  0xec   : > { %5013 = vmatprep.subr.bf16.mxu0 %v5012_v26 }
  0xed   : > { %4246 = vmatmul.mubr.f32.gmra.mrb[30].mxu1 %v6194_v40  ;;  %v6673_v40 = vld [vmem:[#allocation11_spill] sm:$0xff] }
  0xee   : > { %4622 = vmatmul.mubr.f32.gmra.mrb[14].mxu0 %v6466_v60  ;;  %4280 = vmatprep.mubr.f32.mxu1 %v6086_v49  ;;  %v6485_v49 = vld [vmem:[#allocation2 + $0x121] sm:$0xff] }
  0xef   : > { %4624 = vmatprep.mubr.f32.mxu0 %v6468_v48  ;;  %5015 = vmatpush3.bf16.msra.mxu0 %v5012_v26  ;;  %v2910_v26 = vld [vmem:[#allocation2 + $0x182] sm:$0xff] }
  0xf1   : > { %4281 = vmatmul.mubr.f32.vlgmr.msra.gmra.mrb[0].mxu1 %v6100_v30  ;;  %v6492_v30 = vld [vmem:[#allocation2 + $0x129] sm:$0xff] }
  0xf2   : > { %4625 = vmatmul.mubr.f32.gmra.mrb[16].mxu0 %v6474_v42  ;;  %5024 = vmatpush3.bf16.msra.mxu1 %v5433_v8  ;;  %v6495_v8 = vld [vmem:[#allocation2 + $0x139] sm:$0xff] }
  0xf3   : > { %4283 = vmatprep.mubr.f32.mxu1 %v6106_v7  ;;  %4627 = vmatprep.mubr.f32.mxu0 %v6476_v32  ;;  %v6502_v7 = vld [vmem:[#allocation2 + $0x141] sm:$0xff] }
  0xf4   : > { %5017 = vmatprep.subr.bf16.mxu1 %v5451_v13 }
  0xf5   : > { %4284 = vmatmul.mubr.f32.gmra.mrb[2].mxu1 %v6119_v25  ;;  %v6505_v25 = vld [vmem:[#allocation2 + $0x151] sm:$0xff] }
  0xf6   : > { %4628 = vmatmul.mubr.f32.gmra.mrb[18].mxu0 %v6483_v36  ;;  %4286 = vmatprep.mubr.f32.mxu1 %v6124_v41  ;;  %v6671_v41 = vld [vmem:[#allocation3_spill] sm:$0xff] }
  0xf7   : > { %4630 = vmatprep.mubr.f32.mxu0 %v6485_v49  ;;  %5025 = vmatpush3.bf16.msra.mxu1 %v5451_v13  ;;  %v6672_v13 = vld [vmem:[#allocation10_spill] sm:$0xff] }
  0xf8   : > { %5018 = vmatprep.subr.bf16.mxu1 %v5467_v18 }
  0xf9   : > { %4287 = vmatmul.mubr.f32.gmra.mrb[4].mxu1 %v6137_v59  ;;  %v6674_v59 = vld [vmem:[#allocation4_spill] sm:$0xff] }
  0xfa   : > { %4631 = vmatmul.mubr.f32.gmra.mrb[20].mxu0 %v6492_v30  ;;  %4289 = vmatprep.mubr.f32.mxu1 %v6142_v61  ;;  %v6675_v61 = vld [vmem:[#allocation12_spill] sm:$0xff] }
  0xfb   : > { %4633 = vmatprep.mubr.f32.mxu0 %v6495_v8  ;;  %5026 = vmatpush3.bf16.msra.mxu1 %v5467_v18  ;;  %v6676_v18 = vld [vmem:[#allocation13_spill] sm:$0xff] }
  0xfc   : > { %5019 = vmatprep.subr.bf16.mxu1 %v6671_v41 }
  0xfd   : > { %4290 = vmatmul.mubr.f32.gmra.mrb[6].mxu1 %v6672_v13 }
  0xfe   : > { %4634 = vmatmul.mubr.f32.gmra.mrb[22].mxu0 %v6502_v7  ;;  %4292 = vmatprep.mubr.f32.mxu1 %v6673_v40 }
  0xff   : > { %4636 = vmatprep.mubr.f32.mxu0 %v6505_v25  ;;  %5027 = vmatpush3.bf16.msra.mxu1 %v6671_v41 }
 0x100   : > { %5020 = vmatprep.subr.bf16.mxu1 %v6674_v59 }
 0x101   : > { %4293 = vmatmul.mubr.f32.gmra.mrb[8].mxu1 %v6675_v61 }
 0x102   : > { %4637 = vmatmul.mubr.f32.gmra.mrb[24].mxu0 %v5298_v17  ;;  %4295 = vmatprep.mubr.f32.mxu1 %v6676_v18 }
 0x103   : > { %4639 = vmatprep.mubr.f32.mxu0 %v5299_v34  ;;  %5028 = vmatpush3.bf16.msra.mxu1 %v6674_v59 }
 0x104   : > { %5021 = vmatprep.subr.bf16.mxu1 %v6677_v2 }
 0x105   : > { %4296 = vmatmul.mubr.f32.gmra.mrb[10].mxu1 %v6678_v10 }
 0x106   : > { %4640 = vmatmul.mubr.f32.gmra.mrb[26].mxu0 %v5300_v56  ;;  %4298 = vmatprep.mubr.f32.mxu1 %v6679_v6 }
 0x107   : > { %4642 = vmatprep.mubr.f32.mxu0 %v6681_v24  ;;  %5029 = vmatpush3.bf16.msra.mxu1 %v6677_v2 }
 0x108   : > { %5022 = vmatprep.subr.bf16.mxu1 %v6682_v0 }
 0x109   : > { %4299 = vmatmul.mubr.f32.gmra.mrb[12].mxu1 %v6683_v51 }
 0x10a   : > { %4643 = vmatmul.mubr.f32.gmra.mrb[28].mxu0 %v6685_v9  ;;  %4301 = vmatprep.mubr.f32.mxu1 %v6686_v57 }
 0x10b   : > { %4645 = vmatprep.mubr.f32.mxu0 %v2606_v16  ;;  %5030 = vmatpush3.bf16.msra.mxu1 %v6682_v0 }
 0x10c   : > { %5023 = vmatprep.subr.bf16.mxu1 %v6687_v50 }
 0x10d   : > { %4302 = vmatmul.mubr.f32.gmra.mrb[14].mxu1 %v6688_v1 }
 0x10e   : > { %4646 = vmatmul.mubr.f32.gmra.mrb[30].mxu0 %v2607_v28  ;;  %4304 = vmatprep.mubr.f32.mxu1 %v6224_v21  ;;  %v2887_v21 = vld [vmem:[#allocation2 + $0x6a] sm:$0xff] }
 0x10f   : > { %4680 = vmatprep.mubr.f32.mxu0 %v2882_v27  ;;  %5031 = vmatpush3.bf16.msra.mxu1 %v6687_v50 }
 0x111   : > { %4305 = vmatmul.mubr.f32.gmra.mrb[16].mxu1 %v6236_v22  ;;  %v2889_v22 = vld [vmem:[#allocation2 + $0x82] sm:$0xff] }
 0x112   : > { %4681 = vmatmul.mubr.f32.vlgmr.msra.gmra.mrb[0].mxu0 %v2883_v52  ;;  %4307 = vmatprep.mubr.f32.mxu1 %v6240_v47  ;;  %v2891_v47 = vld [vmem:[#allocation2 + $0x9a] sm:$0xff] }
 0x113   : > { %4683 = vmatprep.mubr.f32.mxu0 %v2884_v11 }
 0x115   : > { %4308 = vmatmul.mubr.f32.gmra.mrb[18].mxu1 %v6251_v20  ;;  %v2892_v20 = vld [vmem:[#allocation2 + $0xaa] sm:$0xff] }
 0x116   : > { %4684 = vmatmul.mubr.f32.gmra.mrb[2].mxu0 %v2885_v5  ;;  %4310 = vmatprep.mubr.f32.mxu1 %v6254_v35  ;;  %v2894_v35 = vld [vmem:[#allocation2 + $0xc2] sm:$0xff] }
 0x117   : > { %4686 = vmatprep.mubr.f32.mxu0 %v2886_v53 }
 0x119   : > { %4311 = vmatmul.mubr.f32.gmra.mrb[20].mxu1 %v6265_v37  ;;  %v2893_v37 = vld [vmem:[#allocation2 + $0xb2] sm:$0xff] }
 0x11a   : > { %4687 = vmatmul.mubr.f32.gmra.mrb[4].mxu0 %v2887_v21  ;;  %4313 = vmatprep.mubr.f32.mxu1 %v6268_v31  ;;  %v2896_v31 = vld [vmem:[#allocation2 + $0xda] sm:$0xff] }
 0x11b   : > { %4689 = vmatprep.mubr.f32.mxu0 %v2888_v33 }
 0x11d   : > { %4314 = vmatmul.mubr.f32.gmra.mrb[22].mxu1 %v6279_v12  ;;  %v2895_v12 = vld [vmem:[#allocation2 + $0xca] sm:$0xff] }
 0x11e   : > { %4690 = vmatmul.mubr.f32.gmra.mrb[6].mxu0 %v2889_v22  ;;  %4316 = vmatprep.mubr.f32.mxu1 %v6282_v43  ;;  %v2898_v43 = vld [vmem:[#allocation2 + $0xf2] sm:$0xff] }
 0x11f   : > { %4692 = vmatprep.mubr.f32.mxu0 %v2890_v4 }
 0x121   : > { %4317 = vmatmul.mubr.f32.gmra.mrb[24].mxu1 %v6293_v55  ;;  %v2897_v55 = vld [vmem:[#allocation2 + $0xe2] sm:$0xff] }
 0x122   : > { %4693 = vmatmul.mubr.f32.gmra.mrb[8].mxu0 %v2891_v47  ;;  %4319 = vmatprep.mubr.f32.mxu1 %v6296_v58  ;;  %v2900_v58 = vld [vmem:[#allocation2 + $0x10a] sm:$0xff] }
 0x123   : > { %4695 = vmatprep.mubr.f32.mxu0 %v2892_v20 }
 0x125   : > { %4320 = vmatmul.mubr.f32.gmra.mrb[26].mxu1 %v6307_v46  ;;  %v2899_v46 = vld [vmem:[#allocation2 + $0xfa] sm:$0xff] }
 0x126   : > { %4696 = vmatmul.mubr.f32.gmra.mrb[10].mxu0 %v2893_v37  ;;  %4322 = vmatprep.mubr.f32.mxu1 %v6310_v19  ;;  %v2902_v19 = vld [vmem:[#allocation2 + $0x122] sm:$0xff] }
 0x127   : > { %4698 = vmatprep.mubr.f32.mxu0 %v2894_v35 }
 0x129   : > { %4323 = vmatmul.mubr.f32.gmra.mrb[28].mxu1 %v6321_v29  ;;  %v2901_v29 = vld [vmem:[#allocation2 + $0x112] sm:$0xff] }
 0x12a   : > { %4699 = vmatmul.mubr.f32.gmra.mrb[12].mxu0 %v2895_v12  ;;  %4325 = vmatprep.mubr.f32.mxu1 %v6386_v39  ;;  %v2903_v39 = vld [vmem:[#allocation2 + $0x12a] sm:$0xff] }
 0x12b   : > { %4701 = vmatprep.mubr.f32.mxu0 %v2896_v31 }
 0x12d   : > { %4326 = vmatmul.mubr.f32.gmra.mrb[30].mxu1 %v6398_v44  ;;  %v2904_v44 = vld [vmem:[#allocation2 + $0x13a] sm:$0xff] }
 0x12e   : > { %4702 = vmatmul.mubr.f32.gmra.mrb[14].mxu0 %v2897_v55  ;;  %4384 = vmatprep.mubr.f32.mxu1 %v6461_v63  ;;  %v1685_v63 = vld [vmem:[#allocation2 + $0x169] sm:$0xff] }
 0x12f   : > { %4704 = vmatprep.mubr.f32.mxu0 %v2898_v43 }
 0x131   : > { %4385 = vmatmul.mubr.f32.vlgmr.msra.gmra.mrb[16].mxu1 %v6466_v60  ;;  %v1686_v60 = vld [vmem:[#allocation2 + $0x171] sm:$0xff] }
 0x132   : > { %4705 = vmatmul.mubr.f32.gmra.mrb[16].mxu0 %v2899_v46  ;;  %4387 = vmatprep.mubr.f32.mxu1 %v6468_v48  ;;  %v2911_v48 = vld [vmem:[#allocation2 + $0x18a] sm:$0xff] }
 0x133   : > { %4707 = vmatprep.mubr.f32.mxu0 %v2900_v58 }
 0x135   : > { %4388 = vmatmul.mubr.f32.gmra.mrb[18].mxu1 %v6474_v42  ;;  %v1687_v42 = vld [vmem:[#allocation2 + $0x181] sm:$0xff] }
 0x136   : > { %4708 = vmatmul.mubr.f32.gmra.mrb[18].mxu0 %v2901_v29  ;;  %4390 = vmatprep.mubr.f32.mxu1 %v6476_v32  ;;  %v2912_v32 = vld [vmem:[#allocation2 + $0x19a] sm:$0xff] }
 0x137   : > { %4710 = vmatprep.mubr.f32.mxu0 %v2902_v19 }
 0x139   : > { %4391 = vmatmul.mubr.f32.gmra.mrb[20].mxu1 %v6483_v36  ;;  %v1688_v36 = vld [vmem:[#allocation2 + $0x189] sm:$0xff] }
 0x13a   : > { %4711 = vmatmul.mubr.f32.gmra.mrb[20].mxu0 %v2903_v39  ;;  %4393 = vmatprep.mubr.f32.mxu1 %v6485_v49  ;;  %v2913_v49 = vld [vmem:[#allocation2 + $0x1a2] sm:$0xff] }
 0x13b   : > { %4713 = vmatprep.mubr.f32.mxu0 %v2904_v44 }
 0x13d   : > { %4394 = vmatmul.mubr.f32.gmra.mrb[22].mxu1 %v6492_v30 }
 0x13e   : > { %4714 = vmatmul.mubr.f32.gmra.mrb[22].mxu0 %v2905_v38  ;;  %4396 = vmatprep.mubr.f32.mxu1 %v6495_v8 }
 0x13f   : > { %4716 = vmatprep.mubr.f32.mxu0 %v2906_v54 }
 0x141   : > { %4397 = vmatmul.mubr.f32.gmra.mrb[24].mxu1 %v6502_v7 }
 0x142   : > { %4717 = vmatmul.mubr.f32.gmra.mrb[24].mxu0 %v2907_v14  ;;  %4399 = vmatprep.mubr.f32.mxu1 %v6505_v25 }
 0x143   : > { %4719 = vmatprep.mubr.f32.mxu0 %v2908_v45 }
 0x145   : > { %4400 = vmatmul.mubr.f32.gmra.mrb[26].mxu1 %v1684_v62 }
 0x146   : > { %4720 = vmatmul.mubr.f32.gmra.mrb[26].mxu0 %v2909_v15  ;;  %4402 = vmatprep.mubr.f32.mxu1 %v1685_v63 }
 0x147   : > { %4722 = vmatprep.mubr.f32.mxu0 %v2910_v26 }
 0x149   : > { %4403 = vmatmul.mubr.f32.gmra.mrb[28].mxu1 %v1686_v60 }
 0x14a   : > { %4723 = vmatmul.mubr.f32.gmra.mrb[28].mxu0 %v2911_v48  ;;  %4405 = vmatprep.mubr.f32.mxu1 %v1687_v42 }
 0x14b   : > { %4725 = vmatprep.mubr.f32.mxu0 %v2912_v32 }
 0x14d   : > { %4406 = vmatmul.mubr.f32.gmra.mrb[30].mxu1 %v1688_v36 }
 0x14e   : > { %4726 = vmatmul.mubr.f32.gmra.mrb[30].mxu0 %v2913_v49 }
 0x1c4   : > { %v4282_v30 = vpop.f32.mrb[0].mxu1 }
 0x1c5   : > { %v1466_v8 = vpop.f32.mrb[1].mxu1 }
 0x1c8   : > { %v4285_v7 = vpop.f32.mrb[2].mxu1 }
 0x1c9   : > { %v1476_v25 = vpop.f32.mrb[3].mxu1 }
 0x1cc   : > { %v4288_v41 = vpop.f32.mrb[4].mxu1 }
 0x1cd   : > { %v1486_v13 = vpop.f32.mrb[5].mxu1 }
 0x1d0   : > { %v4291_v40 = vpop.f32.mrb[6].mxu1 }
 0x1d1   : > { %v1496_v59 = vpop.f32.mrb[7].mxu1 }
 0x1d4   : > { %v4294_v61 = vpop.f32.mrb[8].mxu1 }
 0x1d5   : > { %v1506_v17 = vpop.f32.mrb[9].mxu1 }
 0x1d8   : > { %v4297_v18 = vpop.f32.mrb[10].mxu1 }
 0x1d9   : > { %v6559_v34 = vpop.f32.mrb[11].mxu1 }
 0x1dc   : > { %v6561_v2 = vpop.f32.mrb[12].mxu1 }
 0x1dd   : > { %v6563_v10 = vpop.f32.mrb[13].mxu1 }
 0x1e0   : > { %v6565_v56 = vpop.f32.mrb[14].mxu1 }
 0x1e1   : > { %v6567_v6 = vpop.f32.mrb[15].mxu1 }
 0x1e5   : > { %v4682_v23 = vpop.f32.mrb[0].mxu0 }
 0x1e6   : > { %v5032_v24 = vadd.f32 %v4682_v23, %v4282_v30  ;;  %v2997_v16 = vpop.f32.mrb[1].mxu0 }
 0x1e7   : > { %v5033_v0 = vadd.f32 %v2997_v16, %v1466_v8 }
 0x1e8   : > { %3189 = vst [vmem:[%s6574_s7 + $0x8] sm:$0xff] %v5032_v24  ;;  %v3259_v51 = vmul.f32 %v5032_v24, %v5032_v24 }
 0x1e9   : > { %3188 = vst [vmem:[%s6574_s7] sm:$0xff] %v5033_v0  ;;  %v3220_v3 = vadd.f32 %v5033_v0, %v5032_v24  ;;  %v3258_v9 = vmul.f32 %v5033_v0, %v5033_v0  ;;  %v4685_v57 = vpop.f32.mrb[2].mxu0 }
 0x1ea   : > { %v5034_v28 = vadd.f32 %v4685_v57, %v4285_v7  ;;  %v3007_v27 = vpop.f32.mrb[3].mxu0 }
 0x1eb   : > { %v3290_v50 = vadd.f32 %v3259_v51, %v3258_v9  ;;  %v5035_v1 = vadd.f32 %v3007_v27, %v1476_v25 }
 0x1ec   : > { %3191 = vst [vmem:[%s6574_s7 + $0x18] sm:$0xff] %v5034_v28  ;;  %v3261_v33 = vmul.f32 %v5034_v28, %v5034_v28 }
 0x1ed   : > { %3190 = vst [vmem:[%s6574_s7 + $0x10] sm:$0xff] %v5035_v1  ;;  %v3221_v52 = vadd.f32 %v5035_v1, %v3220_v3  ;;  %v3260_v11 = vmul.f32 %v5035_v1, %v5035_v1  ;;  %v4688_v5 = vpop.f32.mrb[4].mxu0 }
 0x1ee   : > { %v5036_v53 = vadd.f32 %v4688_v5, %v4288_v41  ;;  %v3017_v21 = vpop.f32.mrb[5].mxu0 }
 0x1ef   : > { %v3291_v22 = vadd.f32 %v3290_v50, %v3260_v11  ;;  %v5037_v4 = vadd.f32 %v3017_v21, %v1486_v13  ;;  %v3222_v47 = vadd.f32 %v5034_v28, %v3221_v52 }
 0x1f0   : > { %3193 = vst [vmem:[%s6574_s7 + $0x28] sm:$0xff] %v5036_v53  ;;  %v3263_v43 = vmul.f32 %v5036_v53, %v5036_v53 }
 0x1f1   : > { %3192 = vst [vmem:[%s6574_s7 + $0x20] sm:$0xff] %v5037_v4  ;;  %v3223_v20 = vadd.f32 %v5037_v4, %v3222_v47  ;;  %v3262_v37 = vmul.f32 %v5037_v4, %v5037_v4  ;;  %v3292_v35 = vadd.f32 %v3291_v22, %v3261_v33  ;;  %v4691_v12 = vpop.f32.mrb[6].mxu0 }
 0x1f2   : > { %v5038_v31 = vadd.f32 %v4691_v12, %v4291_v40  ;;  %v3027_v55 = vpop.f32.mrb[7].mxu0 }
 0x1f3   : > { %v3293_v46 = vadd.f32 %v3292_v35, %v3262_v37  ;;  %v5039_v58 = vadd.f32 %v3027_v55, %v1496_v59  ;;  %v3224_v29 = vadd.f32 %v5036_v53, %v3223_v20 }
 0x1f4   : > { %3195 = vst [vmem:[%s6574_s7 + $0x38] sm:$0xff] %v5038_v31  ;;  %v3265_v45 = vmul.f32 %v5038_v31, %v5038_v31 }
 0x1f5   : > { %3194 = vst [vmem:[%s6574_s7 + $0x30] sm:$0xff] %v5039_v58  ;;  %v3225_v19 = vadd.f32 %v5039_v58, %v3224_v29  ;;  %v3264_v39 = vmul.f32 %v5039_v58, %v5039_v58  ;;  %v3294_v44 = vadd.f32 %v3293_v46, %v3263_v43  ;;  %v4694_v38 = vpop.f32.mrb[8].mxu0 }
 0x1f6   : > { %v5040_v54 = vadd.f32 %v4694_v38, %v4294_v61  ;;  %v3037_v14 = vpop.f32.mrb[9].mxu0 }
 0x1f7   : > { %v3295_v62 = vadd.f32 %v3294_v44, %v3264_v39  ;;  %v5041_v15 = vadd.f32 %v3037_v14, %v1506_v17  ;;  %v3226_v63 = vadd.f32 %v5038_v31, %v3225_v19 }
 0x1f8   : > { %3197 = vst [vmem:[%s6574_s7 + $0x48] sm:$0xff] %v5040_v54  ;;  %v3267_v49 = vmul.f32 %v5040_v54, %v5040_v54 }
 0x1f9   : > { %3196 = vst [vmem:[%s6574_s7 + $0x40] sm:$0xff] %v5041_v15  ;;  %v3227_v26 = vadd.f32 %v5041_v15, %v3226_v63  ;;  %v3266_v60 = vmul.f32 %v5041_v15, %v5041_v15  ;;  %v3296_v48 = vadd.f32 %v3295_v62, %v3265_v45  ;;  %v4697_v42 = vpop.f32.mrb[10].mxu0 }
 0x1fa   : > { %v5042_v32 = vadd.f32 %v4697_v42, %v4297_v18  ;;  %v3047_v36 = vpop.f32.mrb[11].mxu0 }
 0x1fb   : > { %v3297_v30 = vadd.f32 %v3296_v48, %v3266_v60  ;;  %v5043_v8 = vadd.f32 %v3047_v36, %v6559_v34  ;;  %v3228_v7 = vadd.f32 %v5040_v54, %v3227_v26 }
 0x1fc   : > { %3199 = vst [vmem:[%s6574_s7 + $0x58] sm:$0xff] %v5042_v32  ;;  %v3269_v17 = vmul.f32 %v5042_v32, %v5042_v32 }
 0x1fd   : > { %3198 = vst [vmem:[%s6574_s7 + $0x50] sm:$0xff] %v5043_v8  ;;  %v3229_v25 = vadd.f32 %v5043_v8, %v3228_v7  ;;  %v3268_v41 = vmul.f32 %v5043_v8, %v5043_v8  ;;  %v3298_v13 = vadd.f32 %v3297_v30, %v3267_v49  ;;  %v4700_v40 = vpop.f32.mrb[12].mxu0 }
 0x1fe   : > { %v5044_v59 = vadd.f32 %v4700_v40, %v6561_v2  ;;  %v3057_v61 = vpop.f32.mrb[13].mxu0 }
 0x1ff   : > { %v3299_v18 = vadd.f32 %v3298_v13, %v3268_v41  ;;  %v5045_v23 = vadd.f32 %v3057_v61, %v6563_v10  ;;  %v3230_v24 = vadd.f32 %v5042_v32, %v3229_v25 }
 0x200   : > { %3201 = vst [vmem:[%s6574_s7 + $0x68] sm:$0xff] %v5044_v59  ;;  %v3271_v57 = vmul.f32 %v5044_v59, %v5044_v59 }
 0x201   : > { %3200 = vst [vmem:[%s6574_s7 + $0x60] sm:$0xff] %v5045_v23  ;;  %v3231_v34 = vadd.f32 %v5045_v23, %v3230_v24  ;;  %v3270_v16 = vmul.f32 %v5045_v23, %v5045_v23  ;;  %v3300_v0 = vadd.f32 %v3299_v18, %v3269_v17  ;;  %v4703_v51 = vpop.f32.mrb[14].mxu0 }
 0x202   : > { %v5046_v3 = vadd.f32 %v4703_v51, %v6565_v56  ;;  %v3067_v9 = vpop.f32.mrb[15].mxu0 }
 0x203   : > { %v3301_v28 = vadd.f32 %v3300_v0, %v3270_v16  ;;  %v5047_v2 = vadd.f32 %v3067_v9, %v6567_v6  ;;  %v3232_v27 = vadd.f32 %v5044_v59, %v3231_v34 }
 0x204   : > { %3203 = vst [vmem:[%s6574_s7 + $0x78] sm:$0xff] %v5046_v3  ;;  %v4386_v10 = vpop.f32.mrb[16].mxu1  ;;  %v3273_v33 = vmul.f32 %v5046_v3, %v5046_v3 }
 0x205   : > { %3202 = vst [vmem:[%s6574_s7 + $0x70] sm:$0xff] %v5047_v2  ;;  %v3233_v50 = vadd.f32 %v5047_v2, %v3232_v27  ;;  %v3272_v1 = vmul.f32 %v5047_v2, %v5047_v2  ;;  %v3302_v52 = vadd.f32 %v3301_v28, %v3271_v57  ;;  %v4706_v11 = vpop.f32.mrb[16].mxu0  ;;  %v1852_v5 = vpop.f32.mrb[17].mxu1 }
 0x206   : > { %v5048_v53 = vadd.f32 %v4706_v11, %v4386_v10  ;;  %v3077_v21 = vpop.f32.mrb[17].mxu0 }
 0x207   : > { %v3303_v56 = vadd.f32 %v3302_v52, %v3272_v1  ;;  %v5049_v22 = vadd.f32 %v3077_v21, %v1852_v5  ;;  %v3234_v4 = vadd.f32 %v5046_v3, %v3233_v50 }
 0x208   : > { %3205 = vst [vmem:[%s6574_s7 + $0x88] sm:$0xff] %v5048_v53  ;;  %v4389_v6 = vpop.f32.mrb[18].mxu1  ;;  %v3275_v43 = vmul.f32 %v5048_v53, %v5048_v53 }
 0x209   : > { %3204 = vst [vmem:[%s6574_s7 + $0x80] sm:$0xff] %v5049_v22  ;;  %v3235_v47 = vadd.f32 %v5049_v22, %v3234_v4  ;;  %v3274_v20 = vmul.f32 %v5049_v22, %v5049_v22  ;;  %v3304_v37 = vadd.f32 %v3303_v56, %v3273_v33  ;;  %v4709_v35 = vpop.f32.mrb[18].mxu0  ;;  %v1862_v12 = vpop.f32.mrb[19].mxu1 }
 0x20a   : > { %v5050_v31 = vadd.f32 %v4709_v35, %v4389_v6  ;;  %v3087_v55 = vpop.f32.mrb[19].mxu0 }
 0x20b   : > { %v3305_v46 = vadd.f32 %v3304_v37, %v3274_v20  ;;  %v5051_v58 = vadd.f32 %v3087_v55, %v1862_v12  ;;  %v3236_v29 = vadd.f32 %v5048_v53, %v3235_v47 }
 0x20c   : > { %3207 = vst [vmem:[%s6574_s7 + $0x98] sm:$0xff] %v5050_v31  ;;  %v4392_v19 = vpop.f32.mrb[20].mxu1  ;;  %v3277_v15 = vmul.f32 %v5050_v31, %v5050_v31 }
 0x20d   : > { %3206 = vst [vmem:[%s6574_s7 + $0x90] sm:$0xff] %v5051_v58  ;;  %v3237_v39 = vadd.f32 %v5051_v58, %v3236_v29  ;;  %v3276_v44 = vmul.f32 %v5051_v58, %v5051_v58  ;;  %v3306_v38 = vadd.f32 %v3305_v46, %v3275_v43  ;;  %v4712_v54 = vpop.f32.mrb[20].mxu0  ;;  %v1872_v14 = vpop.f32.mrb[21].mxu1 }
 0x20e   : > { %v5052_v45 = vadd.f32 %v4712_v54, %v4392_v19  ;;  %v3097_v62 = vpop.f32.mrb[21].mxu0 }
 0x20f   : > { %v3307_v63 = vadd.f32 %v3306_v38, %v3276_v44  ;;  %v5053_v26 = vadd.f32 %v3097_v62, %v1872_v14  ;;  %v3238_v60 = vadd.f32 %v5050_v31, %v3237_v39 }
 0x210   : > { %3209 = vst [vmem:[%s6574_s7 + $0xa8] sm:$0xff] %v5052_v45  ;;  %v4395_v48 = vpop.f32.mrb[22].mxu1  ;;  %v3279_v25 = vmul.f32 %v5052_v45, %v5052_v45 }
 0x211   : > { %3208 = vst [vmem:[%s6574_s7 + $0xa0] sm:$0xff] %v5053_v26  ;;  %v3239_v42 = vadd.f32 %v5053_v26, %v3238_v60  ;;  %v3278_v32 = vmul.f32 %v5053_v26, %v5053_v26  ;;  %v3308_v36 = vadd.f32 %v3307_v63, %v3277_v15  ;;  %v4715_v49 = vpop.f32.mrb[22].mxu0  ;;  %v1882_v30 = vpop.f32.mrb[23].mxu1 }
 0x212   : > { %v5054_v8 = vadd.f32 %v4715_v49, %v4395_v48  ;;  %v3107_v7 = vpop.f32.mrb[23].mxu0 }
 0x213   : > { %v3309_v41 = vadd.f32 %v3308_v36, %v3278_v32  ;;  %v5055_v13 = vadd.f32 %v3107_v7, %v1882_v30  ;;  %v3240_v40 = vadd.f32 %v5052_v45, %v3239_v42 }
 0x214   : > { %3211 = vst [vmem:[%s6574_s7 + $0xb8] sm:$0xff] %v5054_v8  ;;  %v4398_v59 = vpop.f32.mrb[24].mxu1  ;;  %v3281_v0 = vmul.f32 %v5054_v8, %v5054_v8 }
 0x215   : > { %3210 = vst [vmem:[%s6574_s7 + $0xb0] sm:$0xff] %v5055_v13  ;;  %v3241_v61 = vadd.f32 %v5055_v13, %v3240_v40  ;;  %v3280_v17 = vmul.f32 %v5055_v13, %v5055_v13  ;;  %v3310_v18 = vadd.f32 %v3309_v41, %v3279_v25  ;;  %v4718_v23 = vpop.f32.mrb[24].mxu0  ;;  %v1892_v24 = vpop.f32.mrb[25].mxu1 }
 0x216   : > { %v5056_v34 = vadd.f32 %v4718_v23, %v4398_v59  ;;  %v3117_v16 = vpop.f32.mrb[25].mxu0 }
 0x217   : > { %v3311_v51 = vadd.f32 %v3310_v18, %v3280_v17  ;;  %v5057_v3 = vadd.f32 %v3117_v16, %v1892_v24  ;;  %v3242_v9 = vadd.f32 %v5054_v8, %v3241_v61 }
 0x218   : > { %3213 = vst [vmem:[%s6574_s7 + $0xc8] sm:$0xff] %v5056_v34  ;;  %v4401_v57 = vpop.f32.mrb[26].mxu1  ;;  %v3283_v11 = vmul.f32 %v5056_v34, %v5056_v34 }
 0x219   : > { %3212 = vst [vmem:[%s6574_s7 + $0xc0] sm:$0xff] %v5057_v3  ;;  %v3243_v28 = vadd.f32 %v5057_v3, %v3242_v9  ;;  %v3282_v2 = vmul.f32 %v5057_v3, %v5057_v3  ;;  %v3312_v27 = vadd.f32 %v3311_v51, %v3281_v0  ;;  %v4721_v10 = vpop.f32.mrb[26].mxu0  ;;  %v1902_v50 = vpop.f32.mrb[27].mxu1 }
 0x21a   : > { %v5058_v1 = vadd.f32 %v4721_v10, %v4401_v57  ;;  %v3127_v52 = vpop.f32.mrb[27].mxu0 }
 0x21b   : > { %v3313_v5 = vadd.f32 %v3312_v27, %v3282_v2  ;;  %v5059_v53 = vadd.f32 %v3127_v52, %v1902_v50  ;;  %v3244_v21 = vadd.f32 %v5056_v34, %v3243_v28 }
 0x21c   : > { %3215 = vst [vmem:[%s6574_s7 + $0xd8] sm:$0xff] %v5058_v1  ;;  %v4404_v33 = vpop.f32.mrb[28].mxu1  ;;  %v3285_v35 = vmul.f32 %v5058_v1, %v5058_v1 }
 0x21d   : > { %3214 = vst [vmem:[%s6574_s7 + $0xd0] sm:$0xff] %v5059_v53  ;;  %v3245_v56 = vadd.f32 %v5059_v53, %v3244_v21  ;;  %v3284_v22 = vmul.f32 %v5059_v53, %v5059_v53  ;;  %v3314_v4 = vadd.f32 %v3313_v5, %v3283_v11  ;;  %v4724_v6 = vpop.f32.mrb[28].mxu0  ;;  %v1912_v47 = vpop.f32.mrb[29].mxu1 }
 0x21e   : > { %v5060_v20 = vadd.f32 %v4724_v6, %v4404_v33  ;;  %v3137_v37 = vpop.f32.mrb[29].mxu0 }
 0x21f   : > { %v3315_v12 = vadd.f32 %v3314_v4, %v3284_v22  ;;  %v5061_v31 = vadd.f32 %v3137_v37, %v1912_v47  ;;  %v3246_v55 = vadd.f32 %v5058_v1, %v3245_v56 }
 0x220   : > { %3217 = vst [vmem:[%s6574_s7 + $0xe8] sm:$0xff] %v5060_v20  ;;  %v4407_v43 = vpop.f32.mrb[30].mxu1  ;;  %v3287_v54 = vmul.f32 %v5060_v20, %v5060_v20 }
 0x221   : > { %3216 = vst [vmem:[%s6574_s7 + $0xe0] sm:$0xff] %v5061_v31  ;;  %v3247_v46 = vadd.f32 %v5061_v31, %v3246_v55  ;;  %v3286_v58 = vmul.f32 %v5061_v31, %v5061_v31  ;;  %v3316_v29 = vadd.f32 %v3315_v12, %v3285_v35  ;;  %v4727_v19 = vpop.f32.mrb[30].mxu0  ;;  %v1922_v39 = vpop.f32.mrb[31].mxu1 }
 0x222   : > { %v5062_v44 = vadd.f32 %v4727_v19, %v4407_v43  ;;  %v3147_v38 = vpop.f32.mrb[31].mxu0 }
 0x223   : > { %v3317_v14 = vadd.f32 %v3316_v29, %v3286_v58  ;;  %v5063_v45 = vadd.f32 %v3147_v38, %v1922_v39  ;;  %v3248_v62 = vadd.f32 %v5060_v20, %v3247_v46 }
 0x224   : > { %3219 = vst [vmem:[%s6574_s7 + $0xf8] sm:$0xff] %v5062_v44  ;;  %v3289_v60 = vmul.f32 %v5062_v44, %v5062_v44 }
 0x225   : > { %3218 = vst [vmem:[%s6574_s7 + $0xf0] sm:$0xff] %v5063_v45  ;;  %v3249_v15 = vadd.f32 %v5063_v45, %v3248_v62  ;;  %v3288_v63 = vmul.f32 %v5063_v45, %v5063_v45  ;;  %v3318_v26 = vadd.f32 %v3317_v14, %v3287_v54 }
 0x227   : > { %v3250_v48 = vadd.f32 %v5062_v44, %v3249_v15  ;;  %v3319_v42 = vadd.f32 %v3318_v26, %v3288_v63 }
 0x229   : > { %v3251_v32 = vrot.slane %v3250_v48, 4  ;;  %v3320_v36 = vadd.f32 %v3319_v42, %v3289_v60 }
 0x22b   : > { %v3252_v49 = vadd.f32 %v3251_v32, %v3250_v48  ;;  %v3321_v30 = vrot.slane %v3320_v36, 4 }
 0x22d   : > { %v3253_v8 = vrot.slane %v3252_v49, 2  ;;  %v3322_v7 = vadd.f32 %v3321_v30, %v3320_v36 }
 0x22f   : > { %v3254_v25 = vadd.f32 %v3253_v8, %v3252_v49  ;;  %v3323_v41 = vrot.slane %v3322_v7, 2 }
 0x231   : > { %v3255_v13 = vrot.slane %v3254_v25, 1  ;;  %v3324_v40 = vadd.f32 %v3323_v41, %v3322_v7 }
 0x233   : > { %v3256_v59 = vadd.f32 %v3255_v13, %v3254_v25  ;;  %v3325_v61 = vrot.slane %v3324_v40, 1 }
 0x235   : > { %3257 = vst [vmem:[%s265_s9] sm:$0x1] %v3256_v59  ;;  %v3326_v17 = vadd.f32 %v3325_v61, %v3324_v40 }
 0x237   : > { %3327 = vst [vmem:[%s268_s12] sm:$0x1] %v3326_v17 }
 0x238 PF: > { %s17_s21 = sadd.s32 1, %s5307_s21  }
 0x239   : > { %p14_p4 = scmp.ge.s32.totalorder %s17_s21, 4  }
 0x23b   :  { %16 = sbr.rel (!%p14_p4) target bundleno = 1 (0x1), region = 100 }

</bundles_post_ra>
